<compile_context>
chip_gen: v6e
topology: v6e:2x2x1
jax: 0.10.0
libtpu: 0.0.40
codegen_flags: <defaults>
</compile_context>

<pallas_src>
import functools

import jax
import jax.numpy as jnp
import numpy as np
from jax.experimental import pallas as pl
from jax.experimental.pallas import tpu as pltpu


# ------------------------------ fused kernel --------------------------------
def _generator_kernel(x_ref, w1, b1, w2, b2, w3, b3, w4, b4, out_ref,
                      a1, a2, a3, a4, patch, *, hq, wq):
    # Zero the padded activation buffers (their 1-cell border is the conv pad).
    a1[...] = jnp.zeros_like(a1)
    a2[...] = jnp.zeros_like(a2)
    a3[...] = jnp.zeros_like(a3)
    a4[...] = jnp.zeros_like(a4)

    # Load this batch element's space-to-depth input into the padded buffer.
    for i in range(hq):
        a1[1 + i, 1:wq + 1, :] = x_ref[0, i, :, :]

    def layer(pin, w_ref, b_ref, act):
        cin = pin.shape[-1]
        k = 9 * cin
        # im2col for a 3x3 stride-1 window: only contiguous static slices.
        for dh in range(3):
            for dw in range(3):
                col0 = (dh * 3 + dw) * cin
                for i in range(hq):
                    patch[i * wq:(i + 1) * wq, col0:col0 + cin] = (
                        pin[i + dh, dw:dw + wq, :])
        lhs = patch[:, :k].astype(jnp.bfloat16)
        y = jnp.dot(lhs, w_ref[...], preferred_element_type=jnp.float32)
        y = y + b_ref[...]
        if act == "relu":
            y = jnp.maximum(y, 0.0)
        else:
            y = jnp.tanh(y)
        return y                                       # (hq*wq, nout) f32

    def store(pout, y):
        for i in range(hq):
            pout[1 + i, 1:wq + 1, :] = y[i * wq:(i + 1) * wq, :]

    y1 = layer(a1, w1, b1, "relu")     # enc1 -> S2D(Y1):  (hq*wq, 256)
    store(a2, y1)
    y2 = layer(a2, w2, b2, "relu")     # enc2 ->      Y2:  (hq*wq, 128)
    store(a3, y2)
    y3 = layer(a3, w3, b3, "relu")     # dec1 -> S2D(Z1):  (hq*wq, 256)
    store(a4, y3)
    y4 = layer(a4, w4, b4, "tanh")     # dec2 -> S4D(out): (hq*wq, 48)
    for i in range(hq):
        out_ref[0, i, :, :] = y4[i * wq:(i + 1) * wq, :]


# -------------------------------- wrapper ------------------------------------
@jax.jit
def generator_forward(x_nchw, packed):
    b, c, h, w = x_nchw.shape                      # c == 3, h % 4 == w % 4 == 0
    hq, wq = h // 4, w // 4
    cs4 = 16 * c                                   # stride-4 space-to-depth chans

    # Prologue (tiny XLA fusion): NCHW -> quarter-res grid with 4x4 phase in C.
    xs = jnp.transpose(x_nchw, (0, 2, 3, 1))
    xs = xs.reshape(b, hq, 4, wq, 4, c).transpose(0, 1, 3, 2, 4, 5)
    xs = xs.reshape(b, hq, wq, cs4).astype(jnp.float32)

    out = pl.pallas_call(
        functools.partial(_generator_kernel, hq=hq, wq=wq),
        out_shape=jax.ShapeDtypeStruct((b, hq, wq, cs4), jnp.float32),
        grid=(b,),
        in_specs=[
            pl.BlockSpec((1, hq, wq, cs4), lambda i: (i, 0, 0, 0)),
            pl.BlockSpec(packed["w1"].shape, lambda i: (0, 0)),
            pl.BlockSpec(packed["b1"].shape, lambda i: (0, 0)),
            pl.BlockSpec(packed["w2"].shape, lambda i: (0, 0)),
            pl.BlockSpec(packed["b2"].shape, lambda i: (0, 0)),
            pl.BlockSpec(packed["w3"].shape, lambda i: (0, 0)),
            pl.BlockSpec(packed["b3"].shape, lambda i: (0, 0)),
            pl.BlockSpec(packed["w4"].shape, lambda i: (0, 0)),
            pl.BlockSpec(packed["b4"].shape, lambda i: (0, 0)),
        ],
        out_specs=pl.BlockSpec((1, hq, wq, cs4), lambda i: (i, 0, 0, 0)),
        scratch_shapes=[
            pltpu.VMEM((hq + 2, wq + 2, cs4), jnp.float32),   # padded enc1 in
            pltpu.VMEM((hq + 2, wq + 2, 256), jnp.float32),   # padded enc2 in
            pltpu.VMEM((hq + 2, wq + 2, 128), jnp.float32),   # padded dec1 in
            pltpu.VMEM((hq + 2, wq + 2, 256), jnp.float32),   # padded dec2 in
            pltpu.VMEM((hq * wq, 9 * 256), jnp.float32),      # shared im2col buf
        ],
        compiler_params=pltpu.CompilerParams(
            dimension_semantics=("parallel",)),
    )(xs, packed["w1"], packed["b1"], packed["w2"], packed["b2"],
      packed["w3"], packed["b3"], packed["w4"], packed["b4"])

    # Epilogue (tiny XLA fusion): quarter-res / phase-in-C -> NCHW.
    y = out.reshape(b, hq, wq, 4, 4, c).transpose(0, 5, 1, 3, 2, 4)
    return y.reshape(b, c, h, w)


# --------------------------- one-time weight packing -------------------------
def pack_params(p):
    """Pack PyTorch-layout conv weights into per-layer (9*Cin_eff, Cout_eff)
    matmul weights for the 3x3 stride-1 quarter-res formulation."""
    w1 = np.asarray(p["enc1_w"], np.float32)   # (64, 3, 4, 4)   Conv2d  (out,in,kh,kw)
    b1 = np.asarray(p["enc1_b"], np.float32)
    w2 = np.asarray(p["enc2_w"], np.float32)   # (128, 64, 4, 4)
    b2 = np.asarray(p["enc2_b"], np.float32)
    w3 = np.asarray(p["dec1_w"], np.float32)   # (128, 64, 4, 4) ConvT   (in,out,kh,kw)
    b3 = np.asarray(p["dec1_b"], np.float32)
    w4 = np.asarray(p["dec2_w"], np.float32)   # (64, 3, 4, 4)
    b4 = np.asarray(p["dec2_b"], np.float32)

    # enc1: input chans (rr, cc, ci) = x[4I+rr, 4J+cc, ci]; output chans
    # (u, v, co) = Y1[2I+u, 2J+v, co].
    wp1 = np.zeros((9 * 48, 256), np.float32)
    for dh in range(3):
        for dw in range(3):
            t = dh * 3 + dw
            for u in range(2):
                for rr in range(4):
                    kh = 4 * (dh - 1) + rr + 1 - 2 * u
                    if not 0 <= kh < 4:
                        continue
                    for v in range(2):
                        for cc in range(4):
                            kw = 4 * (dw - 1) + cc + 1 - 2 * v
                            if not 0 <= kw < 4:
                                continue
                            r0 = t * 48 + (rr * 4 + cc) * 3
                            c0 = (u * 2 + v) * 64
                            wp1[r0:r0 + 3, c0:c0 + 64] = w1[:, :, kh, kw].T
    bp1 = np.tile(b1, 4)[None, :]

    # enc2: input chans (u, v, c) of Y1; output chans = Y2 channels.
    wp2 = np.zeros((9 * 256, 128), np.float32)
    for dh in range(3):
        for dw in range(3):
            t = dh * 3 + dw
            for u in range(2):
                kh = 2 * (dh - 1) + u + 1
                if not 0 <= kh < 4:
                    continue
                for v in range(2):
                    kw = 2 * (dw - 1) + v + 1
                    if not 0 <= kw < 4:
                        continue
                    r0 = t * 256 + (u * 2 + v) * 64
                    wp2[r0:r0 + 64, :] = w2[:, :, kh, kw].T
    bp2 = b2[None, :]

    # dec1: ConvTranspose; output chans (r, s, c) = Z1[2I+r, 2J+s, c].
    wp3 = np.zeros((9 * 128, 256), np.float32)
    for dh in range(3):
        for dw in range(3):
            t = dh * 3 + dw
            for r in range(2):
                kh = r - 2 * (dh - 1) + 1
                if not 0 <= kh < 4:
                    continue
                for s in range(2):
                    kw = s - 2 * (dw - 1) + 1
                    if not 0 <= kw < 4:
                        continue
                    c0 = (r * 2 + s) * 64
                    wp3[t * 128:(t + 1) * 128, c0:c0 + 64] = w3[:, :, kh, kw]
    bp3 = np.tile(b3, 4)[None, :]

    # dec2: ConvTranspose; input chans (u, v, c) of Z1; output chans
    # (ph, pw, c) = final[4I+ph, 4J+pw, c].
    wp4 = np.zeros((9 * 256, 48), np.float32)
    for dh in range(3):
        for dw in range(3):
            t = dh * 3 + dw
            for u in range(2):
                for ph in range(4):
                    kh = ph + 1 - 2 * u - 4 * (dh - 1)
                    if not 0 <= kh < 4:
                        continue
                    for v in range(2):
                        for pw in range(4):
                            kw = pw + 1 - 2 * v - 4 * (dw - 1)
                            if not 0 <= kw < 4:
                                continue
                            r0 = t * 256 + (u * 2 + v) * 64
                            c0 = (ph * 4 + pw) * 3
                            wp4[r0:r0 + 64, c0:c0 + 3] = w4[:, :, kh, kw]
    bp4 = np.tile(b4, 16)[None, :]

    bf = lambda a: jnp.asarray(a, dtype=jnp.bfloat16)
    f32 = lambda a: jnp.asarray(a, dtype=jnp.float32)
    return {"w1": bf(wp1), "b1": f32(bp1), "w2": bf(wp2), "b2": f32(bp2),
            "w3": bf(wp3), "b3": f32(bp3), "w4": bf(wp4), "b4": f32(bp4)}


# ------------------------------- parameters ----------------------------------
def init_params(key):
    ks = jax.random.split(key, 8)

    def rnd(k, shape, fan_in):
        return jax.random.normal(k, shape, jnp.float32) / np.sqrt(fan_in)

    return {
        "enc1_w": rnd(ks[0], (64, 3, 4, 4), 3 * 16),
        "enc1_b": rnd(ks[1], (64,), 3 * 16),
        "enc2_w": rnd(ks[2], (128, 64, 4, 4), 64 * 16),
        "enc2_b": rnd(ks[3], (128,), 64 * 16),
        "dec1_w": rnd(ks[4], (128, 64, 4, 4), 128 * 16),  # ConvTranspose2d(128,64)
        "dec1_b": rnd(ks[5], (64,), 128 * 16),
        "dec2_w": rnd(ks[6], (64, 3, 4, 4), 64 * 16),     # ConvTranspose2d(64,3)
        "dec2_b": rnd(ks[7], (3,), 64 * 16),
    }


# ----------------------------- pure-JAX reference ----------------------------
def _ref_forward(x, p):
    dn = ("NCHW", "OIHW", "NCHW")

    def conv(x, w, b, s, pad):
        y = jax.lax.conv_general_dilated(
            x, w, (s, s), ((pad, pad), (pad, pad)), dimension_numbers=dn)
        return y + b[None, :, None, None]

    def convT(x, w, b, s, pad):
        k = w.shape[2]
        wc = jnp.flip(w, (2, 3)).transpose(1, 0, 2, 3)
        y = jax.lax.conv_general_dilated(
            x, wc, (1, 1), ((k - 1 - pad, k - 1 - pad),) * 2,
            lhs_dilation=(s, s), dimension_numbers=dn)
        return y + b[None, :, None, None]

    h = jax.nn.relu(conv(x, p["enc1_w"], p["enc1_b"], 2, 1))
    h = jax.nn.relu(conv(h, p["enc2_w"], p["enc2_b"], 2, 1))
    h = jax.nn.relu(convT(h, p["dec1_w"], p["dec1_b"], 2, 1))
    return jnp.tanh(convT(h, p["dec2_w"], p["dec2_b"], 2, 1))


if __name__ == "__main__":
    key = jax.random.PRNGKey(0)
    kx, kp = jax.random.split(key)
    x = jax.random.normal(kx, (2, 3, 16, 16), jnp.float32)
    params = init_params(kp)
    packed = pack_params(params)          # one-time weight packing (bf16)

    y = generator_forward(x, packed)
    y = jax.block_until_ready(y)
    assert y.shape == (2, 3, 16, 16) and y.dtype == jnp.float32

    # Matmul operands are bf16 (f32 accumulate, f32 inter-layer activations),
    # so allow bf16-level tolerance vs the pure-f32 reference.
    y_ref = jax.block_until_ready(_ref_forward(x, params))
    np.testing.assert_allclose(np.asarray(y), np.asarray(y_ref),
                               rtol=3e-2, atol=3e-2)
    print("KERNEL_OK")
</pallas_src>

<mosaic_0001>
module attributes {stable_mosaic.version = 11 : i64} {
  func.func @_generator_kernel(%arg0: i32, %arg1: memref<1x4x4x48xf32, #tpu.memory_space<vmem>>, %arg2: memref<432x256xbf16, #tpu.memory_space<vmem>>, %arg3: memref<1x256xf32, #tpu.memory_space<vmem>>, %arg4: memref<2304x128xbf16, #tpu.memory_space<vmem>>, %arg5: memref<1x128xf32, #tpu.memory_space<vmem>>, %arg6: memref<1152x256xbf16, #tpu.memory_space<vmem>>, %arg7: memref<1x256xf32, #tpu.memory_space<vmem>>, %arg8: memref<2304x48xbf16, #tpu.memory_space<vmem>>, %arg9: memref<1x48xf32, #tpu.memory_space<vmem>>, %arg10: memref<1x4x4x48xf32, #tpu.memory_space<vmem>>, %arg11: memref<6x6x48xf32, #tpu.memory_space<vmem>>, %arg12: memref<6x6x256xf32, #tpu.memory_space<vmem>>, %arg13: memref<6x6x128xf32, #tpu.memory_space<vmem>>, %arg14: memref<6x6x256xf32, #tpu.memory_space<vmem>>, %arg15: memref<16x2304xf32, #tpu.memory_space<vmem>>) attributes {dimension_semantics = [#tpu.dimension_semantics<parallel>], iteration_bounds = array<i64: 2>, scalar_prefetch = 0 : i64, scratch_operands = 5 : i64, tpu.core_type = #tpu.core_type<tc>, window_params = [{transform_indices = @transform_0, window_bounds = array<i64: 1, 4, 4, 48>}, {pipeline_mode = #tpu.pipeline_mode<synchronous>, transform_indices = @transform_1, window_bounds = array<i64: 432, 256>}, {pipeline_mode = #tpu.pipeline_mode<synchronous>, transform_indices = @transform_2, window_bounds = array<i64: 1, 256>}, {pipeline_mode = #tpu.pipeline_mode<synchronous>, transform_indices = @transform_3, window_bounds = array<i64: 2304, 128>}, {pipeline_mode = #tpu.pipeline_mode<synchronous>, transform_indices = @transform_4, window_bounds = array<i64: 1, 128>}, {pipeline_mode = #tpu.pipeline_mode<synchronous>, transform_indices = @transform_5, window_bounds = array<i64: 1152, 256>}, {pipeline_mode = #tpu.pipeline_mode<synchronous>, transform_indices = @transform_6, window_bounds = array<i64: 1, 256>}, {pipeline_mode = #tpu.pipeline_mode<synchronous>, transform_indices = @transform_7, window_bounds = array<i64: 2304, 48>}, {pipeline_mode = #tpu.pipeline_mode<synchronous>, transform_indices = @transform_8, window_bounds = array<i64: 1, 48>}, {transform_indices = @transform_9, window_bounds = array<i64: 1, 4, 4, 48>}]} {
    %cst = arith.constant 0.000000e+00 : f32
    %0 = vector.broadcast %cst : f32 to vector<6x6x48xf32>
    %c0 = arith.constant 0 : index
    %c0_0 = arith.constant 0 : index
    %c0_1 = arith.constant 0 : index
    %1 = vector.load %arg11[%c0, %c0_0, %c0_1] : memref<6x6x48xf32, #tpu.memory_space<vmem>>, vector<6x6x48xf32>
    tpu.vector_store %arg11[%c0, %c0_0, %c0_1], %0 {strides = array<i32>} : memref<6x6x48xf32, #tpu.memory_space<vmem>>, vector<6x6x48xf32>,
    %cst_2 = arith.constant 0.000000e+00 : f32
    %2 = vector.broadcast %cst_2 : f32 to vector<6x6x256xf32>
    %c0_3 = arith.constant 0 : index
    %c0_4 = arith.constant 0 : index
    %c0_5 = arith.constant 0 : index
    %3 = vector.load %arg12[%c0_3, %c0_4, %c0_5] : memref<6x6x256xf32, #tpu.memory_space<vmem>>, vector<6x6x256xf32>
    tpu.vector_store %arg12[%c0_3, %c0_4, %c0_5], %2 {strides = array<i32>} : memref<6x6x256xf32, #tpu.memory_space<vmem>>, vector<6x6x256xf32>,
    %cst_6 = arith.constant 0.000000e+00 : f32
    %4 = vector.broadcast %cst_6 : f32 to vector<6x6x128xf32>
    %c0_7 = arith.constant 0 : index
    %c0_8 = arith.constant 0 : index
    %c0_9 = arith.constant 0 : index
    %5 = vector.load %arg13[%c0_7, %c0_8, %c0_9] : memref<6x6x128xf32, #tpu.memory_space<vmem>>, vector<6x6x128xf32>
    tpu.vector_store %arg13[%c0_7, %c0_8, %c0_9], %4 {strides = array<i32>} : memref<6x6x128xf32, #tpu.memory_space<vmem>>, vector<6x6x128xf32>,
    %cst_10 = arith.constant 0.000000e+00 : f32
    %6 = vector.broadcast %cst_10 : f32 to vector<6x6x256xf32>
    %c0_11 = arith.constant 0 : index
    %c0_12 = arith.constant 0 : index
    %c0_13 = arith.constant 0 : index
    %7 = vector.load %arg14[%c0_11, %c0_12, %c0_13] : memref<6x6x256xf32, #tpu.memory_space<vmem>>, vector<6x6x256xf32>
    tpu.vector_store %arg14[%c0_11, %c0_12, %c0_13], %6 {strides = array<i32>} : memref<6x6x256xf32, #tpu.memory_space<vmem>>, vector<6x6x256xf32>,
    %c0_14 = arith.constant 0 : index
    %c0_15 = arith.constant 0 : index
    %c0_16 = arith.constant 0 : index
    %c0_17 = arith.constant 0 : index
    %8 = vector.load %arg1[%c0_14, %c0_15, %c0_16, %c0_17] : memref<1x4x4x48xf32, #tpu.memory_space<vmem>>, vector<1x1x4x48xf32>
    %9 = vector.shape_cast %8 : vector<1x1x4x48xf32> to vector<4x48xf32>
    %c1 = arith.constant 1 : index
    %c1_18 = arith.constant 1 : index
    %c0_19 = arith.constant 0 : index
    %10 = vector.load %arg11[%c1, %c1_18, %c0_19] : memref<6x6x48xf32, #tpu.memory_space<vmem>>, vector<1x4x48xf32>
    %11 = vector.shape_cast %10 : vector<1x4x48xf32> to vector<4x48xf32>
    %12 = vector.shape_cast %9 : vector<4x48xf32> to vector<1x4x48xf32>
    tpu.vector_store %arg11[%c1, %c1_18, %c0_19], %12 {strides = array<i32>} : memref<6x6x48xf32, #tpu.memory_space<vmem>>, vector<1x4x48xf32>,
    %c0_20 = arith.constant 0 : index
    %c1_21 = arith.constant 1 : index
    %c0_22 = arith.constant 0 : index
    %c0_23 = arith.constant 0 : index
    %13 = vector.load %arg1[%c0_20, %c1_21, %c0_22, %c0_23] : memref<1x4x4x48xf32, #tpu.memory_space<vmem>>, vector<1x1x4x48xf32>
    %14 = vector.shape_cast %13 : vector<1x1x4x48xf32> to vector<4x48xf32>
    %c2 = arith.constant 2 : index
    %c1_24 = arith.constant 1 : index
    %c0_25 = arith.constant 0 : index
    %15 = vector.load %arg11[%c2, %c1_24, %c0_25] : memref<6x6x48xf32, #tpu.memory_space<vmem>>, vector<1x4x48xf32>
    %16 = vector.shape_cast %15 : vector<1x4x48xf32> to vector<4x48xf32>
    %17 = vector.shape_cast %14 : vector<4x48xf32> to vector<1x4x48xf32>
    tpu.vector_store %arg11[%c2, %c1_24, %c0_25], %17 {strides = array<i32>} : memref<6x6x48xf32, #tpu.memory_space<vmem>>, vector<1x4x48xf32>,
    %c0_26 = arith.constant 0 : index
    %c2_27 = arith.constant 2 : index
    %c0_28 = arith.constant 0 : index
    %c0_29 = arith.constant 0 : index
    %18 = vector.load %arg1[%c0_26, %c2_27, %c0_28, %c0_29] : memref<1x4x4x48xf32, #tpu.memory_space<vmem>>, vector<1x1x4x48xf32>
    %19 = vector.shape_cast %18 : vector<1x1x4x48xf32> to vector<4x48xf32>
    %c3 = arith.constant 3 : index
    %c1_30 = arith.constant 1 : index
    %c0_31 = arith.constant 0 : index
    %20 = vector.load %arg11[%c3, %c1_30, %c0_31] : memref<6x6x48xf32, #tpu.memory_space<vmem>>, vector<1x4x48xf32>
    %21 = vector.shape_cast %20 : vector<1x4x48xf32> to vector<4x48xf32>
    %22 = vector.shape_cast %19 : vector<4x48xf32> to vector<1x4x48xf32>
    tpu.vector_store %arg11[%c3, %c1_30, %c0_31], %22 {strides = array<i32>} : memref<6x6x48xf32, #tpu.memory_space<vmem>>, vector<1x4x48xf32>,
    %c0_32 = arith.constant 0 : index
    %c3_33 = arith.constant 3 : index
    %c0_34 = arith.constant 0 : index
    %c0_35 = arith.constant 0 : index
    %23 = vector.load %arg1[%c0_32, %c3_33, %c0_34, %c0_35] : memref<1x4x4x48xf32, #tpu.memory_space<vmem>>, vector<1x1x4x48xf32>
    %24 = vector.shape_cast %23 : vector<1x1x4x48xf32> to vector<4x48xf32>
    %c4 = arith.constant 4 : index
    %c1_36 = arith.constant 1 : index
    %c0_37 = arith.constant 0 : index
    %25 = vector.load %arg11[%c4, %c1_36, %c0_37] : memref<6x6x48xf32, #tpu.memory_space<vmem>>, vector<1x4x48xf32>
    %26 = vector.shape_cast %25 : vector<1x4x48xf32> to vector<4x48xf32>
    %27 = vector.shape_cast %24 : vector<4x48xf32> to vector<1x4x48xf32>
    tpu.vector_store %arg11[%c4, %c1_36, %c0_37], %27 {strides = array<i32>} : memref<6x6x48xf32, #tpu.memory_space<vmem>>, vector<1x4x48xf32>,
    %c0_38 = arith.constant 0 : index
    %c0_39 = arith.constant 0 : index
    %c0_40 = arith.constant 0 : index
    %28 = vector.load %arg11[%c0_38, %c0_39, %c0_40] : memref<6x6x48xf32, #tpu.memory_space<vmem>>, vector<1x4x48xf32>
    %29 = vector.shape_cast %28 : vector<1x4x48xf32> to vector<4x48xf32>
    %c0_41 = arith.constant 0 : index
    %c0_42 = arith.constant 0 : index
    %30 = vector.load %arg15[%c0_41, %c0_42] : memref<16x2304xf32, #tpu.memory_space<vmem>>, vector<4x48xf32>
    tpu.vector_store %arg15[%c0_41, %c0_42], %29 {strides = array<i32>} : memref<16x2304xf32, #tpu.memory_space<vmem>>, vector<4x48xf32>,
    %c1_43 = arith.constant 1 : index
    %c0_44 = arith.constant 0 : index
    %c0_45 = arith.constant 0 : index
    %31 = vector.load %arg11[%c1_43, %c0_44, %c0_45] : memref<6x6x48xf32, #tpu.memory_space<vmem>>, vector<1x4x48xf32>
    %32 = vector.shape_cast %31 : vector<1x4x48xf32> to vector<4x48xf32>
    %c4_46 = arith.constant 4 : index
    %c0_47 = arith.constant 0 : index
    %33 = vector.load %arg15[%c4_46, %c0_47] : memref<16x2304xf32, #tpu.memory_space<vmem>>, vector<4x48xf32>
    tpu.vector_store %arg15[%c4_46, %c0_47], %32 {strides = array<i32>} : memref<16x2304xf32, #tpu.memory_space<vmem>>, vector<4x48xf32>,
    %c2_48 = arith.constant 2 : index
    %c0_49 = arith.constant 0 : index
    %c0_50 = arith.constant 0 : index
    %34 = vector.load %arg11[%c2_48, %c0_49, %c0_50] : memref<6x6x48xf32, #tpu.memory_space<vmem>>, vector<1x4x48xf32>
    %35 = vector.shape_cast %34 : vector<1x4x48xf32> to vector<4x48xf32>
    %c8 = arith.constant 8 : index
    %c0_51 = arith.constant 0 : index
    %36 = vector.load %arg15[%c8, %c0_51] : memref<16x2304xf32, #tpu.memory_space<vmem>>, vector<4x48xf32>
    tpu.vector_store %arg15[%c8, %c0_51], %35 {strides = array<i32>} : memref<16x2304xf32, #tpu.memory_space<vmem>>, vector<4x48xf32>,
    %c3_52 = arith.constant 3 : index
    %c0_53 = arith.constant 0 : index
    %c0_54 = arith.constant 0 : index
    %37 = vector.load %arg11[%c3_52, %c0_53, %c0_54] : memref<6x6x48xf32, #tpu.memory_space<vmem>>, vector<1x4x48xf32>
    %38 = vector.shape_cast %37 : vector<1x4x48xf32> to vector<4x48xf32>
    %c12 = arith.constant 12 : index
    %c0_55 = arith.constant 0 : index
    %39 = vector.load %arg15[%c12, %c0_55] : memref<16x2304xf32, #tpu.memory_space<vmem>>, vector<4x48xf32>
    tpu.vector_store %arg15[%c12, %c0_55], %38 {strides = array<i32>} : memref<16x2304xf32, #tpu.memory_space<vmem>>, vector<4x48xf32>,
    %c0_56 = arith.constant 0 : index
    %c1_57 = arith.constant 1 : index
    %c0_58 = arith.constant 0 : index
    %40 = vector.load %arg11[%c0_56, %c1_57, %c0_58] : memref<6x6x48xf32, #tpu.memory_space<vmem>>, vector<1x4x48xf32>
    %41 = vector.shape_cast %40 : vector<1x4x48xf32> to vector<4x48xf32>
    %c0_59 = arith.constant 0 : index
    %c48 = arith.constant 48 : index
    %42 = vector.load %arg15[%c0_59, %c48] : memref<16x2304xf32, #tpu.memory_space<vmem>>, vector<4x48xf32>
    tpu.vector_store %arg15[%c0_59, %c48], %41 {strides = array<i32>} : memref<16x2304xf32, #tpu.memory_space<vmem>>, vector<4x48xf32>,
    %c1_60 = arith.constant 1 : index
    %c1_61 = arith.constant 1 : index
    %c0_62 = arith.constant 0 : index
    %43 = vector.load %arg11[%c1_60, %c1_61, %c0_62] : memref<6x6x48xf32, #tpu.memory_space<vmem>>, vector<1x4x48xf32>
    %44 = vector.shape_cast %43 : vector<1x4x48xf32> to vector<4x48xf32>
    %c4_63 = arith.constant 4 : index
    %c48_64 = arith.constant 48 : index
    %45 = vector.load %arg15[%c4_63, %c48_64] : memref<16x2304xf32, #tpu.memory_space<vmem>>, vector<4x48xf32>
    tpu.vector_store %arg15[%c4_63, %c48_64], %44 {strides = array<i32>} : memref<16x2304xf32, #tpu.memory_space<vmem>>, vector<4x48xf32>,
    %c2_65 = arith.constant 2 : index
    %c1_66 = arith.constant 1 : index
    %c0_67 = arith.constant 0 : index
    %46 = vector.load %arg11[%c2_65, %c1_66, %c0_67] : memref<6x6x48xf32, #tpu.memory_space<vmem>>, vector<1x4x48xf32>
    %47 = vector.shape_cast %46 : vector<1x4x48xf32> to vector<4x48xf32>
    %c8_68 = arith.constant 8 : index
    %c48_69 = arith.constant 48 : index
    %48 = vector.load %arg15[%c8_68, %c48_69] : memref<16x2304xf32, #tpu.memory_space<vmem>>, vector<4x48xf32>
    tpu.vector_store %arg15[%c8_68, %c48_69], %47 {strides = array<i32>} : memref<16x2304xf32, #tpu.memory_space<vmem>>, vector<4x48xf32>,
    %c3_70 = arith.constant 3 : index
    %c1_71 = arith.constant 1 : index
    %c0_72 = arith.constant 0 : index
    %49 = vector.load %arg11[%c3_70, %c1_71, %c0_72] : memref<6x6x48xf32, #tpu.memory_space<vmem>>, vector<1x4x48xf32>
    %50 = vector.shape_cast %49 : vector<1x4x48xf32> to vector<4x48xf32>
    %c12_73 = arith.constant 12 : index
    %c48_74 = arith.constant 48 : index
    %51 = vector.load %arg15[%c12_73, %c48_74] : memref<16x2304xf32, #tpu.memory_space<vmem>>, vector<4x48xf32>
    tpu.vector_store %arg15[%c12_73, %c48_74], %50 {strides = array<i32>} : memref<16x2304xf32, #tpu.memory_space<vmem>>, vector<4x48xf32>,
    %c0_75 = arith.constant 0 : index
    %c2_76 = arith.constant 2 : index
    %c0_77 = arith.constant 0 : index
    %52 = vector.load %arg11[%c0_75, %c2_76, %c0_77] : memref<6x6x48xf32, #tpu.memory_space<vmem>>, vector<1x4x48xf32>
    %53 = vector.shape_cast %52 : vector<1x4x48xf32> to vector<4x48xf32>
    %c0_78 = arith.constant 0 : index
    %c96 = arith.constant 96 : index
    %54 = vector.load %arg15[%c0_78, %c96] : memref<16x2304xf32, #tpu.memory_space<vmem>>, vector<4x48xf32>
    tpu.vector_store %arg15[%c0_78, %c96], %53 {strides = array<i32>} : memref<16x2304xf32, #tpu.memory_space<vmem>>, vector<4x48xf32>,
    %c1_79 = arith.constant 1 : index
    %c2_80 = arith.constant 2 : index
    %c0_81 = arith.constant 0 : index
    %55 = vector.load %arg11[%c1_79, %c2_80, %c0_81] : memref<6x6x48xf32, #tpu.memory_space<vmem>>, vector<1x4x48xf32>
    %56 = vector.shape_cast %55 : vector<1x4x48xf32> to vector<4x48xf32>
    %c4_82 = arith.constant 4 : index
    %c96_83 = arith.constant 96 : index
    %57 = vector.load %arg15[%c4_82, %c96_83] : memref<16x2304xf32, #tpu.memory_space<vmem>>, vector<4x48xf32>
    tpu.vector_store %arg15[%c4_82, %c96_83], %56 {strides = array<i32>} : memref<16x2304xf32, #tpu.memory_space<vmem>>, vector<4x48xf32>,
    %c2_84 = arith.constant 2 : index
    %c2_85 = arith.constant 2 : index
    %c0_86 = arith.constant 0 : index
    %58 = vector.load %arg11[%c2_84, %c2_85, %c0_86] : memref<6x6x48xf32, #tpu.memory_space<vmem>>, vector<1x4x48xf32>
    %59 = vector.shape_cast %58 : vector<1x4x48xf32> to vector<4x48xf32>
    %c8_87 = arith.constant 8 : index
    %c96_88 = arith.constant 96 : index
    %60 = vector.load %arg15[%c8_87, %c96_88] : memref<16x2304xf32, #tpu.memory_space<vmem>>, vector<4x48xf32>
    tpu.vector_store %arg15[%c8_87, %c96_88], %59 {strides = array<i32>} : memref<16x2304xf32, #tpu.memory_space<vmem>>, vector<4x48xf32>,
    %c3_89 = arith.constant 3 : index
    %c2_90 = arith.constant 2 : index
    %c0_91 = arith.constant 0 : index
    %61 = vector.load %arg11[%c3_89, %c2_90, %c0_91] : memref<6x6x48xf32, #tpu.memory_space<vmem>>, vector<1x4x48xf32>
    %62 = vector.shape_cast %61 : vector<1x4x48xf32> to vector<4x48xf32>
    %c12_92 = arith.constant 12 : index
    %c96_93 = arith.constant 96 : index
    %63 = vector.load %arg15[%c12_92, %c96_93] : memref<16x2304xf32, #tpu.memory_space<vmem>>, vector<4x48xf32>
    tpu.vector_store %arg15[%c12_92, %c96_93], %62 {strides = array<i32>} : memref<16x2304xf32, #tpu.memory_space<vmem>>, vector<4x48xf32>,
    %c1_94 = arith.constant 1 : index
    %c0_95 = arith.constant 0 : index
    %c0_96 = arith.constant 0 : index
    %64 = vector.load %arg11[%c1_94, %c0_95, %c0_96] : memref<6x6x48xf32, #tpu.memory_space<vmem>>, vector<1x4x48xf32>
    %65 = vector.shape_cast %64 : vector<1x4x48xf32> to vector<4x48xf32>
    %c0_97 = arith.constant 0 : index
    %c144 = arith.constant 144 : index
    %66 = vector.load %arg15[%c0_97, %c144] : memref<16x2304xf32, #tpu.memory_space<vmem>>, vector<4x48xf32>
    tpu.vector_store %arg15[%c0_97, %c144], %65 {strides = array<i32>} : memref<16x2304xf32, #tpu.memory_space<vmem>>, vector<4x48xf32>,
    %c2_98 = arith.constant 2 : index
    %c0_99 = arith.constant 0 : index
    %c0_100 = arith.constant 0 : index
    %67 = vector.load %arg11[%c2_98, %c0_99, %c0_100] : memref<6x6x48xf32, #tpu.memory_space<vmem>>, vector<1x4x48xf32>
    %68 = vector.shape_cast %67 : vector<1x4x48xf32> to vector<4x48xf32>
    %c4_101 = arith.constant 4 : index
    %c144_102 = arith.constant 144 : index
    %69 = vector.load %arg15[%c4_101, %c144_102] : memref<16x2304xf32, #tpu.memory_space<vmem>>, vector<4x48xf32>
    tpu.vector_store %arg15[%c4_101, %c144_102], %68 {strides = array<i32>} : memref<16x2304xf32, #tpu.memory_space<vmem>>, vector<4x48xf32>,
    %c3_103 = arith.constant 3 : index
    %c0_104 = arith.constant 0 : index
    %c0_105 = arith.constant 0 : index
    %70 = vector.load %arg11[%c3_103, %c0_104, %c0_105] : memref<6x6x48xf32, #tpu.memory_space<vmem>>, vector<1x4x48xf32>
    %71 = vector.shape_cast %70 : vector<1x4x48xf32> to vector<4x48xf32>
    %c8_106 = arith.constant 8 : index
    %c144_107 = arith.constant 144 : index
    %72 = vector.load %arg15[%c8_106, %c144_107] : memref<16x2304xf32, #tpu.memory_space<vmem>>, vector<4x48xf32>
    tpu.vector_store %arg15[%c8_106, %c144_107], %71 {strides = array<i32>} : memref<16x2304xf32, #tpu.memory_space<vmem>>, vector<4x48xf32>,
    %c4_108 = arith.constant 4 : index
    %c0_109 = arith.constant 0 : index
    %c0_110 = arith.constant 0 : index
    %73 = vector.load %arg11[%c4_108, %c0_109, %c0_110] : memref<6x6x48xf32, #tpu.memory_space<vmem>>, vector<1x4x48xf32>
    %74 = vector.shape_cast %73 : vector<1x4x48xf32> to vector<4x48xf32>
    %c12_111 = arith.constant 12 : index
    %c144_112 = arith.constant 144 : index
    %75 = vector.load %arg15[%c12_111, %c144_112] : memref<16x2304xf32, #tpu.memory_space<vmem>>, vector<4x48xf32>
    tpu.vector_store %arg15[%c12_111, %c144_112], %74 {strides = array<i32>} : memref<16x2304xf32, #tpu.memory_space<vmem>>, vector<4x48xf32>,
    %c1_113 = arith.constant 1 : index
    %c1_114 = arith.constant 1 : index
    %c0_115 = arith.constant 0 : index
    %76 = vector.load %arg11[%c1_113, %c1_114, %c0_115] : memref<6x6x48xf32, #tpu.memory_space<vmem>>, vector<1x4x48xf32>
    %77 = vector.shape_cast %76 : vector<1x4x48xf32> to vector<4x48xf32>
    %c0_116 = arith.constant 0 : index
    %c192 = arith.constant 192 : index
    %78 = vector.load %arg15[%c0_116, %c192] : memref<16x2304xf32, #tpu.memory_space<vmem>>, vector<4x48xf32>
    tpu.vector_store %arg15[%c0_116, %c192], %77 {strides = array<i32>} : memref<16x2304xf32, #tpu.memory_space<vmem>>, vector<4x48xf32>,
    %c2_117 = arith.constant 2 : index
    %c1_118 = arith.constant 1 : index
    %c0_119 = arith.constant 0 : index
    %79 = vector.load %arg11[%c2_117, %c1_118, %c0_119] : memref<6x6x48xf32, #tpu.memory_space<vmem>>, vector<1x4x48xf32>
    %80 = vector.shape_cast %79 : vector<1x4x48xf32> to vector<4x48xf32>
    %c4_120 = arith.constant 4 : index
    %c192_121 = arith.constant 192 : index
    %81 = vector.load %arg15[%c4_120, %c192_121] : memref<16x2304xf32, #tpu.memory_space<vmem>>, vector<4x48xf32>
    tpu.vector_store %arg15[%c4_120, %c192_121], %80 {strides = array<i32>} : memref<16x2304xf32, #tpu.memory_space<vmem>>, vector<4x48xf32>,
    %c3_122 = arith.constant 3 : index
    %c1_123 = arith.constant 1 : index
    %c0_124 = arith.constant 0 : index
    %82 = vector.load %arg11[%c3_122, %c1_123, %c0_124] : memref<6x6x48xf32, #tpu.memory_space<vmem>>, vector<1x4x48xf32>
    %83 = vector.shape_cast %82 : vector<1x4x48xf32> to vector<4x48xf32>
    %c8_125 = arith.constant 8 : index
    %c192_126 = arith.constant 192 : index
    %84 = vector.load %arg15[%c8_125, %c192_126] : memref<16x2304xf32, #tpu.memory_space<vmem>>, vector<4x48xf32>
    tpu.vector_store %arg15[%c8_125, %c192_126], %83 {strides = array<i32>} : memref<16x2304xf32, #tpu.memory_space<vmem>>, vector<4x48xf32>,
    %c4_127 = arith.constant 4 : index
    %c1_128 = arith.constant 1 : index
    %c0_129 = arith.constant 0 : index
    %85 = vector.load %arg11[%c4_127, %c1_128, %c0_129] : memref<6x6x48xf32, #tpu.memory_space<vmem>>, vector<1x4x48xf32>
    %86 = vector.shape_cast %85 : vector<1x4x48xf32> to vector<4x48xf32>
    %c12_130 = arith.constant 12 : index
    %c192_131 = arith.constant 192 : index
    %87 = vector.load %arg15[%c12_130, %c192_131] : memref<16x2304xf32, #tpu.memory_space<vmem>>, vector<4x48xf32>
    tpu.vector_store %arg15[%c12_130, %c192_131], %86 {strides = array<i32>} : memref<16x2304xf32, #tpu.memory_space<vmem>>, vector<4x48xf32>,
    %c1_132 = arith.constant 1 : index
    %c2_133 = arith.constant 2 : index
    %c0_134 = arith.constant 0 : index
    %88 = vector.load %arg11[%c1_132, %c2_133, %c0_134] : memref<6x6x48xf32, #tpu.memory_space<vmem>>, vector<1x4x48xf32>
    %89 = vector.shape_cast %88 : vector<1x4x48xf32> to vector<4x48xf32>
    %c0_135 = arith.constant 0 : index
    %c240 = arith.constant 240 : index
    %90 = vector.load %arg15[%c0_135, %c240] : memref<16x2304xf32, #tpu.memory_space<vmem>>, vector<4x48xf32>
    tpu.vector_store %arg15[%c0_135, %c240], %89 {strides = array<i32>} : memref<16x2304xf32, #tpu.memory_space<vmem>>, vector<4x48xf32>,
    %c2_136 = arith.constant 2 : index
    %c2_137 = arith.constant 2 : index
    %c0_138 = arith.constant 0 : index
    %91 = vector.load %arg11[%c2_136, %c2_137, %c0_138] : memref<6x6x48xf32, #tpu.memory_space<vmem>>, vector<1x4x48xf32>
    %92 = vector.shape_cast %91 : vector<1x4x48xf32> to vector<4x48xf32>
    %c4_139 = arith.constant 4 : index
    %c240_140 = arith.constant 240 : index
    %93 = vector.load %arg15[%c4_139, %c240_140] : memref<16x2304xf32, #tpu.memory_space<vmem>>, vector<4x48xf32>
    tpu.vector_store %arg15[%c4_139, %c240_140], %92 {strides = array<i32>} : memref<16x2304xf32, #tpu.memory_space<vmem>>, vector<4x48xf32>,
    %c3_141 = arith.constant 3 : index
    %c2_142 = arith.constant 2 : index
    %c0_143 = arith.constant 0 : index
    %94 = vector.load %arg11[%c3_141, %c2_142, %c0_143] : memref<6x6x48xf32, #tpu.memory_space<vmem>>, vector<1x4x48xf32>
    %95 = vector.shape_cast %94 : vector<1x4x48xf32> to vector<4x48xf32>
    %c8_144 = arith.constant 8 : index
    %c240_145 = arith.constant 240 : index
    %96 = vector.load %arg15[%c8_144, %c240_145] : memref<16x2304xf32, #tpu.memory_space<vmem>>, vector<4x48xf32>
    tpu.vector_store %arg15[%c8_144, %c240_145], %95 {strides = array<i32>} : memref<16x2304xf32, #tpu.memory_space<vmem>>, vector<4x48xf32>,
    %c4_146 = arith.constant 4 : index
    %c2_147 = arith.constant 2 : index
    %c0_148 = arith.constant 0 : index
    %97 = vector.load %arg11[%c4_146, %c2_147, %c0_148] : memref<6x6x48xf32, #tpu.memory_space<vmem>>, vector<1x4x48xf32>
    %98 = vector.shape_cast %97 : vector<1x4x48xf32> to vector<4x48xf32>
    %c12_149 = arith.constant 12 : index
    %c240_150 = arith.constant 240 : index
    %99 = vector.load %arg15[%c12_149, %c240_150] : memref<16x2304xf32, #tpu.memory_space<vmem>>, vector<4x48xf32>
    tpu.vector_store %arg15[%c12_149, %c240_150], %98 {strides = array<i32>} : memref<16x2304xf32, #tpu.memory_space<vmem>>, vector<4x48xf32>,
    %c2_151 = arith.constant 2 : index
    %c0_152 = arith.constant 0 : index
    %c0_153 = arith.constant 0 : index
    %100 = vector.load %arg11[%c2_151, %c0_152, %c0_153] : memref<6x6x48xf32, #tpu.memory_space<vmem>>, vector<1x4x48xf32>
    %101 = vector.shape_cast %100 : vector<1x4x48xf32> to vector<4x48xf32>
    %c0_154 = arith.constant 0 : index
    %c288 = arith.constant 288 : index
    %102 = vector.load %arg15[%c0_154, %c288] : memref<16x2304xf32, #tpu.memory_space<vmem>>, vector<4x48xf32>
    tpu.vector_store %arg15[%c0_154, %c288], %101 {strides = array<i32>} : memref<16x2304xf32, #tpu.memory_space<vmem>>, vector<4x48xf32>,
    %c3_155 = arith.constant 3 : index
    %c0_156 = arith.constant 0 : index
    %c0_157 = arith.constant 0 : index
    %103 = vector.load %arg11[%c3_155, %c0_156, %c0_157] : memref<6x6x48xf32, #tpu.memory_space<vmem>>, vector<1x4x48xf32>
    %104 = vector.shape_cast %103 : vector<1x4x48xf32> to vector<4x48xf32>
    %c4_158 = arith.constant 4 : index
    %c288_159 = arith.constant 288 : index
    %105 = vector.load %arg15[%c4_158, %c288_159] : memref<16x2304xf32, #tpu.memory_space<vmem>>, vector<4x48xf32>
    tpu.vector_store %arg15[%c4_158, %c288_159], %104 {strides = array<i32>} : memref<16x2304xf32, #tpu.memory_space<vmem>>, vector<4x48xf32>,
    %c4_160 = arith.constant 4 : index
    %c0_161 = arith.constant 0 : index
    %c0_162 = arith.constant 0 : index
    %106 = vector.load %arg11[%c4_160, %c0_161, %c0_162] : memref<6x6x48xf32, #tpu.memory_space<vmem>>, vector<1x4x48xf32>
    %107 = vector.shape_cast %106 : vector<1x4x48xf32> to vector<4x48xf32>
    %c8_163 = arith.constant 8 : index
    %c288_164 = arith.constant 288 : index
    %108 = vector.load %arg15[%c8_163, %c288_164] : memref<16x2304xf32, #tpu.memory_space<vmem>>, vector<4x48xf32>
    tpu.vector_store %arg15[%c8_163, %c288_164], %107 {strides = array<i32>} : memref<16x2304xf32, #tpu.memory_space<vmem>>, vector<4x48xf32>,
    %c5 = arith.constant 5 : index
    %c0_165 = arith.constant 0 : index
    %c0_166 = arith.constant 0 : index
    %109 = vector.load %arg11[%c5, %c0_165, %c0_166] : memref<6x6x48xf32, #tpu.memory_space<vmem>>, vector<1x4x48xf32>
    %110 = vector.shape_cast %109 : vector<1x4x48xf32> to vector<4x48xf32>
    %c12_167 = arith.constant 12 : index
    %c288_168 = arith.constant 288 : index
    %111 = vector.load %arg15[%c12_167, %c288_168] : memref<16x2304xf32, #tpu.memory_space<vmem>>, vector<4x48xf32>
    tpu.vector_store %arg15[%c12_167, %c288_168], %110 {strides = array<i32>} : memref<16x2304xf32, #tpu.memory_space<vmem>>, vector<4x48xf32>,
    %c2_169 = arith.constant 2 : index
    %c1_170 = arith.constant 1 : index
    %c0_171 = arith.constant 0 : index
    %112 = vector.load %arg11[%c2_169, %c1_170, %c0_171] : memref<6x6x48xf32, #tpu.memory_space<vmem>>, vector<1x4x48xf32>
    %113 = vector.shape_cast %112 : vector<1x4x48xf32> to vector<4x48xf32>
    %c0_172 = arith.constant 0 : index
    %c336 = arith.constant 336 : index
    %114 = vector.load %arg15[%c0_172, %c336] : memref<16x2304xf32, #tpu.memory_space<vmem>>, vector<4x48xf32>
    tpu.vector_store %arg15[%c0_172, %c336], %113 {strides = array<i32>} : memref<16x2304xf32, #tpu.memory_space<vmem>>, vector<4x48xf32>,
    %c3_173 = arith.constant 3 : index
    %c1_174 = arith.constant 1 : index
    %c0_175 = arith.constant 0 : index
    %115 = vector.load %arg11[%c3_173, %c1_174, %c0_175] : memref<6x6x48xf32, #tpu.memory_space<vmem>>, vector<1x4x48xf32>
    %116 = vector.shape_cast %115 : vector<1x4x48xf32> to vector<4x48xf32>
    %c4_176 = arith.constant 4 : index
    %c336_177 = arith.constant 336 : index
    %117 = vector.load %arg15[%c4_176, %c336_177] : memref<16x2304xf32, #tpu.memory_space<vmem>>, vector<4x48xf32>
    tpu.vector_store %arg15[%c4_176, %c336_177], %116 {strides = array<i32>} : memref<16x2304xf32, #tpu.memory_space<vmem>>, vector<4x48xf32>,
    %c4_178 = arith.constant 4 : index
    %c1_179 = arith.constant 1 : index
    %c0_180 = arith.constant 0 : index
    %118 = vector.load %arg11[%c4_178, %c1_179, %c0_180] : memref<6x6x48xf32, #tpu.memory_space<vmem>>, vector<1x4x48xf32>
    %119 = vector.shape_cast %118 : vector<1x4x48xf32> to vector<4x48xf32>
    %c8_181 = arith.constant 8 : index
    %c336_182 = arith.constant 336 : index
    %120 = vector.load %arg15[%c8_181, %c336_182] : memref<16x2304xf32, #tpu.memory_space<vmem>>, vector<4x48xf32>
    tpu.vector_store %arg15[%c8_181, %c336_182], %119 {strides = array<i32>} : memref<16x2304xf32, #tpu.memory_space<vmem>>, vector<4x48xf32>,
    %c5_183 = arith.constant 5 : index
    %c1_184 = arith.constant 1 : index
    %c0_185 = arith.constant 0 : index
    %121 = vector.load %arg11[%c5_183, %c1_184, %c0_185] : memref<6x6x48xf32, #tpu.memory_space<vmem>>, vector<1x4x48xf32>
    %122 = vector.shape_cast %121 : vector<1x4x48xf32> to vector<4x48xf32>
    %c12_186 = arith.constant 12 : index
    %c336_187 = arith.constant 336 : index
    %123 = vector.load %arg15[%c12_186, %c336_187] : memref<16x2304xf32, #tpu.memory_space<vmem>>, vector<4x48xf32>
    tpu.vector_store %arg15[%c12_186, %c336_187], %122 {strides = array<i32>} : memref<16x2304xf32, #tpu.memory_space<vmem>>, vector<4x48xf32>,
    %c2_188 = arith.constant 2 : index
    %c2_189 = arith.constant 2 : index
    %c0_190 = arith.constant 0 : index
    %124 = vector.load %arg11[%c2_188, %c2_189, %c0_190] : memref<6x6x48xf32, #tpu.memory_space<vmem>>, vector<1x4x48xf32>
    %125 = vector.shape_cast %124 : vector<1x4x48xf32> to vector<4x48xf32>
    %c0_191 = arith.constant 0 : index
    %c384 = arith.constant 384 : index
    %126 = vector.load %arg15[%c0_191, %c384] : memref<16x2304xf32, #tpu.memory_space<vmem>>, vector<4x48xf32>
    tpu.vector_store %arg15[%c0_191, %c384], %125 {strides = array<i32>} : memref<16x2304xf32, #tpu.memory_space<vmem>>, vector<4x48xf32>,
    %c3_192 = arith.constant 3 : index
    %c2_193 = arith.constant 2 : index
    %c0_194 = arith.constant 0 : index
    %127 = vector.load %arg11[%c3_192, %c2_193, %c0_194] : memref<6x6x48xf32, #tpu.memory_space<vmem>>, vector<1x4x48xf32>
    %128 = vector.shape_cast %127 : vector<1x4x48xf32> to vector<4x48xf32>
    %c4_195 = arith.constant 4 : index
    %c384_196 = arith.constant 384 : index
    %129 = vector.load %arg15[%c4_195, %c384_196] : memref<16x2304xf32, #tpu.memory_space<vmem>>, vector<4x48xf32>
    tpu.vector_store %arg15[%c4_195, %c384_196], %128 {strides = array<i32>} : memref<16x2304xf32, #tpu.memory_space<vmem>>, vector<4x48xf32>,
    %c4_197 = arith.constant 4 : index
    %c2_198 = arith.constant 2 : index
    %c0_199 = arith.constant 0 : index
    %130 = vector.load %arg11[%c4_197, %c2_198, %c0_199] : memref<6x6x48xf32, #tpu.memory_space<vmem>>, vector<1x4x48xf32>
    %131 = vector.shape_cast %130 : vector<1x4x48xf32> to vector<4x48xf32>
    %c8_200 = arith.constant 8 : index
    %c384_201 = arith.constant 384 : index
    %132 = vector.load %arg15[%c8_200, %c384_201] : memref<16x2304xf32, #tpu.memory_space<vmem>>, vector<4x48xf32>
    tpu.vector_store %arg15[%c8_200, %c384_201], %131 {strides = array<i32>} : memref<16x2304xf32, #tpu.memory_space<vmem>>, vector<4x48xf32>,
    %c5_202 = arith.constant 5 : index
    %c2_203 = arith.constant 2 : index
    %c0_204 = arith.constant 0 : index
    %133 = vector.load %arg11[%c5_202, %c2_203, %c0_204] : memref<6x6x48xf32, #tpu.memory_space<vmem>>, vector<1x4x48xf32>
    %134 = vector.shape_cast %133 : vector<1x4x48xf32> to vector<4x48xf32>
    %c12_205 = arith.constant 12 : index
    %c384_206 = arith.constant 384 : index
    %135 = vector.load %arg15[%c12_205, %c384_206] : memref<16x2304xf32, #tpu.memory_space<vmem>>, vector<4x48xf32>
    tpu.vector_store %arg15[%c12_205, %c384_206], %134 {strides = array<i32>} : memref<16x2304xf32, #tpu.memory_space<vmem>>, vector<4x48xf32>,
    %c0_207 = arith.constant 0 : index
    %c0_208 = arith.constant 0 : index
    %136 = vector.load %arg15[%c0_207, %c0_208] : memref<16x2304xf32, #tpu.memory_space<vmem>>, vector<16x432xf32>
    %137 = arith.truncf %136 : vector<16x432xf32> to vector<16x432xbf16>
    %c0_209 = arith.constant 0 : index
    %c0_210 = arith.constant 0 : index
    %138 = vector.load %arg2[%c0_209, %c0_210] : memref<432x256xbf16, #tpu.memory_space<vmem>>, vector<432x256xbf16>
    %cst_211 = arith.constant dense<0.000000e+00> : vector<16x256xf32>
    %139 = tpu.matmul %137, %138, %cst_211 {dimension_numbers = #tpu.dot_dimension_numbers<[1], [0], [0], [1], [0, 0, 1, 1], [], []>} : vector<16x432xbf16>, vector<432x256xbf16>, vector<16x256xf32> -> vector<16x256xf32>
    %c0_212 = arith.constant 0 : index
    %c0_213 = arith.constant 0 : index
    %140 = vector.load %arg3[%c0_212, %c0_213] : memref<1x256xf32, #tpu.memory_space<vmem>>, vector<1x256xf32>
    %141 = vector.broadcast %140 : vector<1x256xf32> to vector<16x256xf32>
    %142 = arith.addf %139, %141 : vector<16x256xf32>
    %cst_214 = arith.constant 0.000000e+00 : f32
    %143 = vector.broadcast %cst_214 : f32 to vector<16x256xf32>
    %144 = arith.maximumf %142, %143 : vector<16x256xf32>
    %145 = vector.extract_strided_slice %144 {offsets = [0, 0], sizes = [4, 256], strides = [1, 1]} : vector<16x256xf32> to vector<4x256xf32>
    %c1_215 = arith.constant 1 : index
    %c1_216 = arith.constant 1 : index
    %c0_217 = arith.constant 0 : index
    %146 = vector.load %arg12[%c1_215, %c1_216, %c0_217] : memref<6x6x256xf32, #tpu.memory_space<vmem>>, vector<1x4x256xf32>
    %147 = vector.shape_cast %146 : vector<1x4x256xf32> to vector<4x256xf32>
    %148 = vector.shape_cast %145 : vector<4x256xf32> to vector<1x4x256xf32>
    tpu.vector_store %arg12[%c1_215, %c1_216, %c0_217], %148 {strides = array<i32>} : memref<6x6x256xf32, #tpu.memory_space<vmem>>, vector<1x4x256xf32>,
    %149 = vector.extract_strided_slice %144 {offsets = [4, 0], sizes = [4, 256], strides = [1, 1]} : vector<16x256xf32> to vector<4x256xf32>
    %c2_218 = arith.constant 2 : index
    %c1_219 = arith.constant 1 : index
    %c0_220 = arith.constant 0 : index
    %150 = vector.load %arg12[%c2_218, %c1_219, %c0_220] : memref<6x6x256xf32, #tpu.memory_space<vmem>>, vector<1x4x256xf32>
    %151 = vector.shape_cast %150 : vector<1x4x256xf32> to vector<4x256xf32>
    %152 = vector.shape_cast %149 : vector<4x256xf32> to vector<1x4x256xf32>
    tpu.vector_store %arg12[%c2_218, %c1_219, %c0_220], %152 {strides = array<i32>} : memref<6x6x256xf32, #tpu.memory_space<vmem>>, vector<1x4x256xf32>,
    %153 = vector.extract_strided_slice %144 {offsets = [8, 0], sizes = [4, 256], strides = [1, 1]} : vector<16x256xf32> to vector<4x256xf32>
    %c3_221 = arith.constant 3 : index
    %c1_222 = arith.constant 1 : index
    %c0_223 = arith.constant 0 : index
    %154 = vector.load %arg12[%c3_221, %c1_222, %c0_223] : memref<6x6x256xf32, #tpu.memory_space<vmem>>, vector<1x4x256xf32>
    %155 = vector.shape_cast %154 : vector<1x4x256xf32> to vector<4x256xf32>
    %156 = vector.shape_cast %153 : vector<4x256xf32> to vector<1x4x256xf32>
    tpu.vector_store %arg12[%c3_221, %c1_222, %c0_223], %156 {strides = array<i32>} : memref<6x6x256xf32, #tpu.memory_space<vmem>>, vector<1x4x256xf32>,
    %157 = vector.extract_strided_slice %144 {offsets = [12, 0], sizes = [4, 256], strides = [1, 1]} : vector<16x256xf32> to vector<4x256xf32>
    %c4_224 = arith.constant 4 : index
    %c1_225 = arith.constant 1 : index
    %c0_226 = arith.constant 0 : index
    %158 = vector.load %arg12[%c4_224, %c1_225, %c0_226] : memref<6x6x256xf32, #tpu.memory_space<vmem>>, vector<1x4x256xf32>
    %159 = vector.shape_cast %158 : vector<1x4x256xf32> to vector<4x256xf32>
    %160 = vector.shape_cast %157 : vector<4x256xf32> to vector<1x4x256xf32>
    tpu.vector_store %arg12[%c4_224, %c1_225, %c0_226], %160 {strides = array<i32>} : memref<6x6x256xf32, #tpu.memory_space<vmem>>, vector<1x4x256xf32>,
    %c0_227 = arith.constant 0 : index
    %c0_228 = arith.constant 0 : index
    %c0_229 = arith.constant 0 : index
    %161 = vector.load %arg12[%c0_227, %c0_228, %c0_229] : memref<6x6x256xf32, #tpu.memory_space<vmem>>, vector<1x4x256xf32>
    %162 = vector.shape_cast %161 : vector<1x4x256xf32> to vector<4x256xf32>
    %c0_230 = arith.constant 0 : index
    %c0_231 = arith.constant 0 : index
    %163 = vector.load %arg15[%c0_230, %c0_231] : memref<16x2304xf32, #tpu.memory_space<vmem>>, vector<4x256xf32>
    tpu.vector_store %arg15[%c0_230, %c0_231], %162 {strides = array<i32>} : memref<16x2304xf32, #tpu.memory_space<vmem>>, vector<4x256xf32>,
    %c1_232 = arith.constant 1 : index
    %c0_233 = arith.constant 0 : index
    %c0_234 = arith.constant 0 : index
    %164 = vector.load %arg12[%c1_232, %c0_233, %c0_234] : memref<6x6x256xf32, #tpu.memory_space<vmem>>, vector<1x4x256xf32>
    %165 = vector.shape_cast %164 : vector<1x4x256xf32> to vector<4x256xf32>
    %c4_235 = arith.constant 4 : index
    %c0_236 = arith.constant 0 : index
    %166 = vector.load %arg15[%c4_235, %c0_236] : memref<16x2304xf32, #tpu.memory_space<vmem>>, vector<4x256xf32>
    tpu.vector_store %arg15[%c4_235, %c0_236], %165 {strides = array<i32>} : memref<16x2304xf32, #tpu.memory_space<vmem>>, vector<4x256xf32>,
    %c2_237 = arith.constant 2 : index
    %c0_238 = arith.constant 0 : index
    %c0_239 = arith.constant 0 : index
    %167 = vector.load %arg12[%c2_237, %c0_238, %c0_239] : memref<6x6x256xf32, #tpu.memory_space<vmem>>, vector<1x4x256xf32>
    %168 = vector.shape_cast %167 : vector<1x4x256xf32> to vector<4x256xf32>
    %c8_240 = arith.constant 8 : index
    %c0_241 = arith.constant 0 : index
    %169 = vector.load %arg15[%c8_240, %c0_241] : memref<16x2304xf32, #tpu.memory_space<vmem>>, vector<4x256xf32>
    tpu.vector_store %arg15[%c8_240, %c0_241], %168 {strides = array<i32>} : memref<16x2304xf32, #tpu.memory_space<vmem>>, vector<4x256xf32>,
    %c3_242 = arith.constant 3 : index
    %c0_243 = arith.constant 0 : index
    %c0_244 = arith.constant 0 : index
    %170 = vector.load %arg12[%c3_242, %c0_243, %c0_244] : memref<6x6x256xf32, #tpu.memory_space<vmem>>, vector<1x4x256xf32>
    %171 = vector.shape_cast %170 : vector<1x4x256xf32> to vector<4x256xf32>
    %c12_245 = arith.constant 12 : index
    %c0_246 = arith.constant 0 : index
    %172 = vector.load %arg15[%c12_245, %c0_246] : memref<16x2304xf32, #tpu.memory_space<vmem>>, vector<4x256xf32>
    tpu.vector_store %arg15[%c12_245, %c0_246], %171 {strides = array<i32>} : memref<16x2304xf32, #tpu.memory_space<vmem>>, vector<4x256xf32>,
    %c0_247 = arith.constant 0 : index
    %c1_248 = arith.constant 1 : index
    %c0_249 = arith.constant 0 : index
    %173 = vector.load %arg12[%c0_247, %c1_248, %c0_249] : memref<6x6x256xf32, #tpu.memory_space<vmem>>, vector<1x4x256xf32>
    %174 = vector.shape_cast %173 : vector<1x4x256xf32> to vector<4x256xf32>
    %c0_250 = arith.constant 0 : index
    %c256 = arith.constant 256 : index
    %175 = vector.load %arg15[%c0_250, %c256] : memref<16x2304xf32, #tpu.memory_space<vmem>>, vector<4x256xf32>
    tpu.vector_store %arg15[%c0_250, %c256], %174 {strides = array<i32>} : memref<16x2304xf32, #tpu.memory_space<vmem>>, vector<4x256xf32>,
    %c1_251 = arith.constant 1 : index
    %c1_252 = arith.constant 1 : index
    %c0_253 = arith.constant 0 : index
    %176 = vector.load %arg12[%c1_251, %c1_252, %c0_253] : memref<6x6x256xf32, #tpu.memory_space<vmem>>, vector<1x4x256xf32>
    %177 = vector.shape_cast %176 : vector<1x4x256xf32> to vector<4x256xf32>
    %c4_254 = arith.constant 4 : index
    %c256_255 = arith.constant 256 : index
    %178 = vector.load %arg15[%c4_254, %c256_255] : memref<16x2304xf32, #tpu.memory_space<vmem>>, vector<4x256xf32>
    tpu.vector_store %arg15[%c4_254, %c256_255], %177 {strides = array<i32>} : memref<16x2304xf32, #tpu.memory_space<vmem>>, vector<4x256xf32>,
    %c2_256 = arith.constant 2 : index
    %c1_257 = arith.constant 1 : index
    %c0_258 = arith.constant 0 : index
    %179 = vector.load %arg12[%c2_256, %c1_257, %c0_258] : memref<6x6x256xf32, #tpu.memory_space<vmem>>, vector<1x4x256xf32>
    %180 = vector.shape_cast %179 : vector<1x4x256xf32> to vector<4x256xf32>
    %c8_259 = arith.constant 8 : index
    %c256_260 = arith.constant 256 : index
    %181 = vector.load %arg15[%c8_259, %c256_260] : memref<16x2304xf32, #tpu.memory_space<vmem>>, vector<4x256xf32>
    tpu.vector_store %arg15[%c8_259, %c256_260], %180 {strides = array<i32>} : memref<16x2304xf32, #tpu.memory_space<vmem>>, vector<4x256xf32>,
    %c3_261 = arith.constant 3 : index
    %c1_262 = arith.constant 1 : index
    %c0_263 = arith.constant 0 : index
    %182 = vector.load %arg12[%c3_261, %c1_262, %c0_263] : memref<6x6x256xf32, #tpu.memory_space<vmem>>, vector<1x4x256xf32>
    %183 = vector.shape_cast %182 : vector<1x4x256xf32> to vector<4x256xf32>
    %c12_264 = arith.constant 12 : index
    %c256_265 = arith.constant 256 : index
    %184 = vector.load %arg15[%c12_264, %c256_265] : memref<16x2304xf32, #tpu.memory_space<vmem>>, vector<4x256xf32>
    tpu.vector_store %arg15[%c12_264, %c256_265], %183 {strides = array<i32>} : memref<16x2304xf32, #tpu.memory_space<vmem>>, vector<4x256xf32>,
    %c0_266 = arith.constant 0 : index
    %c2_267 = arith.constant 2 : index
    %c0_268 = arith.constant 0 : index
    %185 = vector.load %arg12[%c0_266, %c2_267, %c0_268] : memref<6x6x256xf32, #tpu.memory_space<vmem>>, vector<1x4x256xf32>
    %186 = vector.shape_cast %185 : vector<1x4x256xf32> to vector<4x256xf32>
    %c0_269 = arith.constant 0 : index
    %c512 = arith.constant 512 : index
    %187 = vector.load %arg15[%c0_269, %c512] : memref<16x2304xf32, #tpu.memory_space<vmem>>, vector<4x256xf32>
    tpu.vector_store %arg15[%c0_269, %c512], %186 {strides = array<i32>} : memref<16x2304xf32, #tpu.memory_space<vmem>>, vector<4x256xf32>,
    %c1_270 = arith.constant 1 : index
    %c2_271 = arith.constant 2 : index
    %c0_272 = arith.constant 0 : index
    %188 = vector.load %arg12[%c1_270, %c2_271, %c0_272] : memref<6x6x256xf32, #tpu.memory_space<vmem>>, vector<1x4x256xf32>
    %189 = vector.shape_cast %188 : vector<1x4x256xf32> to vector<4x256xf32>
    %c4_273 = arith.constant 4 : index
    %c512_274 = arith.constant 512 : index
    %190 = vector.load %arg15[%c4_273, %c512_274] : memref<16x2304xf32, #tpu.memory_space<vmem>>, vector<4x256xf32>
    tpu.vector_store %arg15[%c4_273, %c512_274], %189 {strides = array<i32>} : memref<16x2304xf32, #tpu.memory_space<vmem>>, vector<4x256xf32>,
    %c2_275 = arith.constant 2 : index
    %c2_276 = arith.constant 2 : index
    %c0_277 = arith.constant 0 : index
    %191 = vector.load %arg12[%c2_275, %c2_276, %c0_277] : memref<6x6x256xf32, #tpu.memory_space<vmem>>, vector<1x4x256xf32>
    %192 = vector.shape_cast %191 : vector<1x4x256xf32> to vector<4x256xf32>
    %c8_278 = arith.constant 8 : index
    %c512_279 = arith.constant 512 : index
    %193 = vector.load %arg15[%c8_278, %c512_279] : memref<16x2304xf32, #tpu.memory_space<vmem>>, vector<4x256xf32>
    tpu.vector_store %arg15[%c8_278, %c512_279], %192 {strides = array<i32>} : memref<16x2304xf32, #tpu.memory_space<vmem>>, vector<4x256xf32>,
    %c3_280 = arith.constant 3 : index
    %c2_281 = arith.constant 2 : index
    %c0_282 = arith.constant 0 : index
    %194 = vector.load %arg12[%c3_280, %c2_281, %c0_282] : memref<6x6x256xf32, #tpu.memory_space<vmem>>, vector<1x4x256xf32>
    %195 = vector.shape_cast %194 : vector<1x4x256xf32> to vector<4x256xf32>
    %c12_283 = arith.constant 12 : index
    %c512_284 = arith.constant 512 : index
    %196 = vector.load %arg15[%c12_283, %c512_284] : memref<16x2304xf32, #tpu.memory_space<vmem>>, vector<4x256xf32>
    tpu.vector_store %arg15[%c12_283, %c512_284], %195 {strides = array<i32>} : memref<16x2304xf32, #tpu.memory_space<vmem>>, vector<4x256xf32>,
    %c1_285 = arith.constant 1 : index
    %c0_286 = arith.constant 0 : index
    %c0_287 = arith.constant 0 : index
    %197 = vector.load %arg12[%c1_285, %c0_286, %c0_287] : memref<6x6x256xf32, #tpu.memory_space<vmem>>, vector<1x4x256xf32>
    %198 = vector.shape_cast %197 : vector<1x4x256xf32> to vector<4x256xf32>
    %c0_288 = arith.constant 0 : index
    %c768 = arith.constant 768 : index
    %199 = vector.load %arg15[%c0_288, %c768] : memref<16x2304xf32, #tpu.memory_space<vmem>>, vector<4x256xf32>
    tpu.vector_store %arg15[%c0_288, %c768], %198 {strides = array<i32>} : memref<16x2304xf32, #tpu.memory_space<vmem>>, vector<4x256xf32>,
    %c2_289 = arith.constant 2 : index
    %c0_290 = arith.constant 0 : index
    %c0_291 = arith.constant 0 : index
    %200 = vector.load %arg12[%c2_289, %c0_290, %c0_291] : memref<6x6x256xf32, #tpu.memory_space<vmem>>, vector<1x4x256xf32>
    %201 = vector.shape_cast %200 : vector<1x4x256xf32> to vector<4x256xf32>
    %c4_292 = arith.constant 4 : index
    %c768_293 = arith.constant 768 : index
    %202 = vector.load %arg15[%c4_292, %c768_293] : memref<16x2304xf32, #tpu.memory_space<vmem>>, vector<4x256xf32>
    tpu.vector_store %arg15[%c4_292, %c768_293], %201 {strides = array<i32>} : memref<16x2304xf32, #tpu.memory_space<vmem>>, vector<4x256xf32>,
    %c3_294 = arith.constant 3 : index
    %c0_295 = arith.constant 0 : index
    %c0_296 = arith.constant 0 : index
    %203 = vector.load %arg12[%c3_294, %c0_295, %c0_296] : memref<6x6x256xf32, #tpu.memory_space<vmem>>, vector<1x4x256xf32>
    %204 = vector.shape_cast %203 : vector<1x4x256xf32> to vector<4x256xf32>
    %c8_297 = arith.constant 8 : index
    %c768_298 = arith.constant 768 : index
    %205 = vector.load %arg15[%c8_297, %c768_298] : memref<16x2304xf32, #tpu.memory_space<vmem>>, vector<4x256xf32>
    tpu.vector_store %arg15[%c8_297, %c768_298], %204 {strides = array<i32>} : memref<16x2304xf32, #tpu.memory_space<vmem>>, vector<4x256xf32>,
    %c4_299 = arith.constant 4 : index
    %c0_300 = arith.constant 0 : index
    %c0_301 = arith.constant 0 : index
    %206 = vector.load %arg12[%c4_299, %c0_300, %c0_301] : memref<6x6x256xf32, #tpu.memory_space<vmem>>, vector<1x4x256xf32>
    %207 = vector.shape_cast %206 : vector<1x4x256xf32> to vector<4x256xf32>
    %c12_302 = arith.constant 12 : index
    %c768_303 = arith.constant 768 : index
    %208 = vector.load %arg15[%c12_302, %c768_303] : memref<16x2304xf32, #tpu.memory_space<vmem>>, vector<4x256xf32>
    tpu.vector_store %arg15[%c12_302, %c768_303], %207 {strides = array<i32>} : memref<16x2304xf32, #tpu.memory_space<vmem>>, vector<4x256xf32>,
    %c1_304 = arith.constant 1 : index
    %c1_305 = arith.constant 1 : index
    %c0_306 = arith.constant 0 : index
    %209 = vector.load %arg12[%c1_304, %c1_305, %c0_306] : memref<6x6x256xf32, #tpu.memory_space<vmem>>, vector<1x4x256xf32>
    %210 = vector.shape_cast %209 : vector<1x4x256xf32> to vector<4x256xf32>
    %c0_307 = arith.constant 0 : index
    %c1024 = arith.constant 1024 : index
    %211 = vector.load %arg15[%c0_307, %c1024] : memref<16x2304xf32, #tpu.memory_space<vmem>>, vector<4x256xf32>
    tpu.vector_store %arg15[%c0_307, %c1024], %210 {strides = array<i32>} : memref<16x2304xf32, #tpu.memory_space<vmem>>, vector<4x256xf32>,
    %c2_308 = arith.constant 2 : index
    %c1_309 = arith.constant 1 : index
    %c0_310 = arith.constant 0 : index
    %212 = vector.load %arg12[%c2_308, %c1_309, %c0_310] : memref<6x6x256xf32, #tpu.memory_space<vmem>>, vector<1x4x256xf32>
    %213 = vector.shape_cast %212 : vector<1x4x256xf32> to vector<4x256xf32>
    %c4_311 = arith.constant 4 : index
    %c1024_312 = arith.constant 1024 : index
    %214 = vector.load %arg15[%c4_311, %c1024_312] : memref<16x2304xf32, #tpu.memory_space<vmem>>, vector<4x256xf32>
    tpu.vector_store %arg15[%c4_311, %c1024_312], %213 {strides = array<i32>} : memref<16x2304xf32, #tpu.memory_space<vmem>>, vector<4x256xf32>,
    %c3_313 = arith.constant 3 : index
    %c1_314 = arith.constant 1 : index
    %c0_315 = arith.constant 0 : index
    %215 = vector.load %arg12[%c3_313, %c1_314, %c0_315] : memref<6x6x256xf32, #tpu.memory_space<vmem>>, vector<1x4x256xf32>
    %216 = vector.shape_cast %215 : vector<1x4x256xf32> to vector<4x256xf32>
    %c8_316 = arith.constant 8 : index
    %c1024_317 = arith.constant 1024 : index
    %217 = vector.load %arg15[%c8_316, %c1024_317] : memref<16x2304xf32, #tpu.memory_space<vmem>>, vector<4x256xf32>
    tpu.vector_store %arg15[%c8_316, %c1024_317], %216 {strides = array<i32>} : memref<16x2304xf32, #tpu.memory_space<vmem>>, vector<4x256xf32>,
    %c4_318 = arith.constant 4 : index
    %c1_319 = arith.constant 1 : index
    %c0_320 = arith.constant 0 : index
    %218 = vector.load %arg12[%c4_318, %c1_319, %c0_320] : memref<6x6x256xf32, #tpu.memory_space<vmem>>, vector<1x4x256xf32>
    %219 = vector.shape_cast %218 : vector<1x4x256xf32> to vector<4x256xf32>
    %c12_321 = arith.constant 12 : index
    %c1024_322 = arith.constant 1024 : index
    %220 = vector.load %arg15[%c12_321, %c1024_322] : memref<16x2304xf32, #tpu.memory_space<vmem>>, vector<4x256xf32>
    tpu.vector_store %arg15[%c12_321, %c1024_322], %219 {strides = array<i32>} : memref<16x2304xf32, #tpu.memory_space<vmem>>, vector<4x256xf32>,
    %c1_323 = arith.constant 1 : index
    %c2_324 = arith.constant 2 : index
    %c0_325 = arith.constant 0 : index
    %221 = vector.load %arg12[%c1_323, %c2_324, %c0_325] : memref<6x6x256xf32, #tpu.memory_space<vmem>>, vector<1x4x256xf32>
    %222 = vector.shape_cast %221 : vector<1x4x256xf32> to vector<4x256xf32>
    %c0_326 = arith.constant 0 : index
    %c1280 = arith.constant 1280 : index
    %223 = vector.load %arg15[%c0_326, %c1280] : memref<16x2304xf32, #tpu.memory_space<vmem>>, vector<4x256xf32>
    tpu.vector_store %arg15[%c0_326, %c1280], %222 {strides = array<i32>} : memref<16x2304xf32, #tpu.memory_space<vmem>>, vector<4x256xf32>,
    %c2_327 = arith.constant 2 : index
    %c2_328 = arith.constant 2 : index
    %c0_329 = arith.constant 0 : index
    %224 = vector.load %arg12[%c2_327, %c2_328, %c0_329] : memref<6x6x256xf32, #tpu.memory_space<vmem>>, vector<1x4x256xf32>
    %225 = vector.shape_cast %224 : vector<1x4x256xf32> to vector<4x256xf32>
    %c4_330 = arith.constant 4 : index
    %c1280_331 = arith.constant 1280 : index
    %226 = vector.load %arg15[%c4_330, %c1280_331] : memref<16x2304xf32, #tpu.memory_space<vmem>>, vector<4x256xf32>
    tpu.vector_store %arg15[%c4_330, %c1280_331], %225 {strides = array<i32>} : memref<16x2304xf32, #tpu.memory_space<vmem>>, vector<4x256xf32>,
    %c3_332 = arith.constant 3 : index
    %c2_333 = arith.constant 2 : index
    %c0_334 = arith.constant 0 : index
    %227 = vector.load %arg12[%c3_332, %c2_333, %c0_334] : memref<6x6x256xf32, #tpu.memory_space<vmem>>, vector<1x4x256xf32>
    %228 = vector.shape_cast %227 : vector<1x4x256xf32> to vector<4x256xf32>
    %c8_335 = arith.constant 8 : index
    %c1280_336 = arith.constant 1280 : index
    %229 = vector.load %arg15[%c8_335, %c1280_336] : memref<16x2304xf32, #tpu.memory_space<vmem>>, vector<4x256xf32>
    tpu.vector_store %arg15[%c8_335, %c1280_336], %228 {strides = array<i32>} : memref<16x2304xf32, #tpu.memory_space<vmem>>, vector<4x256xf32>,
    %c4_337 = arith.constant 4 : index
    %c2_338 = arith.constant 2 : index
    %c0_339 = arith.constant 0 : index
    %230 = vector.load %arg12[%c4_337, %c2_338, %c0_339] : memref<6x6x256xf32, #tpu.memory_space<vmem>>, vector<1x4x256xf32>
    %231 = vector.shape_cast %230 : vector<1x4x256xf32> to vector<4x256xf32>
    %c12_340 = arith.constant 12 : index
    %c1280_341 = arith.constant 1280 : index
    %232 = vector.load %arg15[%c12_340, %c1280_341] : memref<16x2304xf32, #tpu.memory_space<vmem>>, vector<4x256xf32>
    tpu.vector_store %arg15[%c12_340, %c1280_341], %231 {strides = array<i32>} : memref<16x2304xf32, #tpu.memory_space<vmem>>, vector<4x256xf32>,
    %c2_342 = arith.constant 2 : index
    %c0_343 = arith.constant 0 : index
    %c0_344 = arith.constant 0 : index
    %233 = vector.load %arg12[%c2_342, %c0_343, %c0_344] : memref<6x6x256xf32, #tpu.memory_space<vmem>>, vector<1x4x256xf32>
    %234 = vector.shape_cast %233 : vector<1x4x256xf32> to vector<4x256xf32>
    %c0_345 = arith.constant 0 : index
    %c1536 = arith.constant 1536 : index
    %235 = vector.load %arg15[%c0_345, %c1536] : memref<16x2304xf32, #tpu.memory_space<vmem>>, vector<4x256xf32>
    tpu.vector_store %arg15[%c0_345, %c1536], %234 {strides = array<i32>} : memref<16x2304xf32, #tpu.memory_space<vmem>>, vector<4x256xf32>,
    %c3_346 = arith.constant 3 : index
    %c0_347 = arith.constant 0 : index
    %c0_348 = arith.constant 0 : index
    %236 = vector.load %arg12[%c3_346, %c0_347, %c0_348] : memref<6x6x256xf32, #tpu.memory_space<vmem>>, vector<1x4x256xf32>
    %237 = vector.shape_cast %236 : vector<1x4x256xf32> to vector<4x256xf32>
    %c4_349 = arith.constant 4 : index
    %c1536_350 = arith.constant 1536 : index
    %238 = vector.load %arg15[%c4_349, %c1536_350] : memref<16x2304xf32, #tpu.memory_space<vmem>>, vector<4x256xf32>
    tpu.vector_store %arg15[%c4_349, %c1536_350], %237 {strides = array<i32>} : memref<16x2304xf32, #tpu.memory_space<vmem>>, vector<4x256xf32>,
    %c4_351 = arith.constant 4 : index
    %c0_352 = arith.constant 0 : index
    %c0_353 = arith.constant 0 : index
    %239 = vector.load %arg12[%c4_351, %c0_352, %c0_353] : memref<6x6x256xf32, #tpu.memory_space<vmem>>, vector<1x4x256xf32>
    %240 = vector.shape_cast %239 : vector<1x4x256xf32> to vector<4x256xf32>
    %c8_354 = arith.constant 8 : index
    %c1536_355 = arith.constant 1536 : index
    %241 = vector.load %arg15[%c8_354, %c1536_355] : memref<16x2304xf32, #tpu.memory_space<vmem>>, vector<4x256xf32>
    tpu.vector_store %arg15[%c8_354, %c1536_355], %240 {strides = array<i32>} : memref<16x2304xf32, #tpu.memory_space<vmem>>, vector<4x256xf32>,
    %c5_356 = arith.constant 5 : index
    %c0_357 = arith.constant 0 : index
    %c0_358 = arith.constant 0 : index
    %242 = vector.load %arg12[%c5_356, %c0_357, %c0_358] : memref<6x6x256xf32, #tpu.memory_space<vmem>>, vector<1x4x256xf32>
    %243 = vector.shape_cast %242 : vector<1x4x256xf32> to vector<4x256xf32>
    %c12_359 = arith.constant 12 : index
    %c1536_360 = arith.constant 1536 : index
    %244 = vector.load %arg15[%c12_359, %c1536_360] : memref<16x2304xf32, #tpu.memory_space<vmem>>, vector<4x256xf32>
    tpu.vector_store %arg15[%c12_359, %c1536_360], %243 {strides = array<i32>} : memref<16x2304xf32, #tpu.memory_space<vmem>>, vector<4x256xf32>,
    %c2_361 = arith.constant 2 : index
    %c1_362 = arith.constant 1 : index
    %c0_363 = arith.constant 0 : index
    %245 = vector.load %arg12[%c2_361, %c1_362, %c0_363] : memref<6x6x256xf32, #tpu.memory_space<vmem>>, vector<1x4x256xf32>
    %246 = vector.shape_cast %245 : vector<1x4x256xf32> to vector<4x256xf32>
    %c0_364 = arith.constant 0 : index
    %c1792 = arith.constant 1792 : index
    %247 = vector.load %arg15[%c0_364, %c1792] : memref<16x2304xf32, #tpu.memory_space<vmem>>, vector<4x256xf32>
    tpu.vector_store %arg15[%c0_364, %c1792], %246 {strides = array<i32>} : memref<16x2304xf32, #tpu.memory_space<vmem>>, vector<4x256xf32>,
    %c3_365 = arith.constant 3 : index
    %c1_366 = arith.constant 1 : index
    %c0_367 = arith.constant 0 : index
    %248 = vector.load %arg12[%c3_365, %c1_366, %c0_367] : memref<6x6x256xf32, #tpu.memory_space<vmem>>, vector<1x4x256xf32>
    %249 = vector.shape_cast %248 : vector<1x4x256xf32> to vector<4x256xf32>
    %c4_368 = arith.constant 4 : index
    %c1792_369 = arith.constant 1792 : index
    %250 = vector.load %arg15[%c4_368, %c1792_369] : memref<16x2304xf32, #tpu.memory_space<vmem>>, vector<4x256xf32>
    tpu.vector_store %arg15[%c4_368, %c1792_369], %249 {strides = array<i32>} : memref<16x2304xf32, #tpu.memory_space<vmem>>, vector<4x256xf32>,
    %c4_370 = arith.constant 4 : index
    %c1_371 = arith.constant 1 : index
    %c0_372 = arith.constant 0 : index
    %251 = vector.load %arg12[%c4_370, %c1_371, %c0_372] : memref<6x6x256xf32, #tpu.memory_space<vmem>>, vector<1x4x256xf32>
    %252 = vector.shape_cast %251 : vector<1x4x256xf32> to vector<4x256xf32>
    %c8_373 = arith.constant 8 : index
    %c1792_374 = arith.constant 1792 : index
    %253 = vector.load %arg15[%c8_373, %c1792_374] : memref<16x2304xf32, #tpu.memory_space<vmem>>, vector<4x256xf32>
    tpu.vector_store %arg15[%c8_373, %c1792_374], %252 {strides = array<i32>} : memref<16x2304xf32, #tpu.memory_space<vmem>>, vector<4x256xf32>,
    %c5_375 = arith.constant 5 : index
    %c1_376 = arith.constant 1 : index
    %c0_377 = arith.constant 0 : index
    %254 = vector.load %arg12[%c5_375, %c1_376, %c0_377] : memref<6x6x256xf32, #tpu.memory_space<vmem>>, vector<1x4x256xf32>
    %255 = vector.shape_cast %254 : vector<1x4x256xf32> to vector<4x256xf32>
    %c12_378 = arith.constant 12 : index
    %c1792_379 = arith.constant 1792 : index
    %256 = vector.load %arg15[%c12_378, %c1792_379] : memref<16x2304xf32, #tpu.memory_space<vmem>>, vector<4x256xf32>
    tpu.vector_store %arg15[%c12_378, %c1792_379], %255 {strides = array<i32>} : memref<16x2304xf32, #tpu.memory_space<vmem>>, vector<4x256xf32>,
    %c2_380 = arith.constant 2 : index
    %c2_381 = arith.constant 2 : index
    %c0_382 = arith.constant 0 : index
    %257 = vector.load %arg12[%c2_380, %c2_381, %c0_382] : memref<6x6x256xf32, #tpu.memory_space<vmem>>, vector<1x4x256xf32>
    %258 = vector.shape_cast %257 : vector<1x4x256xf32> to vector<4x256xf32>
    %c0_383 = arith.constant 0 : index
    %c2048 = arith.constant 2048 : index
    %259 = vector.load %arg15[%c0_383, %c2048] : memref<16x2304xf32, #tpu.memory_space<vmem>>, vector<4x256xf32>
    tpu.vector_store %arg15[%c0_383, %c2048], %258 {strides = array<i32>} : memref<16x2304xf32, #tpu.memory_space<vmem>>, vector<4x256xf32>,
    %c3_384 = arith.constant 3 : index
    %c2_385 = arith.constant 2 : index
    %c0_386 = arith.constant 0 : index
    %260 = vector.load %arg12[%c3_384, %c2_385, %c0_386] : memref<6x6x256xf32, #tpu.memory_space<vmem>>, vector<1x4x256xf32>
    %261 = vector.shape_cast %260 : vector<1x4x256xf32> to vector<4x256xf32>
    %c4_387 = arith.constant 4 : index
    %c2048_388 = arith.constant 2048 : index
    %262 = vector.load %arg15[%c4_387, %c2048_388] : memref<16x2304xf32, #tpu.memory_space<vmem>>, vector<4x256xf32>
    tpu.vector_store %arg15[%c4_387, %c2048_388], %261 {strides = array<i32>} : memref<16x2304xf32, #tpu.memory_space<vmem>>, vector<4x256xf32>,
    %c4_389 = arith.constant 4 : index
    %c2_390 = arith.constant 2 : index
    %c0_391 = arith.constant 0 : index
    %263 = vector.load %arg12[%c4_389, %c2_390, %c0_391] : memref<6x6x256xf32, #tpu.memory_space<vmem>>, vector<1x4x256xf32>
    %264 = vector.shape_cast %263 : vector<1x4x256xf32> to vector<4x256xf32>
    %c8_392 = arith.constant 8 : index
    %c2048_393 = arith.constant 2048 : index
    %265 = vector.load %arg15[%c8_392, %c2048_393] : memref<16x2304xf32, #tpu.memory_space<vmem>>, vector<4x256xf32>
    tpu.vector_store %arg15[%c8_392, %c2048_393], %264 {strides = array<i32>} : memref<16x2304xf32, #tpu.memory_space<vmem>>, vector<4x256xf32>,
    %c5_394 = arith.constant 5 : index
    %c2_395 = arith.constant 2 : index
    %c0_396 = arith.constant 0 : index
    %266 = vector.load %arg12[%c5_394, %c2_395, %c0_396] : memref<6x6x256xf32, #tpu.memory_space<vmem>>, vector<1x4x256xf32>
    %267 = vector.shape_cast %266 : vector<1x4x256xf32> to vector<4x256xf32>
    %c12_397 = arith.constant 12 : index
    %c2048_398 = arith.constant 2048 : index
    %268 = vector.load %arg15[%c12_397, %c2048_398] : memref<16x2304xf32, #tpu.memory_space<vmem>>, vector<4x256xf32>
    tpu.vector_store %arg15[%c12_397, %c2048_398], %267 {strides = array<i32>} : memref<16x2304xf32, #tpu.memory_space<vmem>>, vector<4x256xf32>,
    %c0_399 = arith.constant 0 : index
    %c0_400 = arith.constant 0 : index
    %269 = vector.load %arg15[%c0_399, %c0_400] : memref<16x2304xf32, #tpu.memory_space<vmem>>, vector<16x2304xf32>
    %270 = arith.truncf %269 : vector<16x2304xf32> to vector<16x2304xbf16>
    %c0_401 = arith.constant 0 : index
    %c0_402 = arith.constant 0 : index
    %271 = vector.load %arg4[%c0_401, %c0_402] : memref<2304x128xbf16, #tpu.memory_space<vmem>>, vector<2304x128xbf16>
    %cst_403 = arith.constant dense<0.000000e+00> : vector<16x128xf32>
    %272 = tpu.matmul %270, %271, %cst_403 {dimension_numbers = #tpu.dot_dimension_numbers<[1], [0], [0], [1], [0, 0, 1, 1], [], []>} : vector<16x2304xbf16>, vector<2304x128xbf16>, vector<16x128xf32> -> vector<16x128xf32>
    %c0_404 = arith.constant 0 : index
    %c0_405 = arith.constant 0 : index
    %273 = vector.load %arg5[%c0_404, %c0_405] : memref<1x128xf32, #tpu.memory_space<vmem>>, vector<1x128xf32>
    %274 = vector.broadcast %273 : vector<1x128xf32> to vector<16x128xf32>
    %275 = arith.addf %272, %274 : vector<16x128xf32>
    %cst_406 = arith.constant 0.000000e+00 : f32
    %276 = vector.broadcast %cst_406 : f32 to vector<16x128xf32>
    %277 = arith.maximumf %275, %276 : vector<16x128xf32>
    %278 = vector.extract_strided_slice %277 {offsets = [0, 0], sizes = [4, 128], strides = [1, 1]} : vector<16x128xf32> to vector<4x128xf32>
    %c1_407 = arith.constant 1 : index
    %c1_408 = arith.constant 1 : index
    %c0_409 = arith.constant 0 : index
    %279 = vector.load %arg13[%c1_407, %c1_408, %c0_409] : memref<6x6x128xf32, #tpu.memory_space<vmem>>, vector<1x4x128xf32>
    %280 = vector.shape_cast %279 : vector<1x4x128xf32> to vector<4x128xf32>
    %281 = vector.shape_cast %278 : vector<4x128xf32> to vector<1x4x128xf32>
    tpu.vector_store %arg13[%c1_407, %c1_408, %c0_409], %281 {strides = array<i32>} : memref<6x6x128xf32, #tpu.memory_space<vmem>>, vector<1x4x128xf32>,
    %282 = vector.extract_strided_slice %277 {offsets = [4, 0], sizes = [4, 128], strides = [1, 1]} : vector<16x128xf32> to vector<4x128xf32>
    %c2_410 = arith.constant 2 : index
    %c1_411 = arith.constant 1 : index
    %c0_412 = arith.constant 0 : index
    %283 = vector.load %arg13[%c2_410, %c1_411, %c0_412] : memref<6x6x128xf32, #tpu.memory_space<vmem>>, vector<1x4x128xf32>
    %284 = vector.shape_cast %283 : vector<1x4x128xf32> to vector<4x128xf32>
    %285 = vector.shape_cast %282 : vector<4x128xf32> to vector<1x4x128xf32>
    tpu.vector_store %arg13[%c2_410, %c1_411, %c0_412], %285 {strides = array<i32>} : memref<6x6x128xf32, #tpu.memory_space<vmem>>, vector<1x4x128xf32>,
    %286 = vector.extract_strided_slice %277 {offsets = [8, 0], sizes = [4, 128], strides = [1, 1]} : vector<16x128xf32> to vector<4x128xf32>
    %c3_413 = arith.constant 3 : index
    %c1_414 = arith.constant 1 : index
    %c0_415 = arith.constant 0 : index
    %287 = vector.load %arg13[%c3_413, %c1_414, %c0_415] : memref<6x6x128xf32, #tpu.memory_space<vmem>>, vector<1x4x128xf32>
    %288 = vector.shape_cast %287 : vector<1x4x128xf32> to vector<4x128xf32>
    %289 = vector.shape_cast %286 : vector<4x128xf32> to vector<1x4x128xf32>
    tpu.vector_store %arg13[%c3_413, %c1_414, %c0_415], %289 {strides = array<i32>} : memref<6x6x128xf32, #tpu.memory_space<vmem>>, vector<1x4x128xf32>,
    %290 = vector.extract_strided_slice %277 {offsets = [12, 0], sizes = [4, 128], strides = [1, 1]} : vector<16x128xf32> to vector<4x128xf32>
    %c4_416 = arith.constant 4 : index
    %c1_417 = arith.constant 1 : index
    %c0_418 = arith.constant 0 : index
    %291 = vector.load %arg13[%c4_416, %c1_417, %c0_418] : memref<6x6x128xf32, #tpu.memory_space<vmem>>, vector<1x4x128xf32>
    %292 = vector.shape_cast %291 : vector<1x4x128xf32> to vector<4x128xf32>
    %293 = vector.shape_cast %290 : vector<4x128xf32> to vector<1x4x128xf32>
    tpu.vector_store %arg13[%c4_416, %c1_417, %c0_418], %293 {strides = array<i32>} : memref<6x6x128xf32, #tpu.memory_space<vmem>>, vector<1x4x128xf32>,
    %c0_419 = arith.constant 0 : index
    %c0_420 = arith.constant 0 : index
    %c0_421 = arith.constant 0 : index
    %294 = vector.load %arg13[%c0_419, %c0_420, %c0_421] : memref<6x6x128xf32, #tpu.memory_space<vmem>>, vector<1x4x128xf32>
    %295 = vector.shape_cast %294 : vector<1x4x128xf32> to vector<4x128xf32>
    %c0_422 = arith.constant 0 : index
    %c0_423 = arith.constant 0 : index
    %296 = vector.load %arg15[%c0_422, %c0_423] : memref<16x2304xf32, #tpu.memory_space<vmem>>, vector<4x128xf32>
    tpu.vector_store %arg15[%c0_422, %c0_423], %295 {strides = array<i32>} : memref<16x2304xf32, #tpu.memory_space<vmem>>, vector<4x128xf32>,
    %c1_424 = arith.constant 1 : index
    %c0_425 = arith.constant 0 : index
    %c0_426 = arith.constant 0 : index
    %297 = vector.load %arg13[%c1_424, %c0_425, %c0_426] : memref<6x6x128xf32, #tpu.memory_space<vmem>>, vector<1x4x128xf32>
    %298 = vector.shape_cast %297 : vector<1x4x128xf32> to vector<4x128xf32>
    %c4_427 = arith.constant 4 : index
    %c0_428 = arith.constant 0 : index
    %299 = vector.load %arg15[%c4_427, %c0_428] : memref<16x2304xf32, #tpu.memory_space<vmem>>, vector<4x128xf32>
    tpu.vector_store %arg15[%c4_427, %c0_428], %298 {strides = array<i32>} : memref<16x2304xf32, #tpu.memory_space<vmem>>, vector<4x128xf32>,
    %c2_429 = arith.constant 2 : index
    %c0_430 = arith.constant 0 : index
    %c0_431 = arith.constant 0 : index
    %300 = vector.load %arg13[%c2_429, %c0_430, %c0_431] : memref<6x6x128xf32, #tpu.memory_space<vmem>>, vector<1x4x128xf32>
    %301 = vector.shape_cast %300 : vector<1x4x128xf32> to vector<4x128xf32>
    %c8_432 = arith.constant 8 : index
    %c0_433 = arith.constant 0 : index
    %302 = vector.load %arg15[%c8_432, %c0_433] : memref<16x2304xf32, #tpu.memory_space<vmem>>, vector<4x128xf32>
    tpu.vector_store %arg15[%c8_432, %c0_433], %301 {strides = array<i32>} : memref<16x2304xf32, #tpu.memory_space<vmem>>, vector<4x128xf32>,
    %c3_434 = arith.constant 3 : index
    %c0_435 = arith.constant 0 : index
    %c0_436 = arith.constant 0 : index
    %303 = vector.load %arg13[%c3_434, %c0_435, %c0_436] : memref<6x6x128xf32, #tpu.memory_space<vmem>>, vector<1x4x128xf32>
    %304 = vector.shape_cast %303 : vector<1x4x128xf32> to vector<4x128xf32>
    %c12_437 = arith.constant 12 : index
    %c0_438 = arith.constant 0 : index
    %305 = vector.load %arg15[%c12_437, %c0_438] : memref<16x2304xf32, #tpu.memory_space<vmem>>, vector<4x128xf32>
    tpu.vector_store %arg15[%c12_437, %c0_438], %304 {strides = array<i32>} : memref<16x2304xf32, #tpu.memory_space<vmem>>, vector<4x128xf32>,
    %c0_439 = arith.constant 0 : index
    %c1_440 = arith.constant 1 : index
    %c0_441 = arith.constant 0 : index
    %306 = vector.load %arg13[%c0_439, %c1_440, %c0_441] : memref<6x6x128xf32, #tpu.memory_space<vmem>>, vector<1x4x128xf32>
    %307 = vector.shape_cast %306 : vector<1x4x128xf32> to vector<4x128xf32>
    %c0_442 = arith.constant 0 : index
    %c128 = arith.constant 128 : index
    %308 = vector.load %arg15[%c0_442, %c128] : memref<16x2304xf32, #tpu.memory_space<vmem>>, vector<4x128xf32>
    tpu.vector_store %arg15[%c0_442, %c128], %307 {strides = array<i32>} : memref<16x2304xf32, #tpu.memory_space<vmem>>, vector<4x128xf32>,
    %c1_443 = arith.constant 1 : index
    %c1_444 = arith.constant 1 : index
    %c0_445 = arith.constant 0 : index
    %309 = vector.load %arg13[%c1_443, %c1_444, %c0_445] : memref<6x6x128xf32, #tpu.memory_space<vmem>>, vector<1x4x128xf32>
    %310 = vector.shape_cast %309 : vector<1x4x128xf32> to vector<4x128xf32>
    %c4_446 = arith.constant 4 : index
    %c128_447 = arith.constant 128 : index
    %311 = vector.load %arg15[%c4_446, %c128_447] : memref<16x2304xf32, #tpu.memory_space<vmem>>, vector<4x128xf32>
    tpu.vector_store %arg15[%c4_446, %c128_447], %310 {strides = array<i32>} : memref<16x2304xf32, #tpu.memory_space<vmem>>, vector<4x128xf32>,
    %c2_448 = arith.constant 2 : index
    %c1_449 = arith.constant 1 : index
    %c0_450 = arith.constant 0 : index
    %312 = vector.load %arg13[%c2_448, %c1_449, %c0_450] : memref<6x6x128xf32, #tpu.memory_space<vmem>>, vector<1x4x128xf32>
    %313 = vector.shape_cast %312 : vector<1x4x128xf32> to vector<4x128xf32>
    %c8_451 = arith.constant 8 : index
    %c128_452 = arith.constant 128 : index
    %314 = vector.load %arg15[%c8_451, %c128_452] : memref<16x2304xf32, #tpu.memory_space<vmem>>, vector<4x128xf32>
    tpu.vector_store %arg15[%c8_451, %c128_452], %313 {strides = array<i32>} : memref<16x2304xf32, #tpu.memory_space<vmem>>, vector<4x128xf32>,
    %c3_453 = arith.constant 3 : index
    %c1_454 = arith.constant 1 : index
    %c0_455 = arith.constant 0 : index
    %315 = vector.load %arg13[%c3_453, %c1_454, %c0_455] : memref<6x6x128xf32, #tpu.memory_space<vmem>>, vector<1x4x128xf32>
    %316 = vector.shape_cast %315 : vector<1x4x128xf32> to vector<4x128xf32>
    %c12_456 = arith.constant 12 : index
    %c128_457 = arith.constant 128 : index
    %317 = vector.load %arg15[%c12_456, %c128_457] : memref<16x2304xf32, #tpu.memory_space<vmem>>, vector<4x128xf32>
    tpu.vector_store %arg15[%c12_456, %c128_457], %316 {strides = array<i32>} : memref<16x2304xf32, #tpu.memory_space<vmem>>, vector<4x128xf32>,
    %c0_458 = arith.constant 0 : index
    %c2_459 = arith.constant 2 : index
    %c0_460 = arith.constant 0 : index
    %318 = vector.load %arg13[%c0_458, %c2_459, %c0_460] : memref<6x6x128xf32, #tpu.memory_space<vmem>>, vector<1x4x128xf32>
    %319 = vector.shape_cast %318 : vector<1x4x128xf32> to vector<4x128xf32>
    %c0_461 = arith.constant 0 : index
    %c256_462 = arith.constant 256 : index
    %320 = vector.load %arg15[%c0_461, %c256_462] : memref<16x2304xf32, #tpu.memory_space<vmem>>, vector<4x128xf32>
    tpu.vector_store %arg15[%c0_461, %c256_462], %319 {strides = array<i32>} : memref<16x2304xf32, #tpu.memory_space<vmem>>, vector<4x128xf32>,
    %c1_463 = arith.constant 1 : index
    %c2_464 = arith.constant 2 : index
    %c0_465 = arith.constant 0 : index
    %321 = vector.load %arg13[%c1_463, %c2_464, %c0_465] : memref<6x6x128xf32, #tpu.memory_space<vmem>>, vector<1x4x128xf32>
    %322 = vector.shape_cast %321 : vector<1x4x128xf32> to vector<4x128xf32>
    %c4_466 = arith.constant 4 : index
    %c256_467 = arith.constant 256 : index
    %323 = vector.load %arg15[%c4_466, %c256_467] : memref<16x2304xf32, #tpu.memory_space<vmem>>, vector<4x128xf32>
    tpu.vector_store %arg15[%c4_466, %c256_467], %322 {strides = array<i32>} : memref<16x2304xf32, #tpu.memory_space<vmem>>, vector<4x128xf32>,
    %c2_468 = arith.constant 2 : index
    %c2_469 = arith.constant 2 : index
    %c0_470 = arith.constant 0 : index
    %324 = vector.load %arg13[%c2_468, %c2_469, %c0_470] : memref<6x6x128xf32, #tpu.memory_space<vmem>>, vector<1x4x128xf32>
    %325 = vector.shape_cast %324 : vector<1x4x128xf32> to vector<4x128xf32>
    %c8_471 = arith.constant 8 : index
    %c256_472 = arith.constant 256 : index
    %326 = vector.load %arg15[%c8_471, %c256_472] : memref<16x2304xf32, #tpu.memory_space<vmem>>, vector<4x128xf32>
    tpu.vector_store %arg15[%c8_471, %c256_472], %325 {strides = array<i32>} : memref<16x2304xf32, #tpu.memory_space<vmem>>, vector<4x128xf32>,
    %c3_473 = arith.constant 3 : index
    %c2_474 = arith.constant 2 : index
    %c0_475 = arith.constant 0 : index
    %327 = vector.load %arg13[%c3_473, %c2_474, %c0_475] : memref<6x6x128xf32, #tpu.memory_space<vmem>>, vector<1x4x128xf32>
    %328 = vector.shape_cast %327 : vector<1x4x128xf32> to vector<4x128xf32>
    %c12_476 = arith.constant 12 : index
    %c256_477 = arith.constant 256 : index
    %329 = vector.load %arg15[%c12_476, %c256_477] : memref<16x2304xf32, #tpu.memory_space<vmem>>, vector<4x128xf32>
    tpu.vector_store %arg15[%c12_476, %c256_477], %328 {strides = array<i32>} : memref<16x2304xf32, #tpu.memory_space<vmem>>, vector<4x128xf32>,
    %c1_478 = arith.constant 1 : index
    %c0_479 = arith.constant 0 : index
    %c0_480 = arith.constant 0 : index
    %330 = vector.load %arg13[%c1_478, %c0_479, %c0_480] : memref<6x6x128xf32, #tpu.memory_space<vmem>>, vector<1x4x128xf32>
    %331 = vector.shape_cast %330 : vector<1x4x128xf32> to vector<4x128xf32>
    %c0_481 = arith.constant 0 : index
    %c384_482 = arith.constant 384 : index
    %332 = vector.load %arg15[%c0_481, %c384_482] : memref<16x2304xf32, #tpu.memory_space<vmem>>, vector<4x128xf32>
    tpu.vector_store %arg15[%c0_481, %c384_482], %331 {strides = array<i32>} : memref<16x2304xf32, #tpu.memory_space<vmem>>, vector<4x128xf32>,
    %c2_483 = arith.constant 2 : index
    %c0_484 = arith.constant 0 : index
    %c0_485 = arith.constant 0 : index
    %333 = vector.load %arg13[%c2_483, %c0_484, %c0_485] : memref<6x6x128xf32, #tpu.memory_space<vmem>>, vector<1x4x128xf32>
    %334 = vector.shape_cast %333 : vector<1x4x128xf32> to vector<4x128xf32>
    %c4_486 = arith.constant 4 : index
    %c384_487 = arith.constant 384 : index
    %335 = vector.load %arg15[%c4_486, %c384_487] : memref<16x2304xf32, #tpu.memory_space<vmem>>, vector<4x128xf32>
    tpu.vector_store %arg15[%c4_486, %c384_487], %334 {strides = array<i32>} : memref<16x2304xf32, #tpu.memory_space<vmem>>, vector<4x128xf32>,
    %c3_488 = arith.constant 3 : index
    %c0_489 = arith.constant 0 : index
    %c0_490 = arith.constant 0 : index
    %336 = vector.load %arg13[%c3_488, %c0_489, %c0_490] : memref<6x6x128xf32, #tpu.memory_space<vmem>>, vector<1x4x128xf32>
    %337 = vector.shape_cast %336 : vector<1x4x128xf32> to vector<4x128xf32>
    %c8_491 = arith.constant 8 : index
    %c384_492 = arith.constant 384 : index
    %338 = vector.load %arg15[%c8_491, %c384_492] : memref<16x2304xf32, #tpu.memory_space<vmem>>, vector<4x128xf32>
    tpu.vector_store %arg15[%c8_491, %c384_492], %337 {strides = array<i32>} : memref<16x2304xf32, #tpu.memory_space<vmem>>, vector<4x128xf32>,
    %c4_493 = arith.constant 4 : index
    %c0_494 = arith.constant 0 : index
    %c0_495 = arith.constant 0 : index
    %339 = vector.load %arg13[%c4_493, %c0_494, %c0_495] : memref<6x6x128xf32, #tpu.memory_space<vmem>>, vector<1x4x128xf32>
    %340 = vector.shape_cast %339 : vector<1x4x128xf32> to vector<4x128xf32>
    %c12_496 = arith.constant 12 : index
    %c384_497 = arith.constant 384 : index
    %341 = vector.load %arg15[%c12_496, %c384_497] : memref<16x2304xf32, #tpu.memory_space<vmem>>, vector<4x128xf32>
    tpu.vector_store %arg15[%c12_496, %c384_497], %340 {strides = array<i32>} : memref<16x2304xf32, #tpu.memory_space<vmem>>, vector<4x128xf32>,
    %c1_498 = arith.constant 1 : index
    %c1_499 = arith.constant 1 : index
    %c0_500 = arith.constant 0 : index
    %342 = vector.load %arg13[%c1_498, %c1_499, %c0_500] : memref<6x6x128xf32, #tpu.memory_space<vmem>>, vector<1x4x128xf32>
    %343 = vector.shape_cast %342 : vector<1x4x128xf32> to vector<4x128xf32>
    %c0_501 = arith.constant 0 : index
    %c512_502 = arith.constant 512 : index
    %344 = vector.load %arg15[%c0_501, %c512_502] : memref<16x2304xf32, #tpu.memory_space<vmem>>, vector<4x128xf32>
    tpu.vector_store %arg15[%c0_501, %c512_502], %343 {strides = array<i32>} : memref<16x2304xf32, #tpu.memory_space<vmem>>, vector<4x128xf32>,
    %c2_503 = arith.constant 2 : index
    %c1_504 = arith.constant 1 : index
    %c0_505 = arith.constant 0 : index
    %345 = vector.load %arg13[%c2_503, %c1_504, %c0_505] : memref<6x6x128xf32, #tpu.memory_space<vmem>>, vector<1x4x128xf32>
    %346 = vector.shape_cast %345 : vector<1x4x128xf32> to vector<4x128xf32>
    %c4_506 = arith.constant 4 : index
    %c512_507 = arith.constant 512 : index
    %347 = vector.load %arg15[%c4_506, %c512_507] : memref<16x2304xf32, #tpu.memory_space<vmem>>, vector<4x128xf32>
    tpu.vector_store %arg15[%c4_506, %c512_507], %346 {strides = array<i32>} : memref<16x2304xf32, #tpu.memory_space<vmem>>, vector<4x128xf32>,
    %c3_508 = arith.constant 3 : index
    %c1_509 = arith.constant 1 : index
    %c0_510 = arith.constant 0 : index
    %348 = vector.load %arg13[%c3_508, %c1_509, %c0_510] : memref<6x6x128xf32, #tpu.memory_space<vmem>>, vector<1x4x128xf32>
    %349 = vector.shape_cast %348 : vector<1x4x128xf32> to vector<4x128xf32>
    %c8_511 = arith.constant 8 : index
    %c512_512 = arith.constant 512 : index
    %350 = vector.load %arg15[%c8_511, %c512_512] : memref<16x2304xf32, #tpu.memory_space<vmem>>, vector<4x128xf32>
    tpu.vector_store %arg15[%c8_511, %c512_512], %349 {strides = array<i32>} : memref<16x2304xf32, #tpu.memory_space<vmem>>, vector<4x128xf32>,
    %c4_513 = arith.constant 4 : index
    %c1_514 = arith.constant 1 : index
    %c0_515 = arith.constant 0 : index
    %351 = vector.load %arg13[%c4_513, %c1_514, %c0_515] : memref<6x6x128xf32, #tpu.memory_space<vmem>>, vector<1x4x128xf32>
    %352 = vector.shape_cast %351 : vector<1x4x128xf32> to vector<4x128xf32>
    %c12_516 = arith.constant 12 : index
    %c512_517 = arith.constant 512 : index
    %353 = vector.load %arg15[%c12_516, %c512_517] : memref<16x2304xf32, #tpu.memory_space<vmem>>, vector<4x128xf32>
    tpu.vector_store %arg15[%c12_516, %c512_517], %352 {strides = array<i32>} : memref<16x2304xf32, #tpu.memory_space<vmem>>, vector<4x128xf32>,
    %c1_518 = arith.constant 1 : index
    %c2_519 = arith.constant 2 : index
    %c0_520 = arith.constant 0 : index
    %354 = vector.load %arg13[%c1_518, %c2_519, %c0_520] : memref<6x6x128xf32, #tpu.memory_space<vmem>>, vector<1x4x128xf32>
    %355 = vector.shape_cast %354 : vector<1x4x128xf32> to vector<4x128xf32>
    %c0_521 = arith.constant 0 : index
    %c640 = arith.constant 640 : index
    %356 = vector.load %arg15[%c0_521, %c640] : memref<16x2304xf32, #tpu.memory_space<vmem>>, vector<4x128xf32>
    tpu.vector_store %arg15[%c0_521, %c640], %355 {strides = array<i32>} : memref<16x2304xf32, #tpu.memory_space<vmem>>, vector<4x128xf32>,
    %c2_522 = arith.constant 2 : index
    %c2_523 = arith.constant 2 : index
    %c0_524 = arith.constant 0 : index
    %357 = vector.load %arg13[%c2_522, %c2_523, %c0_524] : memref<6x6x128xf32, #tpu.memory_space<vmem>>, vector<1x4x128xf32>
    %358 = vector.shape_cast %357 : vector<1x4x128xf32> to vector<4x128xf32>
    %c4_525 = arith.constant 4 : index
    %c640_526 = arith.constant 640 : index
    %359 = vector.load %arg15[%c4_525, %c640_526] : memref<16x2304xf32, #tpu.memory_space<vmem>>, vector<4x128xf32>
    tpu.vector_store %arg15[%c4_525, %c640_526], %358 {strides = array<i32>} : memref<16x2304xf32, #tpu.memory_space<vmem>>, vector<4x128xf32>,
    %c3_527 = arith.constant 3 : index
    %c2_528 = arith.constant 2 : index
    %c0_529 = arith.constant 0 : index
    %360 = vector.load %arg13[%c3_527, %c2_528, %c0_529] : memref<6x6x128xf32, #tpu.memory_space<vmem>>, vector<1x4x128xf32>
    %361 = vector.shape_cast %360 : vector<1x4x128xf32> to vector<4x128xf32>
    %c8_530 = arith.constant 8 : index
    %c640_531 = arith.constant 640 : index
    %362 = vector.load %arg15[%c8_530, %c640_531] : memref<16x2304xf32, #tpu.memory_space<vmem>>, vector<4x128xf32>
    tpu.vector_store %arg15[%c8_530, %c640_531], %361 {strides = array<i32>} : memref<16x2304xf32, #tpu.memory_space<vmem>>, vector<4x128xf32>,
    %c4_532 = arith.constant 4 : index
    %c2_533 = arith.constant 2 : index
    %c0_534 = arith.constant 0 : index
    %363 = vector.load %arg13[%c4_532, %c2_533, %c0_534] : memref<6x6x128xf32, #tpu.memory_space<vmem>>, vector<1x4x128xf32>
    %364 = vector.shape_cast %363 : vector<1x4x128xf32> to vector<4x128xf32>
    %c12_535 = arith.constant 12 : index
    %c640_536 = arith.constant 640 : index
    %365 = vector.load %arg15[%c12_535, %c640_536] : memref<16x2304xf32, #tpu.memory_space<vmem>>, vector<4x128xf32>
    tpu.vector_store %arg15[%c12_535, %c640_536], %364 {strides = array<i32>} : memref<16x2304xf32, #tpu.memory_space<vmem>>, vector<4x128xf32>,
    %c2_537 = arith.constant 2 : index
    %c0_538 = arith.constant 0 : index
    %c0_539 = arith.constant 0 : index
    %366 = vector.load %arg13[%c2_537, %c0_538, %c0_539] : memref<6x6x128xf32, #tpu.memory_space<vmem>>, vector<1x4x128xf32>
    %367 = vector.shape_cast %366 : vector<1x4x128xf32> to vector<4x128xf32>
    %c0_540 = arith.constant 0 : index
    %c768_541 = arith.constant 768 : index
    %368 = vector.load %arg15[%c0_540, %c768_541] : memref<16x2304xf32, #tpu.memory_space<vmem>>, vector<4x128xf32>
    tpu.vector_store %arg15[%c0_540, %c768_541], %367 {strides = array<i32>} : memref<16x2304xf32, #tpu.memory_space<vmem>>, vector<4x128xf32>,
    %c3_542 = arith.constant 3 : index
    %c0_543 = arith.constant 0 : index
    %c0_544 = arith.constant 0 : index
    %369 = vector.load %arg13[%c3_542, %c0_543, %c0_544] : memref<6x6x128xf32, #tpu.memory_space<vmem>>, vector<1x4x128xf32>
    %370 = vector.shape_cast %369 : vector<1x4x128xf32> to vector<4x128xf32>
    %c4_545 = arith.constant 4 : index
    %c768_546 = arith.constant 768 : index
    %371 = vector.load %arg15[%c4_545, %c768_546] : memref<16x2304xf32, #tpu.memory_space<vmem>>, vector<4x128xf32>
    tpu.vector_store %arg15[%c4_545, %c768_546], %370 {strides = array<i32>} : memref<16x2304xf32, #tpu.memory_space<vmem>>, vector<4x128xf32>,
    %c4_547 = arith.constant 4 : index
    %c0_548 = arith.constant 0 : index
    %c0_549 = arith.constant 0 : index
    %372 = vector.load %arg13[%c4_547, %c0_548, %c0_549] : memref<6x6x128xf32, #tpu.memory_space<vmem>>, vector<1x4x128xf32>
    %373 = vector.shape_cast %372 : vector<1x4x128xf32> to vector<4x128xf32>
    %c8_550 = arith.constant 8 : index
    %c768_551 = arith.constant 768 : index
    %374 = vector.load %arg15[%c8_550, %c768_551] : memref<16x2304xf32, #tpu.memory_space<vmem>>, vector<4x128xf32>
    tpu.vector_store %arg15[%c8_550, %c768_551], %373 {strides = array<i32>} : memref<16x2304xf32, #tpu.memory_space<vmem>>, vector<4x128xf32>,
    %c5_552 = arith.constant 5 : index
    %c0_553 = arith.constant 0 : index
    %c0_554 = arith.constant 0 : index
    %375 = vector.load %arg13[%c5_552, %c0_553, %c0_554] : memref<6x6x128xf32, #tpu.memory_space<vmem>>, vector<1x4x128xf32>
    %376 = vector.shape_cast %375 : vector<1x4x128xf32> to vector<4x128xf32>
    %c12_555 = arith.constant 12 : index
    %c768_556 = arith.constant 768 : index
    %377 = vector.load %arg15[%c12_555, %c768_556] : memref<16x2304xf32, #tpu.memory_space<vmem>>, vector<4x128xf32>
    tpu.vector_store %arg15[%c12_555, %c768_556], %376 {strides = array<i32>} : memref<16x2304xf32, #tpu.memory_space<vmem>>, vector<4x128xf32>,
    %c2_557 = arith.constant 2 : index
    %c1_558 = arith.constant 1 : index
    %c0_559 = arith.constant 0 : index
    %378 = vector.load %arg13[%c2_557, %c1_558, %c0_559] : memref<6x6x128xf32, #tpu.memory_space<vmem>>, vector<1x4x128xf32>
    %379 = vector.shape_cast %378 : vector<1x4x128xf32> to vector<4x128xf32>
    %c0_560 = arith.constant 0 : index
    %c896 = arith.constant 896 : index
    %380 = vector.load %arg15[%c0_560, %c896] : memref<16x2304xf32, #tpu.memory_space<vmem>>, vector<4x128xf32>
    tpu.vector_store %arg15[%c0_560, %c896], %379 {strides = array<i32>} : memref<16x2304xf32, #tpu.memory_space<vmem>>, vector<4x128xf32>,
    %c3_561 = arith.constant 3 : index
    %c1_562 = arith.constant 1 : index
    %c0_563 = arith.constant 0 : index
    %381 = vector.load %arg13[%c3_561, %c1_562, %c0_563] : memref<6x6x128xf32, #tpu.memory_space<vmem>>, vector<1x4x128xf32>
    %382 = vector.shape_cast %381 : vector<1x4x128xf32> to vector<4x128xf32>
    %c4_564 = arith.constant 4 : index
    %c896_565 = arith.constant 896 : index
    %383 = vector.load %arg15[%c4_564, %c896_565] : memref<16x2304xf32, #tpu.memory_space<vmem>>, vector<4x128xf32>
    tpu.vector_store %arg15[%c4_564, %c896_565], %382 {strides = array<i32>} : memref<16x2304xf32, #tpu.memory_space<vmem>>, vector<4x128xf32>,
    %c4_566 = arith.constant 4 : index
    %c1_567 = arith.constant 1 : index
    %c0_568 = arith.constant 0 : index
    %384 = vector.load %arg13[%c4_566, %c1_567, %c0_568] : memref<6x6x128xf32, #tpu.memory_space<vmem>>, vector<1x4x128xf32>
    %385 = vector.shape_cast %384 : vector<1x4x128xf32> to vector<4x128xf32>
    %c8_569 = arith.constant 8 : index
    %c896_570 = arith.constant 896 : index
    %386 = vector.load %arg15[%c8_569, %c896_570] : memref<16x2304xf32, #tpu.memory_space<vmem>>, vector<4x128xf32>
    tpu.vector_store %arg15[%c8_569, %c896_570], %385 {strides = array<i32>} : memref<16x2304xf32, #tpu.memory_space<vmem>>, vector<4x128xf32>,
    %c5_571 = arith.constant 5 : index
    %c1_572 = arith.constant 1 : index
    %c0_573 = arith.constant 0 : index
    %387 = vector.load %arg13[%c5_571, %c1_572, %c0_573] : memref<6x6x128xf32, #tpu.memory_space<vmem>>, vector<1x4x128xf32>
    %388 = vector.shape_cast %387 : vector<1x4x128xf32> to vector<4x128xf32>
    %c12_574 = arith.constant 12 : index
    %c896_575 = arith.constant 896 : index
    %389 = vector.load %arg15[%c12_574, %c896_575] : memref<16x2304xf32, #tpu.memory_space<vmem>>, vector<4x128xf32>
    tpu.vector_store %arg15[%c12_574, %c896_575], %388 {strides = array<i32>} : memref<16x2304xf32, #tpu.memory_space<vmem>>, vector<4x128xf32>,
    %c2_576 = arith.constant 2 : index
    %c2_577 = arith.constant 2 : index
    %c0_578 = arith.constant 0 : index
    %390 = vector.load %arg13[%c2_576, %c2_577, %c0_578] : memref<6x6x128xf32, #tpu.memory_space<vmem>>, vector<1x4x128xf32>
    %391 = vector.shape_cast %390 : vector<1x4x128xf32> to vector<4x128xf32>
    %c0_579 = arith.constant 0 : index
    %c1024_580 = arith.constant 1024 : index
    %392 = vector.load %arg15[%c0_579, %c1024_580] : memref<16x2304xf32, #tpu.memory_space<vmem>>, vector<4x128xf32>
    tpu.vector_store %arg15[%c0_579, %c1024_580], %391 {strides = array<i32>} : memref<16x2304xf32, #tpu.memory_space<vmem>>, vector<4x128xf32>,
    %c3_581 = arith.constant 3 : index
    %c2_582 = arith.constant 2 : index
    %c0_583 = arith.constant 0 : index
    %393 = vector.load %arg13[%c3_581, %c2_582, %c0_583] : memref<6x6x128xf32, #tpu.memory_space<vmem>>, vector<1x4x128xf32>
    %394 = vector.shape_cast %393 : vector<1x4x128xf32> to vector<4x128xf32>
    %c4_584 = arith.constant 4 : index
    %c1024_585 = arith.constant 1024 : index
    %395 = vector.load %arg15[%c4_584, %c1024_585] : memref<16x2304xf32, #tpu.memory_space<vmem>>, vector<4x128xf32>
    tpu.vector_store %arg15[%c4_584, %c1024_585], %394 {strides = array<i32>} : memref<16x2304xf32, #tpu.memory_space<vmem>>, vector<4x128xf32>,
    %c4_586 = arith.constant 4 : index
    %c2_587 = arith.constant 2 : index
    %c0_588 = arith.constant 0 : index
    %396 = vector.load %arg13[%c4_586, %c2_587, %c0_588] : memref<6x6x128xf32, #tpu.memory_space<vmem>>, vector<1x4x128xf32>
    %397 = vector.shape_cast %396 : vector<1x4x128xf32> to vector<4x128xf32>
    %c8_589 = arith.constant 8 : index
    %c1024_590 = arith.constant 1024 : index
    %398 = vector.load %arg15[%c8_589, %c1024_590] : memref<16x2304xf32, #tpu.memory_space<vmem>>, vector<4x128xf32>
    tpu.vector_store %arg15[%c8_589, %c1024_590], %397 {strides = array<i32>} : memref<16x2304xf32, #tpu.memory_space<vmem>>, vector<4x128xf32>,
    %c5_591 = arith.constant 5 : index
    %c2_592 = arith.constant 2 : index
    %c0_593 = arith.constant 0 : index
    %399 = vector.load %arg13[%c5_591, %c2_592, %c0_593] : memref<6x6x128xf32, #tpu.memory_space<vmem>>, vector<1x4x128xf32>
    %400 = vector.shape_cast %399 : vector<1x4x128xf32> to vector<4x128xf32>
    %c12_594 = arith.constant 12 : index
    %c1024_595 = arith.constant 1024 : index
    %401 = vector.load %arg15[%c12_594, %c1024_595] : memref<16x2304xf32, #tpu.memory_space<vmem>>, vector<4x128xf32>
    tpu.vector_store %arg15[%c12_594, %c1024_595], %400 {strides = array<i32>} : memref<16x2304xf32, #tpu.memory_space<vmem>>, vector<4x128xf32>,
    %c0_596 = arith.constant 0 : index
    %c0_597 = arith.constant 0 : index
    %402 = vector.load %arg15[%c0_596, %c0_597] : memref<16x2304xf32, #tpu.memory_space<vmem>>, vector<16x1152xf32>
    %403 = arith.truncf %402 : vector<16x1152xf32> to vector<16x1152xbf16>
    %c0_598 = arith.constant 0 : index
    %c0_599 = arith.constant 0 : index
    %404 = vector.load %arg6[%c0_598, %c0_599] : memref<1152x256xbf16, #tpu.memory_space<vmem>>, vector<1152x256xbf16>
    %cst_600 = arith.constant dense<0.000000e+00> : vector<16x256xf32>
    %405 = tpu.matmul %403, %404, %cst_600 {dimension_numbers = #tpu.dot_dimension_numbers<[1], [0], [0], [1], [0, 0, 1, 1], [], []>} : vector<16x1152xbf16>, vector<1152x256xbf16>, vector<16x256xf32> -> vector<16x256xf32>
    %c0_601 = arith.constant 0 : index
    %c0_602 = arith.constant 0 : index
    %406 = vector.load %arg7[%c0_601, %c0_602] : memref<1x256xf32, #tpu.memory_space<vmem>>, vector<1x256xf32>
    %407 = vector.broadcast %406 : vector<1x256xf32> to vector<16x256xf32>
    %408 = arith.addf %405, %407 : vector<16x256xf32>
    %cst_603 = arith.constant 0.000000e+00 : f32
    %409 = vector.broadcast %cst_603 : f32 to vector<16x256xf32>
    %410 = arith.maximumf %408, %409 : vector<16x256xf32>
    %411 = vector.extract_strided_slice %410 {offsets = [0, 0], sizes = [4, 256], strides = [1, 1]} : vector<16x256xf32> to vector<4x256xf32>
    %c1_604 = arith.constant 1 : index
    %c1_605 = arith.constant 1 : index
    %c0_606 = arith.constant 0 : index
    %412 = vector.load %arg14[%c1_604, %c1_605, %c0_606] : memref<6x6x256xf32, #tpu.memory_space<vmem>>, vector<1x4x256xf32>
    %413 = vector.shape_cast %412 : vector<1x4x256xf32> to vector<4x256xf32>
    %414 = vector.shape_cast %411 : vector<4x256xf32> to vector<1x4x256xf32>
    tpu.vector_store %arg14[%c1_604, %c1_605, %c0_606], %414 {strides = array<i32>} : memref<6x6x256xf32, #tpu.memory_space<vmem>>, vector<1x4x256xf32>,
    %415 = vector.extract_strided_slice %410 {offsets = [4, 0], sizes = [4, 256], strides = [1, 1]} : vector<16x256xf32> to vector<4x256xf32>
    %c2_607 = arith.constant 2 : index
    %c1_608 = arith.constant 1 : index
    %c0_609 = arith.constant 0 : index
    %416 = vector.load %arg14[%c2_607, %c1_608, %c0_609] : memref<6x6x256xf32, #tpu.memory_space<vmem>>, vector<1x4x256xf32>
    %417 = vector.shape_cast %416 : vector<1x4x256xf32> to vector<4x256xf32>
    %418 = vector.shape_cast %415 : vector<4x256xf32> to vector<1x4x256xf32>
    tpu.vector_store %arg14[%c2_607, %c1_608, %c0_609], %418 {strides = array<i32>} : memref<6x6x256xf32, #tpu.memory_space<vmem>>, vector<1x4x256xf32>,
    %419 = vector.extract_strided_slice %410 {offsets = [8, 0], sizes = [4, 256], strides = [1, 1]} : vector<16x256xf32> to vector<4x256xf32>
    %c3_610 = arith.constant 3 : index
    %c1_611 = arith.constant 1 : index
    %c0_612 = arith.constant 0 : index
    %420 = vector.load %arg14[%c3_610, %c1_611, %c0_612] : memref<6x6x256xf32, #tpu.memory_space<vmem>>, vector<1x4x256xf32>
    %421 = vector.shape_cast %420 : vector<1x4x256xf32> to vector<4x256xf32>
    %422 = vector.shape_cast %419 : vector<4x256xf32> to vector<1x4x256xf32>
    tpu.vector_store %arg14[%c3_610, %c1_611, %c0_612], %422 {strides = array<i32>} : memref<6x6x256xf32, #tpu.memory_space<vmem>>, vector<1x4x256xf32>,
    %423 = vector.extract_strided_slice %410 {offsets = [12, 0], sizes = [4, 256], strides = [1, 1]} : vector<16x256xf32> to vector<4x256xf32>
    %c4_613 = arith.constant 4 : index
    %c1_614 = arith.constant 1 : index
    %c0_615 = arith.constant 0 : index
    %424 = vector.load %arg14[%c4_613, %c1_614, %c0_615] : memref<6x6x256xf32, #tpu.memory_space<vmem>>, vector<1x4x256xf32>
    %425 = vector.shape_cast %424 : vector<1x4x256xf32> to vector<4x256xf32>
    %426 = vector.shape_cast %423 : vector<4x256xf32> to vector<1x4x256xf32>
    tpu.vector_store %arg14[%c4_613, %c1_614, %c0_615], %426 {strides = array<i32>} : memref<6x6x256xf32, #tpu.memory_space<vmem>>, vector<1x4x256xf32>,
    %c0_616 = arith.constant 0 : index
    %c0_617 = arith.constant 0 : index
    %c0_618 = arith.constant 0 : index
    %427 = vector.load %arg14[%c0_616, %c0_617, %c0_618] : memref<6x6x256xf32, #tpu.memory_space<vmem>>, vector<1x4x256xf32>
    %428 = vector.shape_cast %427 : vector<1x4x256xf32> to vector<4x256xf32>
    %c0_619 = arith.constant 0 : index
    %c0_620 = arith.constant 0 : index
    %429 = vector.load %arg15[%c0_619, %c0_620] : memref<16x2304xf32, #tpu.memory_space<vmem>>, vector<4x256xf32>
    tpu.vector_store %arg15[%c0_619, %c0_620], %428 {strides = array<i32>} : memref<16x2304xf32, #tpu.memory_space<vmem>>, vector<4x256xf32>,
    %c1_621 = arith.constant 1 : index
    %c0_622 = arith.constant 0 : index
    %c0_623 = arith.constant 0 : index
    %430 = vector.load %arg14[%c1_621, %c0_622, %c0_623] : memref<6x6x256xf32, #tpu.memory_space<vmem>>, vector<1x4x256xf32>
    %431 = vector.shape_cast %430 : vector<1x4x256xf32> to vector<4x256xf32>
    %c4_624 = arith.constant 4 : index
    %c0_625 = arith.constant 0 : index
    %432 = vector.load %arg15[%c4_624, %c0_625] : memref<16x2304xf32, #tpu.memory_space<vmem>>, vector<4x256xf32>
    tpu.vector_store %arg15[%c4_624, %c0_625], %431 {strides = array<i32>} : memref<16x2304xf32, #tpu.memory_space<vmem>>, vector<4x256xf32>,
    %c2_626 = arith.constant 2 : index
    %c0_627 = arith.constant 0 : index
    %c0_628 = arith.constant 0 : index
    %433 = vector.load %arg14[%c2_626, %c0_627, %c0_628] : memref<6x6x256xf32, #tpu.memory_space<vmem>>, vector<1x4x256xf32>
    %434 = vector.shape_cast %433 : vector<1x4x256xf32> to vector<4x256xf32>
    %c8_629 = arith.constant 8 : index
    %c0_630 = arith.constant 0 : index
    %435 = vector.load %arg15[%c8_629, %c0_630] : memref<16x2304xf32, #tpu.memory_space<vmem>>, vector<4x256xf32>
    tpu.vector_store %arg15[%c8_629, %c0_630], %434 {strides = array<i32>} : memref<16x2304xf32, #tpu.memory_space<vmem>>, vector<4x256xf32>,
    %c3_631 = arith.constant 3 : index
    %c0_632 = arith.constant 0 : index
    %c0_633 = arith.constant 0 : index
    %436 = vector.load %arg14[%c3_631, %c0_632, %c0_633] : memref<6x6x256xf32, #tpu.memory_space<vmem>>, vector<1x4x256xf32>
    %437 = vector.shape_cast %436 : vector<1x4x256xf32> to vector<4x256xf32>
    %c12_634 = arith.constant 12 : index
    %c0_635 = arith.constant 0 : index
    %438 = vector.load %arg15[%c12_634, %c0_635] : memref<16x2304xf32, #tpu.memory_space<vmem>>, vector<4x256xf32>
    tpu.vector_store %arg15[%c12_634, %c0_635], %437 {strides = array<i32>} : memref<16x2304xf32, #tpu.memory_space<vmem>>, vector<4x256xf32>,
    %c0_636 = arith.constant 0 : index
    %c1_637 = arith.constant 1 : index
    %c0_638 = arith.constant 0 : index
    %439 = vector.load %arg14[%c0_636, %c1_637, %c0_638] : memref<6x6x256xf32, #tpu.memory_space<vmem>>, vector<1x4x256xf32>
    %440 = vector.shape_cast %439 : vector<1x4x256xf32> to vector<4x256xf32>
    %c0_639 = arith.constant 0 : index
    %c256_640 = arith.constant 256 : index
    %441 = vector.load %arg15[%c0_639, %c256_640] : memref<16x2304xf32, #tpu.memory_space<vmem>>, vector<4x256xf32>
    tpu.vector_store %arg15[%c0_639, %c256_640], %440 {strides = array<i32>} : memref<16x2304xf32, #tpu.memory_space<vmem>>, vector<4x256xf32>,
    %c1_641 = arith.constant 1 : index
    %c1_642 = arith.constant 1 : index
    %c0_643 = arith.constant 0 : index
    %442 = vector.load %arg14[%c1_641, %c1_642, %c0_643] : memref<6x6x256xf32, #tpu.memory_space<vmem>>, vector<1x4x256xf32>
    %443 = vector.shape_cast %442 : vector<1x4x256xf32> to vector<4x256xf32>
    %c4_644 = arith.constant 4 : index
    %c256_645 = arith.constant 256 : index
    %444 = vector.load %arg15[%c4_644, %c256_645] : memref<16x2304xf32, #tpu.memory_space<vmem>>, vector<4x256xf32>
    tpu.vector_store %arg15[%c4_644, %c256_645], %443 {strides = array<i32>} : memref<16x2304xf32, #tpu.memory_space<vmem>>, vector<4x256xf32>,
    %c2_646 = arith.constant 2 : index
    %c1_647 = arith.constant 1 : index
    %c0_648 = arith.constant 0 : index
    %445 = vector.load %arg14[%c2_646, %c1_647, %c0_648] : memref<6x6x256xf32, #tpu.memory_space<vmem>>, vector<1x4x256xf32>
    %446 = vector.shape_cast %445 : vector<1x4x256xf32> to vector<4x256xf32>
    %c8_649 = arith.constant 8 : index
    %c256_650 = arith.constant 256 : index
    %447 = vector.load %arg15[%c8_649, %c256_650] : memref<16x2304xf32, #tpu.memory_space<vmem>>, vector<4x256xf32>
    tpu.vector_store %arg15[%c8_649, %c256_650], %446 {strides = array<i32>} : memref<16x2304xf32, #tpu.memory_space<vmem>>, vector<4x256xf32>,
    %c3_651 = arith.constant 3 : index
    %c1_652 = arith.constant 1 : index
    %c0_653 = arith.constant 0 : index
    %448 = vector.load %arg14[%c3_651, %c1_652, %c0_653] : memref<6x6x256xf32, #tpu.memory_space<vmem>>, vector<1x4x256xf32>
    %449 = vector.shape_cast %448 : vector<1x4x256xf32> to vector<4x256xf32>
    %c12_654 = arith.constant 12 : index
    %c256_655 = arith.constant 256 : index
    %450 = vector.load %arg15[%c12_654, %c256_655] : memref<16x2304xf32, #tpu.memory_space<vmem>>, vector<4x256xf32>
    tpu.vector_store %arg15[%c12_654, %c256_655], %449 {strides = array<i32>} : memref<16x2304xf32, #tpu.memory_space<vmem>>, vector<4x256xf32>,
    %c0_656 = arith.constant 0 : index
    %c2_657 = arith.constant 2 : index
    %c0_658 = arith.constant 0 : index
    %451 = vector.load %arg14[%c0_656, %c2_657, %c0_658] : memref<6x6x256xf32, #tpu.memory_space<vmem>>, vector<1x4x256xf32>
    %452 = vector.shape_cast %451 : vector<1x4x256xf32> to vector<4x256xf32>
    %c0_659 = arith.constant 0 : index
    %c512_660 = arith.constant 512 : index
    %453 = vector.load %arg15[%c0_659, %c512_660] : memref<16x2304xf32, #tpu.memory_space<vmem>>, vector<4x256xf32>
    tpu.vector_store %arg15[%c0_659, %c512_660], %452 {strides = array<i32>} : memref<16x2304xf32, #tpu.memory_space<vmem>>, vector<4x256xf32>,
    %c1_661 = arith.constant 1 : index
    %c2_662 = arith.constant 2 : index
    %c0_663 = arith.constant 0 : index
    %454 = vector.load %arg14[%c1_661, %c2_662, %c0_663] : memref<6x6x256xf32, #tpu.memory_space<vmem>>, vector<1x4x256xf32>
    %455 = vector.shape_cast %454 : vector<1x4x256xf32> to vector<4x256xf32>
    %c4_664 = arith.constant 4 : index
    %c512_665 = arith.constant 512 : index
    %456 = vector.load %arg15[%c4_664, %c512_665] : memref<16x2304xf32, #tpu.memory_space<vmem>>, vector<4x256xf32>
    tpu.vector_store %arg15[%c4_664, %c512_665], %455 {strides = array<i32>} : memref<16x2304xf32, #tpu.memory_space<vmem>>, vector<4x256xf32>,
    %c2_666 = arith.constant 2 : index
    %c2_667 = arith.constant 2 : index
    %c0_668 = arith.constant 0 : index
    %457 = vector.load %arg14[%c2_666, %c2_667, %c0_668] : memref<6x6x256xf32, #tpu.memory_space<vmem>>, vector<1x4x256xf32>
    %458 = vector.shape_cast %457 : vector<1x4x256xf32> to vector<4x256xf32>
    %c8_669 = arith.constant 8 : index
    %c512_670 = arith.constant 512 : index
    %459 = vector.load %arg15[%c8_669, %c512_670] : memref<16x2304xf32, #tpu.memory_space<vmem>>, vector<4x256xf32>
    tpu.vector_store %arg15[%c8_669, %c512_670], %458 {strides = array<i32>} : memref<16x2304xf32, #tpu.memory_space<vmem>>, vector<4x256xf32>,
    %c3_671 = arith.constant 3 : index
    %c2_672 = arith.constant 2 : index
    %c0_673 = arith.constant 0 : index
    %460 = vector.load %arg14[%c3_671, %c2_672, %c0_673] : memref<6x6x256xf32, #tpu.memory_space<vmem>>, vector<1x4x256xf32>
    %461 = vector.shape_cast %460 : vector<1x4x256xf32> to vector<4x256xf32>
    %c12_674 = arith.constant 12 : index
    %c512_675 = arith.constant 512 : index
    %462 = vector.load %arg15[%c12_674, %c512_675] : memref<16x2304xf32, #tpu.memory_space<vmem>>, vector<4x256xf32>
    tpu.vector_store %arg15[%c12_674, %c512_675], %461 {strides = array<i32>} : memref<16x2304xf32, #tpu.memory_space<vmem>>, vector<4x256xf32>,
    %c1_676 = arith.constant 1 : index
    %c0_677 = arith.constant 0 : index
    %c0_678 = arith.constant 0 : index
    %463 = vector.load %arg14[%c1_676, %c0_677, %c0_678] : memref<6x6x256xf32, #tpu.memory_space<vmem>>, vector<1x4x256xf32>
    %464 = vector.shape_cast %463 : vector<1x4x256xf32> to vector<4x256xf32>
    %c0_679 = arith.constant 0 : index
    %c768_680 = arith.constant 768 : index
    %465 = vector.load %arg15[%c0_679, %c768_680] : memref<16x2304xf32, #tpu.memory_space<vmem>>, vector<4x256xf32>
    tpu.vector_store %arg15[%c0_679, %c768_680], %464 {strides = array<i32>} : memref<16x2304xf32, #tpu.memory_space<vmem>>, vector<4x256xf32>,
    %c2_681 = arith.constant 2 : index
    %c0_682 = arith.constant 0 : index
    %c0_683 = arith.constant 0 : index
    %466 = vector.load %arg14[%c2_681, %c0_682, %c0_683] : memref<6x6x256xf32, #tpu.memory_space<vmem>>, vector<1x4x256xf32>
    %467 = vector.shape_cast %466 : vector<1x4x256xf32> to vector<4x256xf32>
    %c4_684 = arith.constant 4 : index
    %c768_685 = arith.constant 768 : index
    %468 = vector.load %arg15[%c4_684, %c768_685] : memref<16x2304xf32, #tpu.memory_space<vmem>>, vector<4x256xf32>
    tpu.vector_store %arg15[%c4_684, %c768_685], %467 {strides = array<i32>} : memref<16x2304xf32, #tpu.memory_space<vmem>>, vector<4x256xf32>,
    %c3_686 = arith.constant 3 : index
    %c0_687 = arith.constant 0 : index
    %c0_688 = arith.constant 0 : index
    %469 = vector.load %arg14[%c3_686, %c0_687, %c0_688] : memref<6x6x256xf32, #tpu.memory_space<vmem>>, vector<1x4x256xf32>
    %470 = vector.shape_cast %469 : vector<1x4x256xf32> to vector<4x256xf32>
    %c8_689 = arith.constant 8 : index
    %c768_690 = arith.constant 768 : index
    %471 = vector.load %arg15[%c8_689, %c768_690] : memref<16x2304xf32, #tpu.memory_space<vmem>>, vector<4x256xf32>
    tpu.vector_store %arg15[%c8_689, %c768_690], %470 {strides = array<i32>} : memref<16x2304xf32, #tpu.memory_space<vmem>>, vector<4x256xf32>,
    %c4_691 = arith.constant 4 : index
    %c0_692 = arith.constant 0 : index
    %c0_693 = arith.constant 0 : index
    %472 = vector.load %arg14[%c4_691, %c0_692, %c0_693] : memref<6x6x256xf32, #tpu.memory_space<vmem>>, vector<1x4x256xf32>
    %473 = vector.shape_cast %472 : vector<1x4x256xf32> to vector<4x256xf32>
    %c12_694 = arith.constant 12 : index
    %c768_695 = arith.constant 768 : index
    %474 = vector.load %arg15[%c12_694, %c768_695] : memref<16x2304xf32, #tpu.memory_space<vmem>>, vector<4x256xf32>
    tpu.vector_store %arg15[%c12_694, %c768_695], %473 {strides = array<i32>} : memref<16x2304xf32, #tpu.memory_space<vmem>>, vector<4x256xf32>,
    %c1_696 = arith.constant 1 : index
    %c1_697 = arith.constant 1 : index
    %c0_698 = arith.constant 0 : index
    %475 = vector.load %arg14[%c1_696, %c1_697, %c0_698] : memref<6x6x256xf32, #tpu.memory_space<vmem>>, vector<1x4x256xf32>
    %476 = vector.shape_cast %475 : vector<1x4x256xf32> to vector<4x256xf32>
    %c0_699 = arith.constant 0 : index
    %c1024_700 = arith.constant 1024 : index
    %477 = vector.load %arg15[%c0_699, %c1024_700] : memref<16x2304xf32, #tpu.memory_space<vmem>>, vector<4x256xf32>
    tpu.vector_store %arg15[%c0_699, %c1024_700], %476 {strides = array<i32>} : memref<16x2304xf32, #tpu.memory_space<vmem>>, vector<4x256xf32>,
    %c2_701 = arith.constant 2 : index
    %c1_702 = arith.constant 1 : index
    %c0_703 = arith.constant 0 : index
    %478 = vector.load %arg14[%c2_701, %c1_702, %c0_703] : memref<6x6x256xf32, #tpu.memory_space<vmem>>, vector<1x4x256xf32>
    %479 = vector.shape_cast %478 : vector<1x4x256xf32> to vector<4x256xf32>
    %c4_704 = arith.constant 4 : index
    %c1024_705 = arith.constant 1024 : index
    %480 = vector.load %arg15[%c4_704, %c1024_705] : memref<16x2304xf32, #tpu.memory_space<vmem>>, vector<4x256xf32>
    tpu.vector_store %arg15[%c4_704, %c1024_705], %479 {strides = array<i32>} : memref<16x2304xf32, #tpu.memory_space<vmem>>, vector<4x256xf32>,
    %c3_706 = arith.constant 3 : index
    %c1_707 = arith.constant 1 : index
    %c0_708 = arith.constant 0 : index
    %481 = vector.load %arg14[%c3_706, %c1_707, %c0_708] : memref<6x6x256xf32, #tpu.memory_space<vmem>>, vector<1x4x256xf32>
    %482 = vector.shape_cast %481 : vector<1x4x256xf32> to vector<4x256xf32>
    %c8_709 = arith.constant 8 : index
    %c1024_710 = arith.constant 1024 : index
    %483 = vector.load %arg15[%c8_709, %c1024_710] : memref<16x2304xf32, #tpu.memory_space<vmem>>, vector<4x256xf32>
    tpu.vector_store %arg15[%c8_709, %c1024_710], %482 {strides = array<i32>} : memref<16x2304xf32, #tpu.memory_space<vmem>>, vector<4x256xf32>,
    %c4_711 = arith.constant 4 : index
    %c1_712 = arith.constant 1 : index
    %c0_713 = arith.constant 0 : index
    %484 = vector.load %arg14[%c4_711, %c1_712, %c0_713] : memref<6x6x256xf32, #tpu.memory_space<vmem>>, vector<1x4x256xf32>
    %485 = vector.shape_cast %484 : vector<1x4x256xf32> to vector<4x256xf32>
    %c12_714 = arith.constant 12 : index
    %c1024_715 = arith.constant 1024 : index
    %486 = vector.load %arg15[%c12_714, %c1024_715] : memref<16x2304xf32, #tpu.memory_space<vmem>>, vector<4x256xf32>
    tpu.vector_store %arg15[%c12_714, %c1024_715], %485 {strides = array<i32>} : memref<16x2304xf32, #tpu.memory_space<vmem>>, vector<4x256xf32>,
    %c1_716 = arith.constant 1 : index
    %c2_717 = arith.constant 2 : index
    %c0_718 = arith.constant 0 : index
    %487 = vector.load %arg14[%c1_716, %c2_717, %c0_718] : memref<6x6x256xf32, #tpu.memory_space<vmem>>, vector<1x4x256xf32>
    %488 = vector.shape_cast %487 : vector<1x4x256xf32> to vector<4x256xf32>
    %c0_719 = arith.constant 0 : index
    %c1280_720 = arith.constant 1280 : index
    %489 = vector.load %arg15[%c0_719, %c1280_720] : memref<16x2304xf32, #tpu.memory_space<vmem>>, vector<4x256xf32>
    tpu.vector_store %arg15[%c0_719, %c1280_720], %488 {strides = array<i32>} : memref<16x2304xf32, #tpu.memory_space<vmem>>, vector<4x256xf32>,
    %c2_721 = arith.constant 2 : index
    %c2_722 = arith.constant 2 : index
    %c0_723 = arith.constant 0 : index
    %490 = vector.load %arg14[%c2_721, %c2_722, %c0_723] : memref<6x6x256xf32, #tpu.memory_space<vmem>>, vector<1x4x256xf32>
    %491 = vector.shape_cast %490 : vector<1x4x256xf32> to vector<4x256xf32>
    %c4_724 = arith.constant 4 : index
    %c1280_725 = arith.constant 1280 : index
    %492 = vector.load %arg15[%c4_724, %c1280_725] : memref<16x2304xf32, #tpu.memory_space<vmem>>, vector<4x256xf32>
    tpu.vector_store %arg15[%c4_724, %c1280_725], %491 {strides = array<i32>} : memref<16x2304xf32, #tpu.memory_space<vmem>>, vector<4x256xf32>,
    %c3_726 = arith.constant 3 : index
    %c2_727 = arith.constant 2 : index
    %c0_728 = arith.constant 0 : index
    %493 = vector.load %arg14[%c3_726, %c2_727, %c0_728] : memref<6x6x256xf32, #tpu.memory_space<vmem>>, vector<1x4x256xf32>
    %494 = vector.shape_cast %493 : vector<1x4x256xf32> to vector<4x256xf32>
    %c8_729 = arith.constant 8 : index
    %c1280_730 = arith.constant 1280 : index
    %495 = vector.load %arg15[%c8_729, %c1280_730] : memref<16x2304xf32, #tpu.memory_space<vmem>>, vector<4x256xf32>
    tpu.vector_store %arg15[%c8_729, %c1280_730], %494 {strides = array<i32>} : memref<16x2304xf32, #tpu.memory_space<vmem>>, vector<4x256xf32>,
    %c4_731 = arith.constant 4 : index
    %c2_732 = arith.constant 2 : index
    %c0_733 = arith.constant 0 : index
    %496 = vector.load %arg14[%c4_731, %c2_732, %c0_733] : memref<6x6x256xf32, #tpu.memory_space<vmem>>, vector<1x4x256xf32>
    %497 = vector.shape_cast %496 : vector<1x4x256xf32> to vector<4x256xf32>
    %c12_734 = arith.constant 12 : index
    %c1280_735 = arith.constant 1280 : index
    %498 = vector.load %arg15[%c12_734, %c1280_735] : memref<16x2304xf32, #tpu.memory_space<vmem>>, vector<4x256xf32>
    tpu.vector_store %arg15[%c12_734, %c1280_735], %497 {strides = array<i32>} : memref<16x2304xf32, #tpu.memory_space<vmem>>, vector<4x256xf32>,
    %c2_736 = arith.constant 2 : index
    %c0_737 = arith.constant 0 : index
    %c0_738 = arith.constant 0 : index
    %499 = vector.load %arg14[%c2_736, %c0_737, %c0_738] : memref<6x6x256xf32, #tpu.memory_space<vmem>>, vector<1x4x256xf32>
    %500 = vector.shape_cast %499 : vector<1x4x256xf32> to vector<4x256xf32>
    %c0_739 = arith.constant 0 : index
    %c1536_740 = arith.constant 1536 : index
    %501 = vector.load %arg15[%c0_739, %c1536_740] : memref<16x2304xf32, #tpu.memory_space<vmem>>, vector<4x256xf32>
    tpu.vector_store %arg15[%c0_739, %c1536_740], %500 {strides = array<i32>} : memref<16x2304xf32, #tpu.memory_space<vmem>>, vector<4x256xf32>,
    %c3_741 = arith.constant 3 : index
    %c0_742 = arith.constant 0 : index
    %c0_743 = arith.constant 0 : index
    %502 = vector.load %arg14[%c3_741, %c0_742, %c0_743] : memref<6x6x256xf32, #tpu.memory_space<vmem>>, vector<1x4x256xf32>
    %503 = vector.shape_cast %502 : vector<1x4x256xf32> to vector<4x256xf32>
    %c4_744 = arith.constant 4 : index
    %c1536_745 = arith.constant 1536 : index
    %504 = vector.load %arg15[%c4_744, %c1536_745] : memref<16x2304xf32, #tpu.memory_space<vmem>>, vector<4x256xf32>
    tpu.vector_store %arg15[%c4_744, %c1536_745], %503 {strides = array<i32>} : memref<16x2304xf32, #tpu.memory_space<vmem>>, vector<4x256xf32>,
    %c4_746 = arith.constant 4 : index
    %c0_747 = arith.constant 0 : index
    %c0_748 = arith.constant 0 : index
    %505 = vector.load %arg14[%c4_746, %c0_747, %c0_748] : memref<6x6x256xf32, #tpu.memory_space<vmem>>, vector<1x4x256xf32>
    %506 = vector.shape_cast %505 : vector<1x4x256xf32> to vector<4x256xf32>
    %c8_749 = arith.constant 8 : index
    %c1536_750 = arith.constant 1536 : index
    %507 = vector.load %arg15[%c8_749, %c1536_750] : memref<16x2304xf32, #tpu.memory_space<vmem>>, vector<4x256xf32>
    tpu.vector_store %arg15[%c8_749, %c1536_750], %506 {strides = array<i32>} : memref<16x2304xf32, #tpu.memory_space<vmem>>, vector<4x256xf32>,
    %c5_751 = arith.constant 5 : index
    %c0_752 = arith.constant 0 : index
    %c0_753 = arith.constant 0 : index
    %508 = vector.load %arg14[%c5_751, %c0_752, %c0_753] : memref<6x6x256xf32, #tpu.memory_space<vmem>>, vector<1x4x256xf32>
    %509 = vector.shape_cast %508 : vector<1x4x256xf32> to vector<4x256xf32>
    %c12_754 = arith.constant 12 : index
    %c1536_755 = arith.constant 1536 : index
    %510 = vector.load %arg15[%c12_754, %c1536_755] : memref<16x2304xf32, #tpu.memory_space<vmem>>, vector<4x256xf32>
    tpu.vector_store %arg15[%c12_754, %c1536_755], %509 {strides = array<i32>} : memref<16x2304xf32, #tpu.memory_space<vmem>>, vector<4x256xf32>,
    %c2_756 = arith.constant 2 : index
    %c1_757 = arith.constant 1 : index
    %c0_758 = arith.constant 0 : index
    %511 = vector.load %arg14[%c2_756, %c1_757, %c0_758] : memref<6x6x256xf32, #tpu.memory_space<vmem>>, vector<1x4x256xf32>
    %512 = vector.shape_cast %511 : vector<1x4x256xf32> to vector<4x256xf32>
    %c0_759 = arith.constant 0 : index
    %c1792_760 = arith.constant 1792 : index
    %513 = vector.load %arg15[%c0_759, %c1792_760] : memref<16x2304xf32, #tpu.memory_space<vmem>>, vector<4x256xf32>
    tpu.vector_store %arg15[%c0_759, %c1792_760], %512 {strides = array<i32>} : memref<16x2304xf32, #tpu.memory_space<vmem>>, vector<4x256xf32>,
    %c3_761 = arith.constant 3 : index
    %c1_762 = arith.constant 1 : index
    %c0_763 = arith.constant 0 : index
    %514 = vector.load %arg14[%c3_761, %c1_762, %c0_763] : memref<6x6x256xf32, #tpu.memory_space<vmem>>, vector<1x4x256xf32>
    %515 = vector.shape_cast %514 : vector<1x4x256xf32> to vector<4x256xf32>
    %c4_764 = arith.constant 4 : index
    %c1792_765 = arith.constant 1792 : index
    %516 = vector.load %arg15[%c4_764, %c1792_765] : memref<16x2304xf32, #tpu.memory_space<vmem>>, vector<4x256xf32>
    tpu.vector_store %arg15[%c4_764, %c1792_765], %515 {strides = array<i32>} : memref<16x2304xf32, #tpu.memory_space<vmem>>, vector<4x256xf32>,
    %c4_766 = arith.constant 4 : index
    %c1_767 = arith.constant 1 : index
    %c0_768 = arith.constant 0 : index
    %517 = vector.load %arg14[%c4_766, %c1_767, %c0_768] : memref<6x6x256xf32, #tpu.memory_space<vmem>>, vector<1x4x256xf32>
    %518 = vector.shape_cast %517 : vector<1x4x256xf32> to vector<4x256xf32>
    %c8_769 = arith.constant 8 : index
    %c1792_770 = arith.constant 1792 : index
    %519 = vector.load %arg15[%c8_769, %c1792_770] : memref<16x2304xf32, #tpu.memory_space<vmem>>, vector<4x256xf32>
    tpu.vector_store %arg15[%c8_769, %c1792_770], %518 {strides = array<i32>} : memref<16x2304xf32, #tpu.memory_space<vmem>>, vector<4x256xf32>,
    %c5_771 = arith.constant 5 : index
    %c1_772 = arith.constant 1 : index
    %c0_773 = arith.constant 0 : index
    %520 = vector.load %arg14[%c5_771, %c1_772, %c0_773] : memref<6x6x256xf32, #tpu.memory_space<vmem>>, vector<1x4x256xf32>
    %521 = vector.shape_cast %520 : vector<1x4x256xf32> to vector<4x256xf32>
    %c12_774 = arith.constant 12 : index
    %c1792_775 = arith.constant 1792 : index
    %522 = vector.load %arg15[%c12_774, %c1792_775] : memref<16x2304xf32, #tpu.memory_space<vmem>>, vector<4x256xf32>
    tpu.vector_store %arg15[%c12_774, %c1792_775], %521 {strides = array<i32>} : memref<16x2304xf32, #tpu.memory_space<vmem>>, vector<4x256xf32>,
    %c2_776 = arith.constant 2 : index
    %c2_777 = arith.constant 2 : index
    %c0_778 = arith.constant 0 : index
    %523 = vector.load %arg14[%c2_776, %c2_777, %c0_778] : memref<6x6x256xf32, #tpu.memory_space<vmem>>, vector<1x4x256xf32>
    %524 = vector.shape_cast %523 : vector<1x4x256xf32> to vector<4x256xf32>
    %c0_779 = arith.constant 0 : index
    %c2048_780 = arith.constant 2048 : index
    %525 = vector.load %arg15[%c0_779, %c2048_780] : memref<16x2304xf32, #tpu.memory_space<vmem>>, vector<4x256xf32>
    tpu.vector_store %arg15[%c0_779, %c2048_780], %524 {strides = array<i32>} : memref<16x2304xf32, #tpu.memory_space<vmem>>, vector<4x256xf32>,
    %c3_781 = arith.constant 3 : index
    %c2_782 = arith.constant 2 : index
    %c0_783 = arith.constant 0 : index
    %526 = vector.load %arg14[%c3_781, %c2_782, %c0_783] : memref<6x6x256xf32, #tpu.memory_space<vmem>>, vector<1x4x256xf32>
    %527 = vector.shape_cast %526 : vector<1x4x256xf32> to vector<4x256xf32>
    %c4_784 = arith.constant 4 : index
    %c2048_785 = arith.constant 2048 : index
    %528 = vector.load %arg15[%c4_784, %c2048_785] : memref<16x2304xf32, #tpu.memory_space<vmem>>, vector<4x256xf32>
    tpu.vector_store %arg15[%c4_784, %c2048_785], %527 {strides = array<i32>} : memref<16x2304xf32, #tpu.memory_space<vmem>>, vector<4x256xf32>,
    %c4_786 = arith.constant 4 : index
    %c2_787 = arith.constant 2 : index
    %c0_788 = arith.constant 0 : index
    %529 = vector.load %arg14[%c4_786, %c2_787, %c0_788] : memref<6x6x256xf32, #tpu.memory_space<vmem>>, vector<1x4x256xf32>
    %530 = vector.shape_cast %529 : vector<1x4x256xf32> to vector<4x256xf32>
    %c8_789 = arith.constant 8 : index
    %c2048_790 = arith.constant 2048 : index
    %531 = vector.load %arg15[%c8_789, %c2048_790] : memref<16x2304xf32, #tpu.memory_space<vmem>>, vector<4x256xf32>
    tpu.vector_store %arg15[%c8_789, %c2048_790], %530 {strides = array<i32>} : memref<16x2304xf32, #tpu.memory_space<vmem>>, vector<4x256xf32>,
    %c5_791 = arith.constant 5 : index
    %c2_792 = arith.constant 2 : index
    %c0_793 = arith.constant 0 : index
    %532 = vector.load %arg14[%c5_791, %c2_792, %c0_793] : memref<6x6x256xf32, #tpu.memory_space<vmem>>, vector<1x4x256xf32>
    %533 = vector.shape_cast %532 : vector<1x4x256xf32> to vector<4x256xf32>
    %c12_794 = arith.constant 12 : index
    %c2048_795 = arith.constant 2048 : index
    %534 = vector.load %arg15[%c12_794, %c2048_795] : memref<16x2304xf32, #tpu.memory_space<vmem>>, vector<4x256xf32>
    tpu.vector_store %arg15[%c12_794, %c2048_795], %533 {strides = array<i32>} : memref<16x2304xf32, #tpu.memory_space<vmem>>, vector<4x256xf32>,
    %c0_796 = arith.constant 0 : index
    %c0_797 = arith.constant 0 : index
    %535 = vector.load %arg15[%c0_796, %c0_797] : memref<16x2304xf32, #tpu.memory_space<vmem>>, vector<16x2304xf32>
    %536 = arith.truncf %535 : vector<16x2304xf32> to vector<16x2304xbf16>
    %c0_798 = arith.constant 0 : index
    %c0_799 = arith.constant 0 : index
    %537 = vector.load %arg8[%c0_798, %c0_799] : memref<2304x48xbf16, #tpu.memory_space<vmem>>, vector<2304x48xbf16>
    %cst_800 = arith.constant dense<0.000000e+00> : vector<16x48xf32>
    %538 = tpu.matmul %536, %537, %cst_800 {dimension_numbers = #tpu.dot_dimension_numbers<[1], [0], [0], [1], [0, 0, 1, 1], [], []>} : vector<16x2304xbf16>, vector<2304x48xbf16>, vector<16x48xf32> -> vector<16x48xf32>
    %c0_801 = arith.constant 0 : index
    %c0_802 = arith.constant 0 : index
    %539 = vector.load %arg9[%c0_801, %c0_802] : memref<1x48xf32, #tpu.memory_space<vmem>>, vector<1x48xf32>
    %540 = vector.broadcast %539 : vector<1x48xf32> to vector<16x48xf32>
    %541 = arith.addf %538, %540 : vector<16x48xf32>
    %542 = math.tanh %541 : vector<16x48xf32>
    %543 = vector.extract_strided_slice %542 {offsets = [0, 0], sizes = [4, 48], strides = [1, 1]} : vector<16x48xf32> to vector<4x48xf32>
    %c0_803 = arith.constant 0 : index
    %c0_804 = arith.constant 0 : index
    %c0_805 = arith.constant 0 : index
    %c0_806 = arith.constant 0 : index
    %544 = vector.load %arg10[%c0_803, %c0_804, %c0_805, %c0_806] : memref<1x4x4x48xf32, #tpu.memory_space<vmem>>, vector<1x1x4x48xf32>
    %545 = vector.shape_cast %544 : vector<1x1x4x48xf32> to vector<4x48xf32>
    %546 = vector.shape_cast %543 : vector<4x48xf32> to vector<1x1x4x48xf32>
    tpu.vector_store %arg10[%c0_803, %c0_804, %c0_805, %c0_806], %546 {strides = array<i32>} : memref<1x4x4x48xf32, #tpu.memory_space<vmem>>, vector<1x1x4x48xf32>,
    %547 = vector.extract_strided_slice %542 {offsets = [4, 0], sizes = [4, 48], strides = [1, 1]} : vector<16x48xf32> to vector<4x48xf32>
    %c0_807 = arith.constant 0 : index
    %c1_808 = arith.constant 1 : index
    %c0_809 = arith.constant 0 : index
    %c0_810 = arith.constant 0 : index
    %548 = vector.load %arg10[%c0_807, %c1_808, %c0_809, %c0_810] : memref<1x4x4x48xf32, #tpu.memory_space<vmem>>, vector<1x1x4x48xf32>
    %549 = vector.shape_cast %548 : vector<1x1x4x48xf32> to vector<4x48xf32>
    %550 = vector.shape_cast %547 : vector<4x48xf32> to vector<1x1x4x48xf32>
    tpu.vector_store %arg10[%c0_807, %c1_808, %c0_809, %c0_810], %550 {strides = array<i32>} : memref<1x4x4x48xf32, #tpu.memory_space<vmem>>, vector<1x1x4x48xf32>,
    %551 = vector.extract_strided_slice %542 {offsets = [8, 0], sizes = [4, 48], strides = [1, 1]} : vector<16x48xf32> to vector<4x48xf32>
    %c0_811 = arith.constant 0 : index
    %c2_812 = arith.constant 2 : index
    %c0_813 = arith.constant 0 : index
    %c0_814 = arith.constant 0 : index
    %552 = vector.load %arg10[%c0_811, %c2_812, %c0_813, %c0_814] : memref<1x4x4x48xf32, #tpu.memory_space<vmem>>, vector<1x1x4x48xf32>
    %553 = vector.shape_cast %552 : vector<1x1x4x48xf32> to vector<4x48xf32>
    %554 = vector.shape_cast %551 : vector<4x48xf32> to vector<1x1x4x48xf32>
    tpu.vector_store %arg10[%c0_811, %c2_812, %c0_813, %c0_814], %554 {strides = array<i32>} : memref<1x4x4x48xf32, #tpu.memory_space<vmem>>, vector<1x1x4x48xf32>,
    %555 = vector.extract_strided_slice %542 {offsets = [12, 0], sizes = [4, 48], strides = [1, 1]} : vector<16x48xf32> to vector<4x48xf32>
    %c0_815 = arith.constant 0 : index
    %c3_816 = arith.constant 3 : index
    %c0_817 = arith.constant 0 : index
    %c0_818 = arith.constant 0 : index
    %556 = vector.load %arg10[%c0_815, %c3_816, %c0_817, %c0_818] : memref<1x4x4x48xf32, #tpu.memory_space<vmem>>, vector<1x1x4x48xf32>
    %557 = vector.shape_cast %556 : vector<1x1x4x48xf32> to vector<4x48xf32>
    %558 = vector.shape_cast %555 : vector<4x48xf32> to vector<1x1x4x48xf32>
    tpu.vector_store %arg10[%c0_815, %c3_816, %c0_817, %c0_818], %558 {strides = array<i32>} : memref<1x4x4x48xf32, #tpu.memory_space<vmem>>, vector<1x1x4x48xf32>,
    return
  }
  func.func @transform_0(%arg0: i32) -> (i32, i32, i32, i32) {
    %c0_i32 = arith.constant 0 : i32
    %c0_i32_0 = arith.constant 0 : i32
    %c0_i32_1 = arith.constant 0 : i32
    %c0_i32_2 = arith.constant 0 : i32
    return %arg0, %c0_i32, %c0_i32_0, %c0_i32_1 : i32, i32, i32, i32
  }
  func.func @transform_1(%arg0: i32) -> (i32, i32) {
    %c0_i32 = arith.constant 0 : i32
    %c0_i32_0 = arith.constant 0 : i32
    %c0_i32_1 = arith.constant 0 : i32
    return %c0_i32, %c0_i32_0 : i32, i32
  }
  func.func @transform_2(%arg0: i32) -> (i32, i32) {
    %c0_i32 = arith.constant 0 : i32
    %c0_i32_0 = arith.constant 0 : i32
    %c0_i32_1 = arith.constant 0 : i32
    return %c0_i32, %c0_i32_0 : i32, i32
  }
  func.func @transform_3(%arg0: i32) -> (i32, i32) {
    %c0_i32 = arith.constant 0 : i32
    %c0_i32_0 = arith.constant 0 : i32
    %c0_i32_1 = arith.constant 0 : i32
    return %c0_i32, %c0_i32_0 : i32, i32
  }
  func.func @transform_4(%arg0: i32) -> (i32, i32) {
    %c0_i32 = arith.constant 0 : i32
    %c0_i32_0 = arith.constant 0 : i32
    %c0_i32_1 = arith.constant 0 : i32
    return %c0_i32, %c0_i32_0 : i32, i32
  }
  func.func @transform_5(%arg0: i32) -> (i32, i32) {
    %c0_i32 = arith.constant 0 : i32
    %c0_i32_0 = arith.constant 0 : i32
    %c0_i32_1 = arith.constant 0 : i32
    return %c0_i32, %c0_i32_0 : i32, i32
  }
  func.func @transform_6(%arg0: i32) -> (i32, i32) {
    %c0_i32 = arith.constant 0 : i32
    %c0_i32_0 = arith.constant 0 : i32
    %c0_i32_1 = arith.constant 0 : i32
    return %c0_i32, %c0_i32_0 : i32, i32
  }
  func.func @transform_7(%arg0: i32) -> (i32, i32) {
    %c0_i32 = arith.constant 0 : i32
    %c0_i32_0 = arith.constant 0 : i32
    %c0_i32_1 = arith.constant 0 : i32
    return %c0_i32, %c0_i32_0 : i32, i32
  }
  func.func @transform_8(%arg0: i32) -> (i32, i32) {
    %c0_i32 = arith.constant 0 : i32
    %c0_i32_0 = arith.constant 0 : i32
    %c0_i32_1 = arith.constant 0 : i32
    return %c0_i32, %c0_i32_0 : i32, i32
  }
  func.func @transform_9(%arg0: i32) -> (i32, i32, i32, i32) {
    %c0_i32 = arith.constant 0 : i32
    %c0_i32_0 = arith.constant 0 : i32
    %c0_i32_1 = arith.constant 0 : i32
    %c0_i32_2 = arith.constant 0 : i32
    return %arg0, %c0_i32, %c0_i32_0, %c0_i32_1 : i32, i32, i32, i32
  }
}

</mosaic_0001>

<bundles_post_ra>
// kernel: generator_forward.1
= control target key start
LH: loop header
LB: loop body
LE: loop exit
PB: predicated region body
PF: predicated region fallthrough
CT: control target
= control target key end

     0   :  { %s7832_s30 = smov 0   ;;  %s9473_s0 = inlined_call_operand.vmem [shape: f32[2,4,4,48], index: 0, kind: input, shape index: {}]   ;;  %s9474_s1 = inlined_call_operand.vmem [shape: bf16[432,256], index: 1, kind: input, shape index: {}]   ;;  %s9475_s2 = inlined_call_operand.vmem [shape: f32[1,256], index: 2, kind: input, shape index: {}]   ;;  %s9476_s3 = inlined_call_operand.vmem [shape: bf16[2304,128], index: 3, kind: input, shape index: {}]   ;;  %s9477_s4 = inlined_call_operand.vmem [shape: f32[1,128], index: 4, kind: input, shape index: {}]   ;;  %s9478_s5 = inlined_call_operand.vmem [shape: bf16[1152,256], index: 5, kind: input, shape index: {}]   ;;  %s9479_s6 = inlined_call_operand.vmem [shape: f32[1,256], index: 6, kind: input, shape index: {}]   ;;  %s9480_s7 = inlined_call_operand.vmem [shape: bf16[2304,48], index: 7, kind: input, shape index: {}]   ;;  %s9481_s8 = inlined_call_operand.vmem [shape: f32[1,48], index: 8, kind: input, shape index: {}]   ;;  %s9482_s9 = inlined_call_operand.vmem [shape: f32[2,4,4,48], index: 9, kind: output, shape index: {}]  }
   0x1 LB: > { %s6268_s10 = sadd.s32 4294967295, %s7771_s30   ;;  %p6272_p0 = scmp.ge.s32.totalorder %s7771_s30, 1  ;;  %s7771_s30 = sphi %s7832_s30, %s19_s30  }
   0x2   : > { %p287_p1 = scmp.lt.s32.totalorder %s7771_s30, 3 }
   0x4   : > { %p288_p2 = pnand %p6272_p0, %p287_p1 }
   0x5   : > { %p7842_p3 = scmp.lt.s32.totalorder (!%p288_p2), %s6268_s10, 1  ;;  %s7774_s28 = smov (!%p288_p2), 96  }
   0x6   : > { %291 = sbr.rel (%p288_p2) target bundleno = 1546 (0x60a), region = 56  ;;  %s7776_s19 = smov (!%p288_p2), 64  }
   0x7   : > { %s7777_s20 = smov (!%p288_p2), 48   ;;  %s7779_s26 = smov (!%p288_p2), 32  }
   0x8   : > { %s7780_s12 = smov (!%p288_p2), 80  }
   0xb   : > { %vm334_vm0 = vcmask 390144   ;;  %v7773_v0 = vmov 0.0   ;;  %v7189_v1 = vld [vmem:[%s9474_s1 + $0x74] ss:$8 sps:$4 sm:$0xff]   ;;  %s9485_s10 = smov (!%p7842_p3, %s6268_s10), 1  ;;  %vm373_vm1 = vcmask 388096  }
   0xc   : > { %335 = vst.msk [vmem:[#allocation2] sm:$0x3f] %vm334_vm0, %v7773_v0  ;;  %336 = vst.msk [vmem:[#allocation2 + $0x8] sm:$0x3f] %vm334_vm0, %v7773_v0  ;;  %v7191_v2 = vld [vmem:[%s9474_s1 + $0x70] ss:$8 sps:$4 sm:$0xff]   ;;  %977 = vmatprep.subr.bf16.mxu0 %v7189_v1 }
   0xd   : > { %337 = vst.msk [vmem:[#allocation2 + $0x10] sm:$0x3f] %vm334_vm0, %v7773_v0  ;;  %338 = vst.msk [vmem:[#allocation2 + $0x18] sm:$0x3f] %vm334_vm0, %v7773_v0  ;;  %v7192_v3 = vld [vmem:[%s9474_s1 + $0x64] ss:$8 sps:$4 sm:$0xff]   ;;  %978 = vmatpush1.bf16.msra.mxu0 %v7191_v2 }
   0xe   : > { %339 = vst.msk [vmem:[#allocation2 + $0x20] sm:$0x3f] %vm334_vm0, %v7773_v0  ;;  %340 = vst.msk [vmem:[#allocation2 + $0x28] sm:$0x3f] %vm334_vm0, %v7773_v0  ;;  %s6774_s18 = sshll.u32 %s9485_s10, 4  ;;  %979 = vmatprep.subr.bf16.mxu0 %v7192_v3  ;;  %v645_v12 = vld [vmem:[%s9474_s1 + $0x40] sm:$0xff] }
   0xf   : > { %341 = vst [vmem:[#allocation3 + $0x30] sm:$0x3f] %v7773_v0  ;;  %342 = vst [vmem:[#allocation3] sm:$0x3f] %v7773_v0  ;;  %v7194_v4 = vld [vmem:[%s9474_s1 + $0x60] ss:$8 sps:$4 sm:$0xff]   ;;  %s327_s23 = scalar_lea.vmem %s9473_s0, %s6774_s18  ;;  %s332_s11 = scalar_lea.vmem %s9482_s9, %s6774_s18 }
  0x10   : > { %343 = vst [vmem:[#allocation3 + $0x58] sm:$0x3f] %v7773_v0  ;;  %344 = vst [vmem:[#allocation3 + $0x18] sm:$0x3f] %v7773_v0  ;;  %v7195_v5 = vld [vmem:[%s9474_s1 + $0x54] ss:$8 sps:$4 sm:$0xff]  }
  0x11   : > { %345 = vst [vmem:[#allocation3 + $0x50] sm:$0x3f] %v7773_v0  ;;  %346 = vst [vmem:[#allocation3 + $0x20] sm:$0x3f] %v7773_v0  ;;  %v6277_v6 = vld [vmem:[%s327_s23 + $0x4] sm:$0xf]  ;;  %980 = vmatpush1.bf16.msra.mxu0 %v7194_v4 }
  0x12   : > { %347 = vst [vmem:[#allocation3 + $0x8] sm:$0x3f] %v7773_v0  ;;  %348 = vst [vmem:[#allocation3 + $0x38] sm:$0x3f] %v7773_v0  ;;  %v371_v7 = vld [vmem:[%s327_s23] sm:$0xf]  ;;  %981 = vmatprep.subr.bf16.mxu0 %v7195_v5 }
  0x13   : > { %349 = vst [vmem:[#allocation3 + $0x28] sm:$0x3f] %v7773_v0  ;;  %350 = vst [vmem:[#allocation3 + $0x48] sm:$0x3f] %v7773_v0  ;;  %v6278_v8 = vld [vmem:[%s327_s23 + $0x8] sm:$0xf] }
  0x14   : > { %351 = vst [vmem:[#allocation3 + $0x10] sm:$0x3f] %v7773_v0  ;;  %352 = vst [vmem:[#allocation3 + $0x40] sm:$0x3f] %v7773_v0  ;;  %v6279_v9 = vld [vmem:[%s327_s23 + $0xc] sm:$0xf] }
  0x15   : > { %353 = vst [vmem:[#allocation4] sm:$0x3f] %v7773_v0  ;;  %354 = vst [vmem:[#allocation4 + $0x8] sm:$0x3f] %v7773_v0  ;;  %v430_v10 = vld [vmem:[#allocation2 + $0x2] sm:$0xf] }
  0x16   : > { %355 = vst [vmem:[#allocation4 + $0x10] sm:$0x3f] %v7773_v0  ;;  %356 = vst [vmem:[#allocation4 + $0x18] sm:$0x3f] %v7773_v0  ;;  %v7197_v11 = vld [vmem:[%s9474_s1 + $0x50] ss:$8 sps:$4 sm:$0xff]   ;;  %432 = vrot.lane.b32.xlu0 %v430_v10, %s7774_s28 }
  0x17   : > { %357 = vst [vmem:[#allocation4 + $0x20] sm:$0x3f] %v7773_v0  ;;  %358 = vst [vmem:[#allocation4 + $0x28] sm:$0x3f] %v7773_v0  ;;  %v646_v13 = vld [vmem:[%s9474_s1 + $0x48] sm:$0xff]  ;;  %v643_v15 = vld [vmem:[%s9474_s1 + $0x30] sm:$0xff]  ;;  %982 = vmatpush1.bf16.msra.mxu0 %v7197_v11 }
  0x18   : > { %359 = vst [vmem:[#allocation5 + $0x48] sm:$0x3f] %v7773_v0  ;;  %360 = vst [vmem:[#allocation5] sm:$0x3f] %v7773_v0  ;;  %v7198_v14 = vld [vmem:[%s9474_s1 + $0x44] ss:$8 sps:$4 sm:$0xff]   ;;  %v6288_v16 = vcombine.low %v645_v12, %v646_v13 }
  0x19   : > { %361 = vst [vmem:[#allocation5 + $0x50] sm:$0x3f] %v7773_v0  ;;  %362 = vst [vmem:[#allocation5 + $0x30] sm:$0x3f] %v7773_v0  ;;  %v644_v17 = vld [vmem:[%s9474_s1 + $0x38] sm:$0xff]  ;;  %983 = vmatprep.subr.bf16.mxu0 %v7198_v14  ;;  %s7775_s23 = smov 16  }
  0x1a   : > { %363 = vst [vmem:[#allocation5 + $0x8] sm:$0x3f] %v7773_v0  ;;  %364 = vst [vmem:[#allocation5 + $0x20] sm:$0x3f] %v7773_v0  ;;  %v7200_v18 = vld [vmem:[%s9474_s1 + $0x34] ss:$8 sps:$4 sm:$0xff]   ;;  %v6286_v25 = vcombine.low %v643_v15, %v644_v17 }
  0x1b   : > { %365 = vst [vmem:[#allocation5 + $0x18] sm:$0x3f] %v7773_v0  ;;  %366 = vst [vmem:[#allocation5 + $0x40] sm:$0x3f] %v7773_v0  ;;  %984 = vmatpush1.bf16.msra.mxu0 %v6288_v16  ;;  %v641_v26 = vld [vmem:[%s9474_s1 + $0x20] sm:$0xff]  ;;  %v642_v27 = vld [vmem:[%s9474_s1 + $0x28] sm:$0xff] }
  0x1c   : > { %367 = vst [vmem:[#allocation5 + $0x38] sm:$0x3f] %v7773_v0  ;;  %368 = vst [vmem:[#allocation5 + $0x28] sm:$0x3f] %v7773_v0  ;;  %985 = vmatprep.subr.bf16.mxu0 %v7200_v18  ;;  %v7202_v28 = vld [vmem:[%s9474_s1 + $0x24] ss:$8 sps:$4 sm:$0xff]   ;;  %v6284_v33 = vcombine.low %v641_v26, %v642_v27 }
  0x1d   : > { %369 = vst [vmem:[#allocation5 + $0x58] sm:$0x3f] %v7773_v0  ;;  %370 = vst [vmem:[#allocation5 + $0x10] sm:$0x3f] %v7773_v0  ;;  %v639_v34 = vld [vmem:[%s9474_s1 + $0x10] sm:$0xff]  ;;  %v640_v35 = vld [vmem:[%s9474_s1 + $0x18] sm:$0xff] }
  0x1e   : > { %378 = vst.msk [vmem:[#allocation2 + $0x11] sm:$0xf] %vm373_vm1, %v6277_v6  ;;  %374 = vst.msk [vmem:[#allocation2 + $0x9] sm:$0xf] %vm373_vm1, %v371_v7  ;;  %v7204_v36 = vld [vmem:[%s9474_s1 + $0x14] ss:$8 sps:$4 sm:$0xff]   ;;  %v6282_v40 = vcombine.low %v639_v34, %v640_v35 }
  0x1f   : > { %382 = vst.msk [vmem:[#allocation2 + $0x19] sm:$0xf] %vm373_vm1, %v6278_v8  ;;  %386 = vst.msk [vmem:[#allocation2 + $0x21] sm:$0xf] %vm373_vm1, %v6279_v9  ;;  %986 = vmatpush1.bf16.msra.mxu0 %v6286_v25  ;;  %v637_v42 = vld [vmem:[%s9474_s1] sm:$0xff]  ;;  %v638_v43 = vld [vmem:[%s9474_s1 + $0x8] sm:$0xff] }
  0x20   : > { %987 = vmatprep.subr.bf16.mxu0 %v7202_v28  ;;  %v7206_v44 = vld [vmem:[%s9474_s1 + $0x4] ss:$8 sps:$4 sm:$0xff]   ;;  %v7210_v47 = vld [vmem:[%s9474_s1 + $0x174] ss:$8 sps:$4 sm:$0xff]   ;;  %v7214_v48 = vld [vmem:[%s9474_s1 + $0x170] ss:$8 sps:$4 sm:$0xff]   ;;  %v6280_v53 = vcombine.low %v637_v42, %v638_v43 }
  0x21   : > { %v667_v49 = vld [vmem:[%s9474_s1 + $0xf0] sm:$0xff]  ;;  %v387_v51 = vld [vmem:[#allocation2] sm:$0xf]  ;;  %v7215_v52 = vld [vmem:[%s9474_s1 + $0x164] ss:$8 sps:$4 sm:$0xff]   ;;  %1020 = vmatprep.subr.bf16.mxu1 %v7210_v47  ;;  %vm393_vm2 = vcmask 392196  }
  0x22   : > { %v7208_v50 = vld [vmem:[%s9474_s1 + $0xf4] ss:$8 sps:$4 sm:$0xff]   ;;  %388 = vst.msk [vmem:[#allocation6] sm:$0xf] %vm373_vm1, %v387_v51  ;;  %v7219_v55 = vld [vmem:[%s9474_s1 + $0x160] ss:$8 sps:$4 sm:$0xff]   ;;  %1021 = vmatpush1.bf16.msra.mxu1 %v7214_v48 }
  0x23   : > { %988 = vmatpush1.bf16.msra.mxu0 %v6284_v33  ;;  %v668_v54 = vld [vmem:[%s9474_s1 + $0xf8] sm:$0xff]  ;;  %v620_v58 = vld [vmem:[#allocation2 + $0x2a] sm:$0xf]  ;;  %v402_v61 = vld [vmem:[#allocation2 + $0x1] sm:$0xf]  ;;  %1022 = vmatprep.subr.bf16.mxu1 %v7215_v52  ;;  %vm973_vm3 = vcmask 392192  }
  0x24   : > { %989 = vmatprep.subr.bf16.mxu0 %v7204_v36  ;;  %v622_v63 = vrot.slane %v620_v58, 4  ;;  %v7220_v2 = vld [vmem:[%s9474_s1 + $0x154] ss:$8 sps:$4 sm:$0xff]   ;;  %v6310_v4 = vcombine.low %v667_v49, %v668_v54  ;;  %v665_v5 = vld [vmem:[%s9474_s1 + $0xe0] sm:$0xff]  ;;  %v666_v6 = vld [vmem:[%s9474_s1 + $0xe8] sm:$0xff]  ;;  %vm437_vm4 = vcmask 125952  }
  0x25   : > { %v449_v19 = vld [vmem:[#allocation2 + $0x12] sm:$0xf]  ;;  %v464_v20 = vld [vmem:[#allocation2 + $0x8] sm:$0xf]  ;;  %v7212_v8 = vld [vmem:[%s9474_s1 + $0xe4] ss:$8 sps:$4 sm:$0xff]   ;;  %v6308_v14 = vcombine.low %v665_v5, %v666_v6 }
  0x26   : > { %v456_v21 = vld [vmem:[#allocation2 + $0x1a] sm:$0xf]  ;;  %451 = vrot.lane.b32.xlu1 %v449_v19, %s7774_s28  ;;  %466 = vrot.lane.b32.xlu0 %v464_v20, %s7775_s23  ;;  %v471_v24 = vld [vmem:[#allocation2 + $0x10] sm:$0xf]  ;;  %v492_v30 = vld [vmem:[#allocation2 + $0x9] sm:$0xf] }
  0x27   : > { %v458_v22 = vrot.slane %v456_v21, 4  ;;  %v479_v23 = vld [vmem:[#allocation2 + $0x18] sm:$0xf]  ;;  %v473_v29 = vrot.slane %v471_v24, 4  ;;  %v485_v31 = vld [vmem:[#allocation2 + $0x20] sm:$0xf]  ;;  %990 = vmatpush1.bf16.msra.mxu0 %v6282_v40  ;;  %1023 = vmatpush1.bf16.msra.mxu1 %v7219_v55 }
  0x28   : > { %v439_v32 = vld [vmem:[#allocation2 + $0xa] sm:$0xf]  ;;  %v499_v37 = vld [vmem:[#allocation2 + $0x11] sm:$0xf]  ;;  %v487_v38 = vrot.slane %v485_v31, 4  ;;  %991 = vmatprep.subr.bf16.mxu0 %v7206_v44  ;;  %1024 = vmatprep.subr.bf16.mxu1 %v7220_v2  ;;  %v664_v16 = vld [vmem:[%s9474_s1 + $0xd8] sm:$0xff] }
  0x29   : > { %v441_v39 = vrot.slane %v439_v32, 4  ;;  %v501_v41 = vrot.slane %v499_v37, 4  ;;  %v507_v45 = vld [vmem:[#allocation2 + $0x19] sm:$0xf]  ;;  %v513_v46 = vld [vmem:[#allocation2 + $0x21] sm:$0xf] }
  0x2a   : > { %459 = vrot.lane.b32.xlu1 %v458_v22, %s7774_s28  ;;  %481 = vrot.lane.b32.xlu0 %v479_v23, %s7775_s23  ;;  %v395_v56 = vld [vmem:[#allocation2 + $0x10] sm:$0xf]  ;;  %v613_v57 = vld [vmem:[#allocation2 + $0x1a] sm:$0xf]  ;;  %v389_v59 = vld [vmem:[#allocation2 + $0x8] sm:$0xf] }
  0x2b   : > { %396 = vst.msk [vmem:[#allocation6 + $0x90] sm:$0xf] %vm373_vm1, %v395_v56  ;;  %v515_v60 = vrot.slane %v513_v46, 4  ;;  %v615_v62 = vrot.slane %v613_v57, 4  ;;  %v391_v0 = vrot.slane %v389_v59, 4  ;;  %992 = vmatpush1.bf16.msra.mxu0 %v6280_v53  ;;  %v663_v15 = vld [vmem:[%s9474_s1 + $0xd0] sm:$0xff] }
  0x2c   : > { %v409_v1 = vld [vmem:[#allocation2 + $0x9] sm:$0xf]  ;;  %v397_v3 = vld [vmem:[#allocation2 + $0x18] sm:$0xf]  ;;  %624 = vst.msk [vmem:[#allocation6 + $0xa8] sm:$0xf0] %vm393_vm2, %v622_v63  ;;  %993 = vmatprep.subr.bf16.mxu0 %v7208_v50  ;;  %v6306_v26 = vcombine.low %v663_v15, %v664_v16 }
  0x2d   : > { %617 = vst.msk [vmem:[#allocation6 + $0x18] sm:$0xf0] %vm393_vm2, %v615_v62  ;;  %394 = vst.msk [vmem:[#allocation6] sm:$0xf0] %vm393_vm2, %v391_v0  ;;  %v399_v7 = vrot.slane %v397_v3, 4  ;;  %v411_v12 = vrot.slane %v409_v1, 4 }
  0x2e   : > { %474 = vrot.lane.b32.xlu1 %v473_v29, %s7775_s23  ;;  %494 = vrot.lane.b32.xlu0 %v492_v30, %s7776_s19  ;;  %v7224_v9 = vld [vmem:[%s9474_s1 + $0x150] ss:$8 sps:$4 sm:$0xff]   ;;  %v7225_v10 = vld [vmem:[%s9474_s1 + $0x144] ss:$8 sps:$4 sm:$0xff]   ;;  %v576_v46 = vld [vmem:[#allocation2 + $0x28] sm:$0xf] }
  0x2f   : > { %401 = vst.msk [vmem:[#allocation6 + $0x90] sm:$0xf0] %vm393_vm2, %v399_v7  ;;  %v417_v11 = vld [vmem:[#allocation2 + $0x11] sm:$0xf]  ;;  %v423_v13 = vld [vmem:[#allocation2 + $0x19] sm:$0xf]  ;;  %994 = vmatpush2.bf16.msra.mxu0 %v6310_v4  ;;  %1025 = vmatpush1.bf16.msra.mxu1 %v7224_v9 }
  0x30   : > { %995 = vmatprep.subr.bf16.mxu0 %v7212_v8  ;;  %v7217_v17 = vld [vmem:[%s9474_s1 + $0xd4] ss:$8 sps:$4 sm:$0xff]   ;;  %v7229_v18 = vld [vmem:[%s9474_s1 + $0x140] ss:$8 sps:$4 sm:$0xff]   ;;  %1026 = vmatprep.subr.bf16.mxu1 %v7225_v10  ;;  %v425_v21 = vrot.slane %v423_v13, 4  ;;  %v578_v58 = vrot.slane %v576_v46, 4 }
  0x31   : > { %v520_v19 = vld [vmem:[#allocation2 + $0xa] sm:$0xf]  ;;  %v7230_v20 = vld [vmem:[%s9474_s1 + $0x134] ss:$8 sps:$4 sm:$0xff]   ;;  %v661_v23 = vld [vmem:[%s9474_s1 + $0xc0] sm:$0xff]  ;;  %vm469_vm5 = vcmask 519296  }
  0x32   : > { %488 = vrot.lane.b32.xlu1 %v487_v38, %s7775_s23  ;;  %442 = vrot.lane.b32.xlu0 %v441_v39, %s7774_s28  ;;  %v529_v22 = vld [vmem:[#allocation2 + $0x12] sm:$0xf]  ;;  %v662_v24 = vld [vmem:[%s9474_s1 + $0xc8] sm:$0xff]  ;;  %v539_v28 = vld [vmem:[#allocation2 + $0x1a] sm:$0xf]  ;;  %s7778_s23 = smov 112  }
  0x33   : > { %v7222_v25 = vld [vmem:[%s9474_s1 + $0xc4] ss:$8 sps:$4 sm:$0xff]   ;;  %996 = vmatpush2.bf16.msra.mxu0 %v6308_v14  ;;  %v7234_v27 = vld [vmem:[%s9474_s1 + $0x130] ss:$8 sps:$4 sm:$0xff]   ;;  %1027 = vmatpush1.bf16.msra.mxu1 %v7229_v18  ;;  %v531_v31 = vrot.slane %v529_v22, 4  ;;  %v6304_v36 = vcombine.low %v661_v23, %v662_v24  ;;  %vm447_vm6 = vcmask 130052  }
  0x34   : > { %997 = vmatprep.subr.bf16.mxu0 %v7217_v17  ;;  %v546_v29 = vld [vmem:[#allocation2 + $0x22] sm:$0xf]  ;;  %1028 = vmatprep.subr.bf16.mxu1 %v7230_v20  ;;  %v659_v32 = vld [vmem:[%s9474_s1 + $0xb0] sm:$0xff]  ;;  %v660_v33 = vld [vmem:[%s9474_s1 + $0xb8] sm:$0xff]  ;;  %vm497_vm7 = vcmask 912896   ;;  %vm477_vm8 = vcmask 523396  }
  0x35   : > { %v7235_v30 = vld [vmem:[%s9474_s1 + $0x124] ss:$8 sps:$4 sm:$0xff]   ;;  %v7227_v34 = vld [vmem:[%s9474_s1 + $0xb4] ss:$8 sps:$4 sm:$0xff]   ;;  %v7239_v35 = vld [vmem:[%s9474_s1 + $0x120] ss:$8 sps:$4 sm:$0xff]   ;;  %v6302_v44 = vcombine.low %v659_v32, %v660_v33 }
  0x36   : > { %502 = vrot.lane.b32.xlu1 %v501_v41, %s7776_s19  ;;  %509 = vrot.lane.b32.xlu0 %v507_v45, %s7776_s19  ;;  %v548_v37 = vrot.slane %v546_v29, 4  ;;  %v554_v38 = vld [vmem:[#allocation2 + $0x10] sm:$0xf]  ;;  %v7240_v39 = vld [vmem:[%s9474_s1 + $0x114] ss:$8 sps:$4 sm:$0xff]   ;;  %v657_v41 = vld [vmem:[%s9474_s1 + $0xa0] sm:$0xff] }
  0x37   : > { %998 = vmatpush2.bf16.msra.mxu0 %v6306_v26  ;;  %1029 = vmatpush1.bf16.msra.mxu1 %v7234_v27  ;;  %v561_v40 = vld [vmem:[#allocation2 + $0x18] sm:$0xf]  ;;  %v658_v42 = vld [vmem:[%s9474_s1 + $0xa8] sm:$0xff]  ;;  %v569_v48 = vld [vmem:[#allocation2 + $0x20] sm:$0xf]  ;;  %vm505_vm9 = vcmask 916996  }
  0x38   : > { %999 = vmatprep.subr.bf16.mxu0 %v7222_v25  ;;  %1030 = vmatprep.subr.bf16.mxu1 %v7235_v30  ;;  %v7232_v43 = vld [vmem:[%s9474_s1 + $0xa4] ss:$8 sps:$4 sm:$0xff]   ;;  %v7244_v45 = vld [vmem:[%s9474_s1 + $0x110] ss:$8 sps:$4 sm:$0xff]   ;;  %v563_v47 = vrot.slane %v561_v40, 4  ;;  %v6300_v55 = vcombine.low %v657_v41, %v658_v42  ;;  %vm407_vm10 = vcmask 781696  }
  0x39   : > { %v7245_v49 = vld [vmem:[%s9474_s1 + $0x104] ss:$8 sps:$4 sm:$0xff]   ;;  %v590_v50 = vld [vmem:[#allocation2 + $0x19] sm:$0xf]  ;;  %v655_v51 = vld [vmem:[%s9474_s1 + $0x90] sm:$0xff]  ;;  %vm435_vm11 = vcmask 1044224  }
  0x3a   : > { %516 = vrot.lane.b32.xlu1 %v515_v60, %s7776_s19  ;;  %404 = vrot.lane.b32.xlu0 %v402_v61, %s7777_s20  ;;  %v656_v52 = vld [vmem:[%s9474_s1 + $0x98] sm:$0xff]  ;;  %v7247_v54 = vld [vmem:[%s9474_s1 + $0x100] ss:$8 sps:$4 sm:$0xff]   ;;  %v611_v56 = vld [vmem:[#allocation2 + $0x12] sm:$0xf]  ;;  %v592_v61 = vrot.slane %v590_v50, 4 }
  0x3b   : > { %1000 = vmatpush2.bf16.msra.mxu0 %v6304_v36  ;;  %1031 = vmatpush1.bf16.msra.mxu1 %v7239_v35  ;;  %v7237_v53 = vld [vmem:[%s9474_s1 + $0x94] ss:$8 sps:$4 sm:$0xff]   ;;  %v618_v57 = vld [vmem:[#allocation2 + $0x22] sm:$0xf]  ;;  %612 = vst.msk [vmem:[#allocation6 + $0x18] sm:$0xf] %vm373_vm1, %v611_v56  ;;  %v6298_v3 = vcombine.low %v655_v51, %v656_v52 }
  0x3c   : > { %1001 = vmatprep.subr.bf16.mxu0 %v7227_v34  ;;  %1032 = vmatprep.subr.bf16.mxu1 %v7240_v39  ;;  %619 = vst.msk [vmem:[#allocation6 + $0xa8] sm:$0xf] %vm373_vm1, %v618_v57  ;;  %v583_v59 = vld [vmem:[#allocation2 + $0x11] sm:$0xf]  ;;  %v7248_v60 = vld [vmem:[%s9474_s1 + $0x1a4] ss:$8 sps:$4 sm:$0xff]  }
  0x3d   : > { %v653_v62 = vld [vmem:[%s9474_s1 + $0x80] sm:$0xff]  ;;  %v654_v63 = vld [vmem:[%s9474_s1 + $0x88] sm:$0xff]  ;;  %v1128_v2 = vld [vmem:[#allocation3] sm:$0x1e]  ;;  %vm415_vm12 = vcmask 785796   ;;  %vm445_vm13 = vcmask 1048324  }
  0x3e   : > { %419 = vrot.lane.b32.xlu0 %v417_v11, %s7777_s20  ;;  %412 = vrot.lane.b32.xlu1 %v411_v12, %s7777_s20  ;;  %v7242_v0 = vld [vmem:[%s9474_s1 + $0x84] ss:$8 sps:$4 sm:$0xff]   ;;  %v7250_v1 = vld [vmem:[%s9474_s1 + $0x1a0] ss:$8 sps:$4 sm:$0xff]   ;;  %v1132_v5 = vrot.slane %v1128_v2, 1  ;;  %v6296_v9 = vcombine.low %v653_v62, %v654_v63  ;;  %vm525_vm14 = vcmask 1044352  }
  0x3f   : > { %1002 = vmatpush2.bf16.msra.mxu0 %v6302_v44  ;;  %1033 = vmatpush1.bf16.msra.mxu1 %v7244_v45  ;;  %v7251_v4 = vld [vmem:[%s9474_s1 + $0x194] ss:$8 sps:$4 sm:$0xff]   ;;  %v604_v6 = vld [vmem:[#allocation2 + $0x29] sm:$0xf]  ;;  %v598_v7 = vld [vmem:[#allocation2 + $0x21] sm:$0xf] }
  0x40   : > { %1003 = vmatprep.subr.bf16.mxu0 %v7232_v43  ;;  %1034 = vmatprep.subr.bf16.mxu1 %v7245_v49  ;;  %v7253_v8 = vld [vmem:[%s9474_s1 + $0x190] ss:$8 sps:$4 sm:$0xff]   ;;  %v7254_v10 = vld [vmem:[%s9474_s1 + $0x184] ss:$8 sps:$4 sm:$0xff]   ;;  %v606_v14 = vrot.slane %v604_v6, 4  ;;  %vm527_vm15 = vcmask 257024  }
  0x41   : > { %v7256_v15 = vld [vmem:[%s9474_s1 + $0x180] ss:$8 sps:$4 sm:$0xff]   ;;  %vm535_vm0 = vcmask 1048452   ;;  %v7260_v56 = vld [vmem:[%s9476_s3 + $0xb8] sm:$0xff]   ;;  %v7261_v57 = vld [vmem:[%s9476_s3 + $0x70] sm:$0xff]  }
  0x42   : > { %426 = vrot.lane.b32.xlu1 %v425_v21, %s7777_s20  ;;  %522 = vrot.lane.b32.xlu0 %v520_v19, %s7778_s23  ;;  %v628_v11 = vld [vmem:[#allocation6 + $0x18] sm:$0xff]  ;;  %v7266_v62 = vld [vmem:[%s9476_s3 + $0xe8] sm:$0xff]   ;;  %v7270_v2 = vld [vmem:[%s9476_s3 + $0xe0] sm:$0xff]  }
  0x43   : > { %1004 = vmatpush2.bf16.msra.mxu0 %v6300_v55  ;;  %1035 = vmatpush1.bf16.msra.mxu1 %v7247_v54  ;;  %v632_v12 = vld [vmem:[#allocation6 + $0xa8] sm:$0xff]  ;;  %1136 = vst [vmem:[#allocation6 + $0x18] sm:$0xf] %v1132_v5  ;;  %v7258_v54 = vld [vmem:[%s9476_s3 + $0xf8] sm:$0xff]   ;;  %v1127_v5 = vld [vmem:[#allocation3 + $0x30] sm:$0x1e] }
  0x44   : > { %1005 = vmatprep.subr.bf16.mxu0 %v7237_v53  ;;  %1046 = vmatprep.subr.bf16.mxu1 %v7248_v60  ;;  %v636_v13 = vpack.c.bf16 %v632_v12, %v628_v11  ;;  %v7257_v53 = vld [vmem:[%s9476_s3 + $0x78] sm:$0xff]   ;;  %v7264_v60 = vld [vmem:[%s9476_s3 + $0xb0] sm:$0xff]   ;;  %v7267_v63 = vld [vmem:[%s9476_s3 + $0x28] sm:$0xff]  }
  0x45   : > { %v7259_v55 = vld [vmem:[%s9476_s3 + $0x38] sm:$0xff]   ;;  %v1099_v12 = vld [vmem:[#allocation3 + $0x30] sm:$0xf] }
  0x46   : > { %532 = vrot.lane.b32.xlu1 %v531_v31, %s7778_s23  ;;  %541 = vrot.lane.b32.xlu0 %v539_v28, %s7778_s23  ;;  %v7273_v6 = vld [vmem:[%s9476_s3 + $0x58] sm:$0xff]  }
  0x47   : > { %1006 = vmatpush2.bf16.msra.mxu0 %v6298_v3  ;;  %1047 = vmatpush2.bf16.msra.mxu1 %v7250_v1  ;;  %v7269_v1 = vld [vmem:[%s9476_s3 + $0x60] sm:$0xff]   ;;  %v7276_v11 = vld [vmem:[%s9476_s3 + $0x98] sm:$0xff]  }
  0x48   : > { %1007 = vmatprep.subr.bf16.mxu0 %v7242_v0  ;;  %1048 = vmatprep.subr.bf16.mxu1 %v7251_v4  ;;  %v7268_v0 = vld [vmem:[%s9476_s3 + $0xa8] sm:$0xff]   ;;  %v7271_v3 = vld [vmem:[%s9476_s3 + $0x20] sm:$0xff]  }
  0x49   : > { %6334 = vmatprep.mubr.msk.bf16.mxu1 %vm973_vm3, %v636_v13  ;;  %vm537_vm3 = vcmask 261124   ;;  %v7272_v4 = vld [vmem:[%s9476_s3 + $0xa0] sm:$0xff]  }
  0x4a   : > { %549 = vrot.lane.b32.xlu1 %v548_v37, %s7778_s23  ;;  %556 = vrot.lane.b32.xlu0 %v554_v38, %s7779_s26 }
  0x4b   : > { %1008 = vmatpush2.bf16.msra.mxu0 %v6296_v9  ;;  %1049 = vmatpush2.bf16.msra.mxu1 %v7253_v8  ;;  %v1131_v8 = vrot.slane %v1127_v5, 1  ;;  %v1167_v9 = vld [vmem:[#allocation3 + $0x30] sm:$0x3c] }
  0x4c   : > { %1050 = vmatprep.subr.bf16.mxu1 %v7254_v10  ;;  %6798 = vmatprep.subr.bf16.mxu0 %v7258_v54  ;;  %v7275_v10 = vld [vmem:[%s9476_s3 + $0x18] sm:$0xff]   ;;  %v1171_v13 = vrot.slane %v1167_v9, 2 }
  0x4e   : > { %564 = vrot.lane.b32.xlu1 %v563_v47, %s7779_s26  ;;  %571 = vrot.lane.b32.xlu0 %v569_v48, %s7779_s26  ;;  %1175 = vst [vmem:[#allocation6 + $0x20] sm:$0xf] %v1171_v13 }
  0x4f   : > { %1051 = vmatpush2.bf16.msra.mxu1 %v7256_v15  ;;  %v1100_v15 = vld [vmem:[#allocation3] sm:$0xf] }
  0x50   : > { %6776 = vmatprep.subr.bf16.mxu1 %v7257_v53 }
  0x52   : > { %579 = vrot.lane.b32.xlu1 %v578_v58, %s7779_s26  ;;  %585 = vrot.lane.b32.xlu0 %v583_v59, %s7780_s12  ;;  %v7262_v58 = vld [vmem:[%s9476_s3 + $0xf0] sm:$0xff]  }
  0x53   : > { %v7263_v59 = vld [vmem:[%s9476_s3 + $0x30] sm:$0xff]  }
  0x56   : > { %593 = vrot.lane.b32.xlu1 %v592_v61, %s7780_s12  ;;  %600 = vrot.lane.b32.xlu0 %v598_v7, %s7780_s12  ;;  %v7265_v61 = vld [vmem:[%s9476_s3 + $0x68] sm:$0xff]   ;;  %v7274_v7 = vld [vmem:[%s9476_s3 + $0xd8] sm:$0xff]  }
  0x5a   : > { %607 = vrot.lane.b32.xlu1 %v606_v14, %s7780_s12  ;;  %v1168_v14 = vld [vmem:[#allocation3] sm:$0x3c] }
  0x88   : > { %v433_v16 = vpop.permute.xlu0 %432 }
  0x89   : > { %438 = vst.msk [vmem:[#allocation6 + $0x8] sm:$0xf] %vm437_vm4, %v433_v16 }
  0x98   : > { %v452_v17 = vpop.permute.xlu1 %451  ;;  %v467_v18 = vpop.permute.xlu0 %466 }
  0x99   : > { %455 = vst.msk [vmem:[#allocation6 + $0x98] sm:$0xf] %vm437_vm4, %v452_v17  ;;  %vm559_vm4 = vcmask 650496  }
  0x9a   : > { %470 = vst.msk [vmem:[#allocation6 + $0x8] sm:$0xf] %vm469_vm5, %v467_v18  ;;  %v7278_v18 = vld [vmem:[%s9476_s3 + $0xd0] sm:$0xff]  }
  0x9c   : > { %v460_v19 = vpop.permute.xlu1 %459  ;;  %v482_v20 = vpop.permute.xlu0 %481 }
  0x9d   : > { %463 = vst.msk [vmem:[#allocation6 + $0x98] sm:$0xf0] %vm447_vm6, %v460_v19 }
  0x9e   : > { %484 = vst.msk [vmem:[#allocation6 + $0x98] sm:$0xf] %vm469_vm5, %v482_v20  ;;  %vm567_vm5 = vcmask 654596   ;;  %v7280_v20 = vld [vmem:[%s9476_s3 + $0x90] sm:$0xff]  }
  0xa0   : > { %v475_v21 = vpop.permute.xlu1 %474  ;;  %v495_v22 = vpop.permute.xlu0 %494 }
  0xa1   : > { %498 = vst.msk [vmem:[#allocation6 + $0x8] sm:$0xf] %vm497_vm7, %v495_v22  ;;  %v7281_v22 = vld [vmem:[%s9476_s3 + $0x48] sm:$0xff]  }
  0xa4   : > { %v489_v23 = vpop.permute.xlu1 %488  ;;  %v443_v24 = vpop.permute.xlu0 %442 }
  0xa5   : > { %491 = vst.msk [vmem:[#allocation6 + $0x98] sm:$0xf0] %vm477_vm8, %v489_v23  ;;  %v7282_v23 = vld [vmem:[%s9476_s3 + $0xc8] sm:$0xff]  }
  0xa6   : > { %448 = vst.msk [vmem:[#allocation6 + $0x8] sm:$0xf0] %vm447_vm6, %v443_v24  ;;  %vm588_vm6 = vcmask 1044096  }
  0xa7   : > { %478 = vst.msk [vmem:[#allocation6 + $0x8] sm:$0xf0] %vm477_vm8, %v475_v21  ;;  %v1334_v21 = vld [vmem:[#allocation3 + $0x10] sm:$0xf] }
  0xa8   : > { %v503_v25 = vpop.permute.xlu1 %502  ;;  %v510_v26 = vpop.permute.xlu0 %509 }
  0xa9   : > { %506 = vst.msk [vmem:[#allocation6 + $0x8] sm:$0xf0] %vm505_vm9, %v503_v25  ;;  %v1338_v25 = vrot.slane %v1334_v21, 4 }
  0xaa   : > { %512 = vst.msk [vmem:[#allocation6 + $0x98] sm:$0xf] %vm497_vm7, %v510_v26  ;;  %vm596_vm7 = vcmask 1048196   ;;  %v7284_v26 = vld [vmem:[%s9476_s3 + $0x88] sm:$0xff]  }
  0xab   : > { %1342 = vst [vmem:[#allocation6 + $0xf0] sm:$0xf0] %v1338_v25 }
  0xac   : > { %v517_v27 = vpop.permute.xlu1 %516  ;;  %v405_v28 = vpop.permute.xlu0 %404 }
  0xad   : > { %519 = vst.msk [vmem:[#allocation6 + $0x98] sm:$0xf0] %vm505_vm9, %v517_v27  ;;  %v7285_v27 = vld [vmem:[%s9476_s3 + $0x40] sm:$0xff]  }
  0xae   : > { %408 = vst.msk [vmem:[#allocation6] sm:$0xf] %vm407_vm10, %v405_v28  ;;  %v7286_v28 = vld [vmem:[%s9476_s3 + $0xc0] sm:$0xff]  }
  0xaf   : > { %436 = vst.msk [vmem:[#allocation6] sm:$0xf] %vm435_vm11, %v433_v16  ;;  %v1172_v16 = vrot.slane %v1168_v14, 2 }
  0xb0   : > { %v420_v29 = vpop.permute.xlu0 %419  ;;  %v413_v30 = vpop.permute.xlu1 %412 }
  0xb1   : > { %422 = vst.msk [vmem:[#allocation6 + $0x90] sm:$0xf] %vm407_vm10, %v420_v29  ;;  %1176 = vst [vmem:[#allocation6 + $0x28] sm:$0xf] %v1172_v16  ;;  %v7287_v29 = vld [vmem:[%s9476_s3] sm:$0xff]  }
  0xb2   : > { %416 = vst.msk [vmem:[#allocation6] sm:$0xf0] %vm415_vm12, %v413_v30  ;;  %v1335_v30 = vld [vmem:[#allocation3 + $0x40] sm:$0xf] }
  0xb3   : > { %454 = vst.msk [vmem:[#allocation6 + $0x90] sm:$0xf] %vm435_vm11, %v452_v17  ;;  %v7277_v17 = vld [vmem:[%s9476_s3 + $0x50] sm:$0xff]  }
  0xb4   : > { %446 = vst.msk [vmem:[#allocation6] sm:$0xf0] %vm445_vm13, %v443_v24  ;;  %v427_v31 = vpop.permute.xlu1 %426  ;;  %v523_v32 = vpop.permute.xlu0 %522  ;;  %v7283_v24 = vld [vmem:[%s9476_s3 + $0x8] sm:$0xff]  }
  0xb5   : > { %429 = vst.msk [vmem:[#allocation6 + $0x90] sm:$0xf0] %vm415_vm12, %v427_v31  ;;  %v7288_v31 = vld [vmem:[%s9476_s3 + $0x80] sm:$0xff]  }
  0xb6   : > { %526 = vst.msk [vmem:[#allocation6 + $0x8] sm:$0xf] %vm525_vm14, %v523_v32 }
  0xb7   : > { %528 = vst.msk [vmem:[#allocation6 + $0x10] sm:$0xf] %vm527_vm15, %v523_v32  ;;  %v1339_v32 = vrot.slane %v1335_v30, 4 }
  0xb8   : > { %462 = vst.msk [vmem:[#allocation6 + $0x90] sm:$0xf0] %vm445_vm13, %v460_v19  ;;  %v533_v33 = vpop.permute.xlu1 %532  ;;  %v542_v34 = vpop.permute.xlu0 %541  ;;  %v7279_v19 = vld [vmem:[%s9476_s3 + $0x10] sm:$0xff]  }
  0xb9   : > { %536 = vst.msk [vmem:[#allocation6 + $0x8] sm:$0xf0] %vm535_vm0, %v533_v33  ;;  %1343 = vst [vmem:[#allocation6 + $0xf8] sm:$0xf0] %v1339_v32 }
  0xba   : > { %538 = vst.msk [vmem:[#allocation6 + $0x10] sm:$0xf0] %vm537_vm3, %v533_v33  ;;  %v1375_v33 = vld [vmem:[#allocation3 + $0x40] sm:$0x1e] }
  0xbb   : > { %544 = vst.msk [vmem:[#allocation6 + $0x98] sm:$0xf] %vm525_vm14, %v542_v34  ;;  %v625_v41 = vld [vmem:[#allocation6] sm:$0xff] }
  0xbc   : > { %545 = vst.msk [vmem:[#allocation6 + $0xa0] sm:$0xf] %vm527_vm15, %v542_v34  ;;  %v550_v35 = vpop.permute.xlu1 %549  ;;  %v557_v36 = vpop.permute.xlu0 %556  ;;  %1101 = vst [vmem:[#allocation6] sm:$0xf] %v1099_v12  ;;  %v1374_v34 = vld [vmem:[#allocation3 + $0x10] sm:$0x1e] }
  0xbd   : > { %552 = vst.msk [vmem:[#allocation6 + $0x98] sm:$0xf0] %vm535_vm0, %v550_v35 }
  0xbe   : > { %553 = vst.msk [vmem:[#allocation6 + $0xa0] sm:$0xf0] %vm537_vm3, %v550_v35  ;;  %v7289_v35 = vld [vmem:[%s9476_s3 + $0x178] sm:$0xff]  }
  0xbf   : > { %560 = vst.msk [vmem:[#allocation6 + $0x10] sm:$0xf] %vm559_vm4, %v557_v36  ;;  %v629_v39 = vld [vmem:[#allocation6 + $0x90] sm:$0xff]  ;;  %v7290_v36 = vld [vmem:[%s9476_s3 + $0x1f8] sm:$0xff]  }
  0xc0   : > { %v565_v37 = vpop.permute.xlu1 %564  ;;  %v572_v38 = vpop.permute.xlu0 %571  ;;  %v626_v40 = vld [vmem:[#allocation6 + $0x8] sm:$0xff]  ;;  %v633_v46 = vpack.c.bf16 %v629_v39, %v625_v41  ;;  %v1415_v39 = vld [vmem:[#allocation3 + $0x40] sm:$0x3c] }
  0xc1   : > { %568 = vst.msk [vmem:[#allocation6 + $0x10] sm:$0xf0] %vm567_vm5, %v565_v37  ;;  %1102 = vst [vmem:[#allocation6 + $0x8] sm:$0xf] %v1100_v15  ;;  %v1379_v37 = vrot.slane %v1375_v33, 5  ;;  %v1419_v41 = vrot.slane %v1415_v39, 6 }
  0xc2   : > { %574 = vst.msk [vmem:[#allocation6 + $0xa0] sm:$0xf] %vm559_vm4, %v572_v38  ;;  %v1378_v38 = vrot.slane %v1374_v34, 5 }
  0xc3   : > { %1383 = vst [vmem:[#allocation6 + $0x108] sm:$0xf0] %v1379_v37  ;;  %1423 = vst [vmem:[#allocation6 + $0x118] sm:$0xf0] %v1419_v41 }
  0xc4   : > { %v580_v42 = vpop.permute.xlu1 %579  ;;  %v630_v43 = vld [vmem:[#allocation6 + $0x98] sm:$0xff]  ;;  %v586_v44 = vpop.permute.xlu0 %585  ;;  %1382 = vst [vmem:[#allocation6 + $0x100] sm:$0xf0] %v1378_v38 }
  0xc5   : > { %582 = vst.msk [vmem:[#allocation6 + $0xa0] sm:$0xf0] %vm567_vm5, %v580_v42  ;;  %v634_v45 = vpack.c.bf16 %v630_v43, %v626_v40  ;;  %v1414_v40 = vld [vmem:[#allocation3 + $0x10] sm:$0x3c]  ;;  %v693_v43 = vlaneseq }
  0xc6   : > { %589 = vst.msk [vmem:[#allocation6 + $0x10] sm:$0xf] %vm588_vm6, %v586_v44  ;;  %v1418_v42 = vrot.slane %v1414_v40, 6 }
  0xc7   : > { %1009 = vmatprep.mubr.bf16.mxu0 %v634_v45  ;;  %v8207_v44 = vshrl.u32 %v693_v43, 7  ;;  %v3016_v43 = vld [vmem:[#allocation4] sm:$0xf] }
  0xc8   : > { %v594_v47 = vpop.permute.xlu1 %593  ;;  %1010 = vmatmul.mubr.bf16.vlgmr.msra.gmra.mxu0 %v633_v46  ;;  %v601_v48 = vpop.permute.xlu0 %600  ;;  %1422 = vst [vmem:[#allocation6 + $0x110] sm:$0xf0] %v1418_v42 }
  0xc9   : > { %597 = vst.msk [vmem:[#allocation6 + $0x10] sm:$0xf0] %vm596_vm7, %v594_v47  ;;  %6799 = vmatpush3.bf16.msra.mxu0 %v7260_v56  ;;  %v695_v46 = vsub.s32 0, %v8207_v44  ;;  %v691_v47 = vld [vmem:[%s9475_s2] sm:$0x3] }
  0xca   : > { %603 = vst.msk [vmem:[#allocation6 + $0xa0] sm:$0xf] %vm588_vm6, %v601_v48  ;;  %6800 = vmatprep.subr.bf16.mxu0 %v7262_v58  ;;  %v699_v48 = vsub.s32 1, %v8207_v44 }
  0xcc   : > { %v608_v49 = vpop.permute.xlu1 %607 }
  0xcd   : > { %610 = vst.msk [vmem:[#allocation6 + $0xa0] sm:$0xf0] %vm596_vm7, %v608_v49  ;;  %6801 = vmatpush3.bf16.msra.mxu0 %v7264_v60 }
  0xce   : > { %6802 = vmatprep.subr.bf16.mxu0 %v7266_v62 }
  0xd0   : > { %v627_v50 = vld [vmem:[#allocation6 + $0x10] sm:$0xff] }
  0xd1   : > { %6803 = vmatpush3.bf16.msra.mxu0 %v7268_v0  ;;  %1135 = vst [vmem:[#allocation6 + $0x10] sm:$0xf] %v1131_v8 }
  0xd2   : > { %6804 = vmatprep.subr.bf16.mxu0 %v7270_v2 }
  0xd4   : > { %v631_v51 = vld [vmem:[#allocation6 + $0xa0] sm:$0xff] }
  0xd5   : > { %v635_v52 = vpack.c.bf16 %v631_v51, %v627_v50  ;;  %6805 = vmatpush3.bf16.msra.mxu0 %v7272_v4  ;;  %v696_v50 = vrot.slane %v691_v47, %v695_v46  ;;  %v700_v51 = vrot.slane %v691_v47, %v699_v48 }
  0xd6   : > { %6806 = vmatprep.subr.bf16.mxu0 %v7274_v7 }
  0xd7   : > { %1053 = vmatmul.mubr.bf16.vlgmr.msra.gmra.mxu1 %v635_v52 }
  0xd8   : > { %6777 = vmatpush3.bf16.msra.mxu1 %v7259_v55 }
  0xd9   : > { %6778 = vmatprep.subr.bf16.mxu1 %v7261_v57  ;;  %6807 = vmatpush3.bf16.msra.mxu0 %v7276_v11 }
  0xda   : > { %6808 = vmatprep.subr.bf16.mxu0 %v7278_v18 }
  0xdc   : > { %6779 = vmatpush3.bf16.msra.mxu1 %v7263_v59 }
  0xdd   : > { %6780 = vmatprep.subr.bf16.mxu1 %v7265_v61  ;;  %6809 = vmatpush3.bf16.msra.mxu0 %v7280_v20 }
  0xde   : > { %6810 = vmatprep.subr.bf16.mxu0 %v7282_v23 }
  0xe0   : > { %6781 = vmatpush3.bf16.msra.mxu1 %v7267_v63 }
  0xe1   : > { %6782 = vmatprep.subr.bf16.mxu1 %v7269_v1  ;;  %6811 = vmatpush3.bf16.msra.mxu0 %v7284_v26 }
  0xe2   : > { %6812 = vmatprep.subr.bf16.mxu0 %v7286_v28 }
  0xe4   : > { %6783 = vmatpush3.bf16.msra.mxu1 %v7271_v3 }
  0xe5   : > { %6784 = vmatprep.subr.bf16.mxu1 %v7273_v6  ;;  %6813 = vmatpush3.bf16.msra.mxu0 %v7288_v31 }
  0xe6   : > { %6842 = vmatprep.subr.bf16.mxu0 %v7290_v36 }
  0xe8   : > { %6785 = vmatpush3.bf16.msra.mxu1 %v7275_v10 }
  0xe9   : > { %6786 = vmatprep.subr.bf16.mxu1 %v7277_v17 }
  0xec   : > { %6787 = vmatpush3.bf16.msra.mxu1 %v7279_v19 }
  0xed   : > { %6788 = vmatprep.subr.bf16.mxu1 %v7281_v22 }
  0xf0   : > { %6789 = vmatpush3.bf16.msra.mxu1 %v7283_v24 }
  0xf1   : > { %6790 = vmatprep.subr.bf16.mxu1 %v7285_v27 }
  0xf4   : > { %6791 = vmatpush3.bf16.msra.mxu1 %v7287_v29 }
  0xf5   : > { %6820 = vmatprep.subr.bf16.mxu1 %v7289_v35 }
 0x188   : > { %v1011_v45 = vpop.f32.mrf.mxu0 }
 0x189   : > { %v1012_v53 = vadd.f32 %v1011_v45, %v696_v50 }
 0x18a   : > { %v1013_v49 = vpop.f32.mrf.mxu0 }
 0x18b   : > { %v1014_v55 = vadd.f32 %v1013_v49, %v700_v51 }
 0x18c   : > { %v1015_v52 = vpop.f32.mrf.mxu0 }
 0x18d   : > { %v1016_v59 = vadd.f32 %v1015_v52, %v696_v50 }
 0x18e   : > { %v1017_v56 = vpop.f32.mrf.mxu0 }
 0x18f   : > { %v1018_v62 = vadd.f32 %v1017_v56, %v700_v51 }
 0x197   : > { %v1054_v54 = vpop.f32.mrf.mxu1 }
 0x198   : > { %v1055_v57 = vadd.f32 %v1054_v54, %v1012_v53 }
 0x199   : > { %v1056_v58 = vpop.f32.mrf.mxu1 }
 0x19a   : > { %v1063_v60 = vmax.f32 %v1055_v57, 0.0  ;;  %v1057_v61 = vadd.f32 %v1056_v58, %v1014_v55  ;;  %v3044_v58 = vld [vmem:[#allocation4 + $0x2] sm:$0xf] }
 0x19b   : > { %v1058_v63 = vpop.f32.mrf.mxu1 }
 0x19c   : > { %v1069_v0 = vrot.slane %v1063_v60, 7  ;;  %v1076_v1 = vrot.slane %v1063_v60, 3  ;;  %v1064_v2 = vmax.f32 %v1057_v61, 0.0  ;;  %v1059_v3 = vadd.f32 %v1058_v63, %v1016_v59 }
 0x19d   : > { %v1060_v4 = vpop.f32.mrf.mxu1 }
 0x19e   : > { %1074 = vst [vmem:[#allocation3 + $0x58] sm:$0x1e] %v1069_v0  ;;  %1081 = vst [vmem:[#allocation3 + $0x50] sm:$0x1e] %v1076_v1  ;;  %v1070_v5 = vrot.slane %v1064_v2, 7  ;;  %v1077_v6 = vrot.slane %v1064_v2, 3  ;;  %v1061_v8 = vadd.f32 %v1060_v4, %v1018_v62 }
 0x19f   : > { %v1065_v7 = vmax.f32 %v1059_v3, 0.0 }
 0x1a0   : > { %1075 = vst [vmem:[#allocation3 + $0x18] sm:$0x1e] %v1070_v5  ;;  %1082 = vst [vmem:[#allocation3 + $0x20] sm:$0x1e] %v1077_v6  ;;  %v1066_v11 = vmax.f32 %v1061_v8, 0.0 }
 0x1a1   : > { %v1085_v9 = vrot.slane %v1065_v7, 7  ;;  %v1092_v10 = vrot.slane %v1065_v7, 3  ;;  %v3030_v7 = vld [vmem:[#allocation4 + $0x1] sm:$0xf] }
 0x1a2   : > { %v1086_v12 = vrot.slane %v1066_v11, 7  ;;  %v1093_v13 = vrot.slane %v1066_v11, 3 }
 0x1a3   : > { %1090 = vst [vmem:[#allocation3 + $0x8] sm:$0x1e] %v1085_v9  ;;  %1097 = vst [vmem:[#allocation3 + $0x28] sm:$0x1e] %v1092_v10 }
 0x1a4   : > { %1091 = vst [vmem:[#allocation3 + $0x38] sm:$0x1e] %v1086_v12  ;;  %1098 = vst [vmem:[#allocation3 + $0x48] sm:$0x1e] %v1093_v13 }
 0x1a5   : > { %v1103_v14 = vld [vmem:[#allocation3 + $0x58] sm:$0xf]  ;;  %v1113_v15 = vld [vmem:[#allocation3 + $0x50] sm:$0xf] }
 0x1a6   : > { %v1137_v16 = vld [vmem:[#allocation3 + $0x58] sm:$0x1e]  ;;  %v1107_v17 = vrot.slane %v1103_v14, 4  ;;  %1115 = vst [vmem:[#allocation6 + $0x90] sm:$0xf] %v1113_v15 }
 0x1a7   : > { %v1141_v18 = vrot.slane %v1137_v16, 5  ;;  %v1147_v19 = vld [vmem:[#allocation3 + $0x50] sm:$0x1e]  ;;  %v1177_v20 = vld [vmem:[#allocation3 + $0x58] sm:$0x3c] }
 0x1a8   : > { %v1151_v21 = vrot.slane %v1147_v19, 1  ;;  %v1181_v22 = vrot.slane %v1177_v20, 6  ;;  %v1187_v23 = vld [vmem:[#allocation3 + $0x50] sm:$0x3c]  ;;  %v1207_v24 = vld [vmem:[#allocation3 + $0x58] sm:$0xf] }
 0x1a9   : > { %1111 = vst [vmem:[#allocation6] sm:$0xf0] %v1107_v17  ;;  %1145 = vst [vmem:[#allocation6 + $0x10] sm:$0xf0] %v1141_v18  ;;  %v1191_v25 = vrot.slane %v1187_v23, 2 }
 0x1aa   : > { %1209 = vst [vmem:[#allocation6 + $0x30] sm:$0xf] %v1207_v24  ;;  %v1211_v26 = vld [vmem:[#allocation3 + $0x50] sm:$0xf]  ;;  %v1235_v27 = vld [vmem:[#allocation3 + $0x58] sm:$0x1e] }
 0x1ab   : > { %1155 = vst [vmem:[#allocation6 + $0xa0] sm:$0xf] %v1151_v21  ;;  %1185 = vst [vmem:[#allocation6 + $0x20] sm:$0xf0] %v1181_v22  ;;  %v1215_v28 = vrot.slane %v1211_v26, 4  ;;  %v1239_v29 = vrot.slane %v1235_v27, 1 }
 0x1ac   : > { %v1245_v30 = vld [vmem:[#allocation3 + $0x50] sm:$0x1e]  ;;  %v1275_v31 = vld [vmem:[#allocation3 + $0x58] sm:$0x3c]  ;;  %1195 = vst [vmem:[#allocation6 + $0xb0] sm:$0xf] %v1191_v25 }
 0x1ad   : > { %v1249_v32 = vrot.slane %v1245_v30, 5  ;;  %v1279_v33 = vrot.slane %v1275_v31, 2  ;;  %v1285_v34 = vld [vmem:[#allocation3 + $0x50] sm:$0x3c]  ;;  %1219 = vst [vmem:[#allocation6 + $0x30] sm:$0xf0] %v1215_v28 }
 0x1ae   : > { %v1315_v35 = vld [vmem:[#allocation3 + $0x50] sm:$0xf]  ;;  %1243 = vst [vmem:[#allocation6 + $0x40] sm:$0xf] %v1239_v29  ;;  %v1289_v36 = vrot.slane %v1285_v34, 6 }
 0x1af   : > { %1317 = vst [vmem:[#allocation6 + $0x60] sm:$0xf] %v1315_v35  ;;  %v1344_v37 = vld [vmem:[#allocation3 + $0x50] sm:$0x1e]  ;;  %1253 = vst [vmem:[#allocation6 + $0x40] sm:$0xf0] %v1249_v32 }
 0x1b0   : > { %v1384_v38 = vld [vmem:[#allocation3 + $0x50] sm:$0x3c]  ;;  %1283 = vst [vmem:[#allocation6 + $0x50] sm:$0xf] %v1279_v33  ;;  %v1348_v39 = vrot.slane %v1344_v37, 1  ;;  %v8220_v11 = vld [vmem:[#allocation6 + $0x10] sm:$0xff] }
 0x1b1   : > { %v1388_v40 = vrot.slane %v1384_v38, 2  ;;  %v1104_v41 = vld [vmem:[#allocation3 + $0x18] sm:$0xf]  ;;  %v1114_v42 = vld [vmem:[#allocation3 + $0x20] sm:$0xf]  ;;  %v8218_v62 = vld [vmem:[#allocation6] sm:$0xff] }
 0x1b2   : > { %1293 = vst [vmem:[#allocation6 + $0x50] sm:$0xf0] %v1289_v36  ;;  %v1108_v45 = vrot.slane %v1104_v41, 4  ;;  %1116 = vst [vmem:[#allocation6 + $0x98] sm:$0xf] %v1114_v42 }
 0x1b3   : > { %v1138_v47 = vld [vmem:[#allocation3 + $0x18] sm:$0x1e]  ;;  %v1148_v49 = vld [vmem:[#allocation3 + $0x20] sm:$0x1e]  ;;  %1352 = vst [vmem:[#allocation6 + $0x70] sm:$0xf] %v1348_v39 }
 0x1b4   : > { %1392 = vst [vmem:[#allocation6 + $0x80] sm:$0xf] %v1388_v40  ;;  %v1142_v50 = vrot.slane %v1138_v47, 5  ;;  %v1152_v51 = vrot.slane %v1148_v49, 1  ;;  %v1178_v52 = vld [vmem:[#allocation3 + $0x18] sm:$0x3c] }
 0x1b5   : > { %v1188_v53 = vld [vmem:[#allocation3 + $0x20] sm:$0x3c]  ;;  %1112 = vst [vmem:[#allocation6 + $0x8] sm:$0xf0] %v1108_v45  ;;  %v1182_v54 = vrot.slane %v1178_v52, 6 }
 0x1b6   : > { %v1192_v55 = vrot.slane %v1188_v53, 2  ;;  %v1208_v56 = vld [vmem:[#allocation3 + $0x18] sm:$0xf]  ;;  %v1212_v57 = vld [vmem:[#allocation3 + $0x20] sm:$0xf] }
 0x1b7   : > { %1146 = vst [vmem:[#allocation6 + $0x18] sm:$0xf0] %v1142_v50  ;;  %1156 = vst [vmem:[#allocation6 + $0xa8] sm:$0xf] %v1152_v51  ;;  %v1216_v59 = vrot.slane %v1212_v57, 4 }
 0x1b8   : > { %1210 = vst [vmem:[#allocation6 + $0x38] sm:$0xf] %v1208_v56  ;;  %v1236_v60 = vld [vmem:[#allocation3 + $0x18] sm:$0x1e]  ;;  %v1246_v61 = vld [vmem:[#allocation3 + $0x20] sm:$0x1e] }
 0x1b9   : > { %1186 = vst [vmem:[#allocation6 + $0x28] sm:$0xf0] %v1182_v54  ;;  %1196 = vst [vmem:[#allocation6 + $0xb8] sm:$0xf] %v1192_v55  ;;  %v1240_v63 = vrot.slane %v1236_v60, 1  ;;  %v1250_v0 = vrot.slane %v1246_v61, 5 }
 0x1ba   : > { %v1276_v1 = vld [vmem:[#allocation3 + $0x18] sm:$0x3c]  ;;  %v1286_v2 = vld [vmem:[#allocation3 + $0x20] sm:$0x3c]  ;;  %3017 = vst [vmem:[#allocation6] sm:$0xf] %v3016_v43 }
 0x1bb   : > { %1220 = vst [vmem:[#allocation6 + $0x38] sm:$0xf0] %v1216_v59  ;;  %v1280_v3 = vrot.slane %v1276_v1, 2  ;;  %v1290_v4 = vrot.slane %v1286_v2, 6  ;;  %v1316_v5 = vld [vmem:[#allocation3 + $0x20] sm:$0xf] }
 0x1bc   : > { %v1345_v6 = vld [vmem:[#allocation3 + $0x20] sm:$0x1e]  ;;  %1244 = vst [vmem:[#allocation6 + $0x48] sm:$0xf] %v1240_v63  ;;  %1254 = vst [vmem:[#allocation6 + $0x48] sm:$0xf0] %v1250_v0 }
 0x1bd   : > { %1318 = vst [vmem:[#allocation6 + $0x68] sm:$0xf] %v1316_v5  ;;  %v1349_v8 = vrot.slane %v1345_v6, 1  ;;  %v1385_v9 = vld [vmem:[#allocation3 + $0x20] sm:$0x3c]  ;;  %v8222_v23 = vld [vmem:[#allocation6 + $0x8] sm:$0xff] }
 0x1be   : > { %v1117_v10 = vld [vmem:[#allocation3 + $0x8] sm:$0xf]  ;;  %1284 = vst [vmem:[#allocation6 + $0x58] sm:$0xf] %v1280_v3  ;;  %1294 = vst [vmem:[#allocation6 + $0x58] sm:$0xf0] %v1290_v4 }
 0x1bf   : > { %v1389_v12 = vrot.slane %v1385_v9, 2  ;;  %v1121_v13 = vrot.slane %v1117_v10, 4  ;;  %v1157_v14 = vld [vmem:[#allocation3 + $0x8] sm:$0x1e]  ;;  %3045 = vst [vmem:[#allocation6 + $0x10] sm:$0xf] %v3044_v58 }
 0x1c0   : > { %v1197_v15 = vld [vmem:[#allocation3 + $0x8] sm:$0x3c]  ;;  %1353 = vst [vmem:[#allocation6 + $0x78] sm:$0xf] %v1349_v8  ;;  %v1161_v16 = vrot.slane %v1157_v14, 5 }
 0x1c1   : > { %v1201_v17 = vrot.slane %v1197_v15, 6  ;;  %v1221_v18 = vld [vmem:[#allocation3 + $0x8] sm:$0xf]  ;;  %1393 = vst [vmem:[#allocation6 + $0x88] sm:$0xf] %v1389_v12 }
 0x1c2   : > { %v1255_v19 = vld [vmem:[#allocation3 + $0x8] sm:$0x1e]  ;;  %1125 = vst [vmem:[#allocation6 + $0x90] sm:$0xf0] %v1121_v13  ;;  %1223 = vst [vmem:[#allocation6 + $0xc0] sm:$0xf] %v1221_v18 }
 0x1c3   : > { %v1259_v20 = vrot.slane %v1255_v19, 1  ;;  %v1295_v21 = vld [vmem:[#allocation3 + $0x8] sm:$0x3c]  ;;  %1165 = vst [vmem:[#allocation6 + $0xa0] sm:$0xf0] %v1161_v16 }
 0x1c4   : > { %v1305_v22 = vld [vmem:[#allocation3 + $0x28] sm:$0x3c]  ;;  %1205 = vst [vmem:[#allocation6 + $0xb0] sm:$0xf0] %v1201_v17  ;;  %v1299_v24 = vrot.slane %v1295_v21, 2 }
 0x1c5   : > { %v1309_v25 = vrot.slane %v1305_v22, 6  ;;  %v1319_v26 = vld [vmem:[#allocation3 + $0x8] sm:$0xf]  ;;  %3031 = vst [vmem:[#allocation6 + $0x8] sm:$0xf] %v3030_v7 }
 0x1c6   : > { %v1329_v27 = vld [vmem:[#allocation3 + $0x28] sm:$0xf]  ;;  %1263 = vst [vmem:[#allocation6 + $0xd0] sm:$0xf] %v1259_v20  ;;  %v1323_v28 = vrot.slane %v1319_v26, 4 }
 0x1c7   : > { %1331 = vst [vmem:[#allocation6 + $0xf0] sm:$0xf] %v1329_v27  ;;  %v1354_v29 = vld [vmem:[#allocation3 + $0x8] sm:$0x1e]  ;;  %1303 = vst [vmem:[#allocation6 + $0xe0] sm:$0xf] %v1299_v24 }
 0x1c8   : > { %v1364_v30 = vld [vmem:[#allocation3 + $0x28] sm:$0x1e]  ;;  %1313 = vst [vmem:[#allocation6 + $0xe0] sm:$0xf0] %v1309_v25  ;;  %v1358_v31 = vrot.slane %v1354_v29, 5  ;;  %v7293_v27 = vld [vmem:[%s9476_s3 + $0x170] sm:$0xff]  }
 0x1c9   : > { %v1368_v32 = vrot.slane %v1364_v30, 1  ;;  %v1394_v33 = vld [vmem:[#allocation3 + $0x8] sm:$0x3c]  ;;  %1327 = vst [vmem:[#allocation6 + $0x60] sm:$0xf0] %v1323_v28  ;;  %v1442_v9 = vld [vmem:[#allocation6 + $0x90] sm:$0xff] }
 0x1ca   : > { %v1404_v34 = vld [vmem:[#allocation3 + $0x28] sm:$0x3c]  ;;  %v1398_v35 = vrot.slane %v1394_v33, 6  ;;  %v1118_v37 = vld [vmem:[#allocation3 + $0x38] sm:$0xf]  ;;  %v1444_v10 = vld [vmem:[#allocation6 + $0xa0] sm:$0xff]  ;;  %v1460_v25 = vpack.c.bf16 %v1442_v9, %v8218_v62 }
 0x1cb   : > { %v1408_v36 = vrot.slane %v1404_v34, 2  ;;  %v1158_v38 = vld [vmem:[#allocation3 + $0x38] sm:$0x1e]  ;;  %1362 = vst [vmem:[#allocation6 + $0x70] sm:$0xf0] %v1358_v31  ;;  %v1122_v39 = vrot.slane %v1118_v37, 4  ;;  %v1462_v26 = vpack.c.bf16 %v1444_v10, %v8220_v11 }
 0x1cc   : > { %1372 = vst [vmem:[#allocation6 + $0x100] sm:$0xf] %v1368_v32  ;;  %v1162_v40 = vrot.slane %v1158_v38, 5  ;;  %v1198_v41 = vld [vmem:[#allocation3 + $0x38] sm:$0x3c]  ;;  %v1427_v8 = vld [vmem:[#allocation6 + $0x18] sm:$0xff] }
 0x1cd   : > { %v1222_v42 = vld [vmem:[#allocation3 + $0x38] sm:$0xf]  ;;  %1402 = vst [vmem:[#allocation6 + $0x80] sm:$0xf0] %v1398_v35  ;;  %1412 = vst [vmem:[#allocation6 + $0x110] sm:$0xf] %v1408_v36 }
 0x1ce   : > { %v1202_v43 = vrot.slane %v1198_v41, 6  ;;  %1224 = vst [vmem:[#allocation6 + $0xc8] sm:$0xf] %v1222_v42  ;;  %v1256_v45 = vld [vmem:[#allocation3 + $0x38] sm:$0x1e]  ;;  %v7291_v12 = vld [vmem:[%s9476_s3 + $0x138] sm:$0xff]  }
 0x1cf   : > { %v1266_v47 = vld [vmem:[#allocation3 + $0x48] sm:$0x1e]  ;;  %1126 = vst [vmem:[#allocation6 + $0x98] sm:$0xf0] %v1122_v39  ;;  %1166 = vst [vmem:[#allocation6 + $0xa8] sm:$0xf0] %v1162_v40 }
 0x1d0   : > { %v1260_v49 = vrot.slane %v1256_v45, 1  ;;  %v1270_v50 = vrot.slane %v1266_v47, 5  ;;  %v1296_v51 = vld [vmem:[#allocation3 + $0x38] sm:$0x3c]  ;;  %v1306_v52 = vld [vmem:[#allocation3 + $0x48] sm:$0x3c] }
 0x1d1   : > { %1206 = vst [vmem:[#allocation6 + $0xb8] sm:$0xf0] %v1202_v43  ;;  %v1300_v53 = vrot.slane %v1296_v51, 2  ;;  %v1310_v54 = vrot.slane %v1306_v52, 6  ;;  %v1320_v55 = vld [vmem:[#allocation3 + $0x38] sm:$0xf] }
 0x1d2   : > { %v1330_v56 = vld [vmem:[#allocation3 + $0x48] sm:$0xf]  ;;  %v4533_v57 = vld [vmem:[#allocation5 + $0x10] sm:$0xf]  ;;  %1264 = vst [vmem:[#allocation6 + $0xd8] sm:$0xf] %v1260_v49 }
 0x1d3   : > { %1274 = vst [vmem:[#allocation6 + $0xd8] sm:$0xf0] %v1270_v50  ;;  %v1324_v58 = vrot.slane %v1320_v55, 4  ;;  %1332 = vst [vmem:[#allocation6 + $0xf8] sm:$0xf] %v1330_v56  ;;  %v4537_v14 = vrot.slane %v4533_v57, 4 }
 0x1d4   : > { %v1355_v59 = vld [vmem:[#allocation3 + $0x38] sm:$0x1e]  ;;  %v1365_v60 = vld [vmem:[#allocation3 + $0x48] sm:$0x1e]  ;;  %1304 = vst [vmem:[#allocation6 + $0xe8] sm:$0xf] %v1300_v53 }
 0x1d5   : > { %1314 = vst [vmem:[#allocation6 + $0xe8] sm:$0xf0] %v1310_v54  ;;  %v1359_v61 = vrot.slane %v1355_v59, 5  ;;  %v1369_v63 = vrot.slane %v1365_v60, 1  ;;  %v1395_v0 = vld [vmem:[#allocation3 + $0x38] sm:$0x3c] }
 0x1d6   : > { %v1405_v1 = vld [vmem:[#allocation3 + $0x48] sm:$0x3c]  ;;  %1328 = vst [vmem:[#allocation6 + $0x68] sm:$0xf0] %v1324_v58  ;;  %v1399_v2 = vrot.slane %v1395_v0, 6  ;;  %v1445_v16 = vld [vmem:[#allocation6 + $0xa8] sm:$0xff] }
 0x1d7   : > { %v1409_v3 = vrot.slane %v1405_v1, 2  ;;  %v1226_v4 = vld [vmem:[#allocation3 + $0x48] sm:$0xf]  ;;  %1363 = vst [vmem:[#allocation6 + $0x78] sm:$0xf0] %v1359_v61  ;;  %v1463_v19 = vpack.c.bf16 %v1445_v16, %v1427_v8  ;;  %v1429_v30 = vld [vmem:[#allocation6 + $0x28] sm:$0xff] }
 0x1d8   : > { %1373 = vst [vmem:[#allocation6 + $0x108] sm:$0xf] %v1369_v63  ;;  %v1230_v5 = vrot.slane %v1226_v4, 4  ;;  %v1225_v6 = vld [vmem:[#allocation3 + $0x28] sm:$0xf]  ;;  %v7294_v31 = vld [vmem:[%s9476_s3 + $0x1f0] sm:$0xff]  }
 0x1d9   : > { %v4573_v7 = vld [vmem:[#allocation5 + $0x10] sm:$0x1e]  ;;  %1403 = vst [vmem:[#allocation6 + $0x88] sm:$0xf0] %v1399_v2  ;;  %1413 = vst [vmem:[#allocation6 + $0x118] sm:$0xf] %v1409_v3  ;;  %2710 = vmatprep.mubr.bf16.mxu0 %v1463_v19 }
 0x1da   : > { %v1229_v13 = vrot.slane %v1225_v6, 4  ;;  %v1443_v15 = vld [vmem:[#allocation6 + $0x98] sm:$0xff]  ;;  %1234 = vst [vmem:[#allocation6 + $0xc8] sm:$0xf0] %v1230_v5  ;;  %2711 = vmatmul.mubr.bf16.vlgmr.msra.gmra.mxu0 %v1462_v26  ;;  %v7295_v32 = vld [vmem:[%s9476_s3 + $0x130] sm:$0xff]   ;;  %v7297_v36 = vld [vmem:[%s9476_s3 + $0x168] sm:$0xff]  }
 0x1db   : > { %v1265_v17 = vld [vmem:[#allocation3 + $0x28] sm:$0x1e]  ;;  %v1461_v18 = vpack.c.bf16 %v1443_v15, %v8222_v23  ;;  %v4577_v23 = vrot.slane %v4573_v7, 5  ;;  %v7296_v35 = vld [vmem:[%s9476_s3 + $0x1b0] sm:$0xff]   ;;  %v7298_v40 = vld [vmem:[%s9476_s3 + $0x1e8] sm:$0xff]  }
 0x1dc   : > { %v7292_v20 = vld [vmem:[%s9476_s3 + $0x1b8] sm:$0xff]   ;;  %1233 = vst [vmem:[#allocation6 + $0xc0] sm:$0xf0] %v1229_v13  ;;  %v1269_v24 = vrot.slane %v1265_v17, 5  ;;  %v8255_v41 = vld [vmem:[#allocation6 + $0xf0] sm:$0xff]  ;;  %v8259_v53 = vld [vmem:[#allocation6 + $0x100] sm:$0xff] }
 0x1dd   : > { %v1447_v21 = vld [vmem:[#allocation6 + $0xb8] sm:$0xff]  ;;  %2669 = vmatprep.mubr.bf16.mxu1 %v1461_v18  ;;  %6843 = vmatpush3.bf16.msra.mxu0 %v7292_v20  ;;  %v4613_v50 = vld [vmem:[#allocation5 + $0x10] sm:$0x3c]  ;;  %v7299_v55 = vld [vmem:[%s9476_s3 + $0x128] sm:$0xff]  }
 0x1de   : > { %v3124_v22 = vld [vmem:[#allocation4 + $0x29] sm:$0xf]  ;;  %1273 = vst [vmem:[#allocation6 + $0xd0] sm:$0xf0] %v1269_v24  ;;  %2670 = vmatmul.mubr.bf16.vlgmr.msra.gmra.mxu1 %v1460_v25  ;;  %v1465_v62 = vpack.c.bf16 %v1447_v21, %v1429_v30  ;;  %6844 = vmatprep.subr.bf16.mxu0 %v7294_v31  ;;  %v4617_v54 = vrot.slane %v4613_v50, 6  ;;  %v7300_v56 = vld [vmem:[%s9476_s3 + $0x1a8] sm:$0xff]  }
 0x1df   : > { %v3110_v28 = vld [vmem:[#allocation4 + $0x28] sm:$0xf]  ;;  %v3126_v11 = vrot.slane %v3124_v22, 4  ;;  %6821 = vmatpush3.bf16.msra.mxu1 %v7291_v12  ;;  %v8250_v38 = vld [vmem:[#allocation6 + $0x108] sm:$0xff]  ;;  %v7301_v58 = vld [vmem:[%s9476_s3 + $0x160] sm:$0xff]  }
 0x1e0   : > { %v8236_v29 = vld [vmem:[#allocation6 + $0xf8] sm:$0xff]  ;;  %v3112_v37 = vrot.slane %v3110_v28, 4  ;;  %2751 = vmatprep.mubr.bf16.mxu1 %v1465_v62  ;;  %6822 = vmatprep.subr.bf16.mxu1 %v7293_v27  ;;  %4581 = vst [vmem:[#allocation6 + $0x108] sm:$0xf0] %v4577_v23  ;;  %v7302_v59 = vld [vmem:[%s9476_s3 + $0x1e0] sm:$0xff]   ;;  %v8289_v4 = vld [vmem:[#allocation6 + $0x110] sm:$0xff] }
 0x1e1   : > { %4541 = vst [vmem:[#allocation6 + $0xf8] sm:$0xf0] %v4537_v14  ;;  %v3138_v33 = vld [vmem:[#allocation4 + $0x2a] sm:$0xf]  ;;  %v1449_v45 = vld [vmem:[#allocation6 + $0xc8] sm:$0xff]  ;;  %6845 = vmatpush3.bf16.msra.mxu0 %v7296_v35  ;;  %v7303_v61 = vld [vmem:[%s9476_s3 + $0x120] sm:$0xff]  }
 0x1e2   : > { %v4532_v34 = vld [vmem:[#allocation5 + $0x58] sm:$0xf]  ;;  %v3140_v47 = vrot.slane %v3138_v33, 4  ;;  %3128 = vst [vmem:[#allocation6 + $0xc8] sm:$0xf0] %v3126_v11  ;;  %6846 = vmatprep.subr.bf16.mxu0 %v7298_v40  ;;  %v7304_v63 = vld [vmem:[%s9476_s3 + $0x1a0] sm:$0xff]  }
 0x1e3   : > { %v4536_v39 = vrot.slane %v4532_v34, 4  ;;  %v4572_v42 = vld [vmem:[#allocation5 + $0x58] sm:$0x1e]  ;;  %v8257_v52 = vld [vmem:[#allocation6 + $0xc0] sm:$0xff]  ;;  %6823 = vmatpush3.bf16.msra.mxu1 %v7295_v32  ;;  %v7309_v7 = vld [vmem:[%s9476_s3 + $0x150] sm:$0xff]  }
 0x1e4   : > { %v1431_v43 = vld [vmem:[#allocation6 + $0x38] sm:$0xff]  ;;  %v4576_v49 = vrot.slane %v4572_v42, 5  ;;  %3114 = vst [vmem:[#allocation6 + $0xc0] sm:$0xf0] %v3112_v37  ;;  %6824 = vmatprep.subr.bf16.mxu1 %v7297_v36  ;;  %v7310_v8 = vld [vmem:[%s9476_s3 + $0x1d0] sm:$0xff]   ;;  %v7313_v12 = vld [vmem:[%s9476_s3 + $0x148] sm:$0xff]  }
 0x1e5   : > { %4540 = vst [vmem:[#allocation6 + $0xf0] sm:$0xf0] %v4536_v39  ;;  %v1467_v51 = vpack.c.bf16 %v1449_v45, %v1431_v43  ;;  %v8267_v57 = vld [vmem:[#allocation6 + $0x118] sm:$0xff]  ;;  %v8275_v60 = vld [vmem:[#allocation6 + $0xd0] sm:$0xff]  ;;  %6847 = vmatpush3.bf16.msra.mxu0 %v7300_v56  ;;  %v7314_v13 = vld [vmem:[%s9476_s3 + $0x1c8] sm:$0xff]  }
 0x1e6   : > { %4580 = vst [vmem:[#allocation6 + $0x100] sm:$0xf0] %v4576_v49  ;;  %4621 = vst [vmem:[#allocation6 + $0x118] sm:$0xf0] %v4617_v54  ;;  %v4612_v0 = vld [vmem:[#allocation5 + $0x58] sm:$0x3c]  ;;  %6848 = vmatprep.subr.bf16.mxu0 %v7302_v59 }
 0x1e7   : > { %2792 = vmatprep.mubr.bf16.mxu0 %v1467_v51  ;;  %3142 = vst [vmem:[#allocation6 + $0xd0] sm:$0xf0] %v3140_v47  ;;  %6825 = vmatpush3.bf16.msra.mxu1 %v7299_v55  ;;  %v7305_v1 = vld [vmem:[%s9476_s3 + $0x158] sm:$0xff]   ;;  %v4616_v3 = vrot.slane %v4612_v0, 6  ;;  %v7311_v9 = vld [vmem:[%s9476_s3 + $0x110] sm:$0xff]   ;;  %v7315_v14 = vld [vmem:[%s9476_s3 + $0x108] sm:$0xff]  }
 0x1e8   : > { %6826 = vmatprep.subr.bf16.mxu1 %v7301_v58  ;;  %v7306_v2 = vld [vmem:[%s9476_s3 + $0x1d8] sm:$0xff]   ;;  %v7312_v10 = vld [vmem:[%s9476_s3 + $0x190] sm:$0xff]   ;;  %v7316_v15 = vld [vmem:[%s9476_s3 + $0x188] sm:$0xff]  }
 0x1e9   : > { %4620 = vst [vmem:[#allocation6 + $0x110] sm:$0xf0] %v4616_v3  ;;  %6849 = vmatpush3.bf16.msra.mxu0 %v7304_v63  ;;  %v7307_v5 = vld [vmem:[%s9476_s3 + $0x118] sm:$0xff]   ;;  %v7317_v16 = vld [vmem:[%s9476_s3 + $0x140] sm:$0xff]   ;;  %v1446_v22 = vld [vmem:[#allocation6 + $0xb0] sm:$0xff] }
 0x1ea   : > { %v7308_v6 = vld [vmem:[%s9476_s3 + $0x198] sm:$0xff]   ;;  %6850 = vmatprep.subr.bf16.mxu0 %v7306_v2  ;;  %v7318_v17 = vld [vmem:[%s9476_s3 + $0x1c0] sm:$0xff]   ;;  %v1430_v27 = vld [vmem:[#allocation6 + $0x30] sm:$0xff] }
 0x1eb   : > { %6827 = vmatpush3.bf16.msra.mxu1 %v7303_v61  ;;  %v7319_v18 = vld [vmem:[%s9476_s3 + $0x100] sm:$0xff]   ;;  %v7321_v20 = vld [vmem:[%s9476_s3 + $0x278] sm:$0xff]   ;;  %v1453_v28 = vld [vmem:[#allocation6 + $0xe8] sm:$0xff]  ;;  %v1466_v30 = vpack.c.bf16 %v8257_v52, %v1430_v27 }
 0x1ec   : > { %6828 = vmatprep.subr.bf16.mxu1 %v7305_v1  ;;  %v7320_v19 = vld [vmem:[%s9476_s3 + $0x180] sm:$0xff]   ;;  %v7322_v21 = vld [vmem:[%s9476_s3 + $0x2f8] sm:$0xff]   ;;  %v1433_v31 = vld [vmem:[#allocation6 + $0x48] sm:$0xff] }
 0x1ed   : > { %6851 = vmatpush3.bf16.msra.mxu0 %v7308_v6  ;;  %v7323_v24 = vld [vmem:[%s9476_s3 + $0x238] sm:$0xff]   ;;  %v1428_v26 = vld [vmem:[#allocation6 + $0x20] sm:$0xff]  ;;  %v7325_v33 = vld [vmem:[%s9476_s3 + $0x270] sm:$0xff]  }
 0x1ee   : > { %6852 = vmatprep.subr.bf16.mxu0 %v7310_v8  ;;  %v1451_v25 = vld [vmem:[#allocation6 + $0xd8] sm:$0xff]  ;;  %v1464_v23 = vpack.c.bf16 %v1446_v22, %v1428_v26  ;;  %v7326_v34 = vld [vmem:[%s9476_s3 + $0x2f0] sm:$0xff]   ;;  %v7329_v39 = vld [vmem:[%s9476_s3 + $0x268] sm:$0xff]  }
 0x1ef   : > { %6829 = vmatpush3.bf16.msra.mxu1 %v7307_v5  ;;  %v7324_v62 = vld [vmem:[%s9476_s3 + $0x2b8] sm:$0xff]   ;;  %v1469_v11 = vpack.c.bf16 %v1451_v25, %v1433_v31  ;;  %v7327_v36 = vld [vmem:[%s9476_s3 + $0x230] sm:$0xff]   ;;  %v7330_v40 = vld [vmem:[%s9476_s3 + $0x2e8] sm:$0xff]  }
 0x1f0   : > { %6830 = vmatprep.subr.bf16.mxu1 %v7309_v7  ;;  %v1435_v32 = vld [vmem:[#allocation6 + $0x58] sm:$0xff]  ;;  %v7328_v37 = vld [vmem:[%s9476_s3 + $0x2b0] sm:$0xff]   ;;  %v7331_v42 = vld [vmem:[%s9476_s3 + $0x228] sm:$0xff]  }
 0x1f1   : > { %6853 = vmatpush3.bf16.msra.mxu0 %v7312_v10  ;;  %v1471_v35 = vpack.c.bf16 %v1453_v28, %v1435_v32  ;;  %v7332_v43 = vld [vmem:[%s9476_s3 + $0x2a8] sm:$0xff]   ;;  %v7333_v45 = vld [vmem:[%s9476_s3 + $0x260] sm:$0xff]   ;;  %v7337_v51 = vld [vmem:[%s9476_s3 + $0x258] sm:$0xff]  }
 0x1f2   : > { %6854 = vmatprep.subr.bf16.mxu0 %v7314_v13  ;;  %v7334_v47 = vld [vmem:[%s9476_s3 + $0x2e0] sm:$0xff]   ;;  %v7338_v52 = vld [vmem:[%s9476_s3 + $0x2d8] sm:$0xff]   ;;  %v7341_v56 = vld [vmem:[%s9476_s3 + $0x250] sm:$0xff]  }
 0x1f3   : > { %6831 = vmatpush3.bf16.msra.mxu1 %v7311_v9  ;;  %v7335_v49 = vld [vmem:[%s9476_s3 + $0x220] sm:$0xff]   ;;  %v7339_v54 = vld [vmem:[%s9476_s3 + $0x218] sm:$0xff]   ;;  %v7342_v58 = vld [vmem:[%s9476_s3 + $0x2d0] sm:$0xff]  }
 0x1f4   : > { %6832 = vmatprep.subr.bf16.mxu1 %v7313_v12  ;;  %v7336_v50 = vld [vmem:[%s9476_s3 + $0x2a0] sm:$0xff]   ;;  %v7340_v55 = vld [vmem:[%s9476_s3 + $0x298] sm:$0xff]   ;;  %v7343_v59 = vld [vmem:[%s9476_s3 + $0x210] sm:$0xff]  }
 0x1f5   : > { %6855 = vmatpush3.bf16.msra.mxu0 %v7316_v15  ;;  %v7344_v61 = vld [vmem:[%s9476_s3 + $0x290] sm:$0xff]   ;;  %v7345_v63 = vld [vmem:[%s9476_s3 + $0x248] sm:$0xff]   ;;  %v7349_v3 = vld [vmem:[%s9476_s3 + $0x240] sm:$0xff]  }
 0x1f6   : > { %6856 = vmatprep.subr.bf16.mxu0 %v7318_v17  ;;  %v7346_v0 = vld [vmem:[%s9476_s3 + $0x2c8] sm:$0xff]   ;;  %v7350_v5 = vld [vmem:[%s9476_s3 + $0x2c0] sm:$0xff]   ;;  %v7353_v8 = vld [vmem:[%s9476_s3 + $0x378] sm:$0xff]  }
 0x1f7   : > { %6833 = vmatpush3.bf16.msra.mxu1 %v7315_v14  ;;  %v7347_v1 = vld [vmem:[%s9476_s3 + $0x208] sm:$0xff]   ;;  %v7351_v6 = vld [vmem:[%s9476_s3 + $0x200] sm:$0xff]   ;;  %v7354_v9 = vld [vmem:[%s9476_s3 + $0x3f8] sm:$0xff]  }
 0x1f8   : > { %6834 = vmatprep.subr.bf16.mxu1 %v7317_v16  ;;  %v7348_v2 = vld [vmem:[%s9476_s3 + $0x288] sm:$0xff]   ;;  %v7352_v7 = vld [vmem:[%s9476_s3 + $0x280] sm:$0xff]   ;;  %v7355_v13 = vld [vmem:[%s9476_s3 + $0x338] sm:$0xff]  }
 0x1f9   : > { %6857 = vmatpush3.bf16.msra.mxu0 %v7320_v19  ;;  %v1452_v10 = vld [vmem:[#allocation6 + $0xe0] sm:$0xff]  ;;  %v1437_v14 = vld [vmem:[#allocation6 + $0x68] sm:$0xff]  ;;  %v1434_v16 = vld [vmem:[#allocation6 + $0x50] sm:$0xff] }
 0x1fa   : > { %6886 = vmatprep.subr.bf16.mxu0 %v7322_v21  ;;  %v1432_v12 = vld [vmem:[#allocation6 + $0x40] sm:$0xff]  ;;  %v7356_v17 = vld [vmem:[%s9476_s3 + $0x3b8] sm:$0xff]   ;;  %v1470_v19 = vpack.c.bf16 %v1452_v10, %v1434_v16  ;;  %v1473_v21 = vpack.c.bf16 %v8236_v29, %v1437_v14  ;;  %v7360_v25 = vld [vmem:[%s9476_s3 + $0x3b0] sm:$0xff]  }
 0x1fb   : > { %6835 = vmatpush3.bf16.msra.mxu1 %v7319_v18  ;;  %v1468_v15 = vpack.c.bf16 %v8275_v60, %v1432_v12  ;;  %v1439_v18 = vld [vmem:[#allocation6 + $0x78] sm:$0xff]  ;;  %v7358_v60 = vld [vmem:[%s9476_s3 + $0x3f0] sm:$0xff]   ;;  %v7361_v29 = vld [vmem:[%s9476_s3 + $0x368] sm:$0xff]  }
 0x1fc   : > { %6864 = vmatprep.subr.bf16.mxu1 %v7321_v20  ;;  %2793 = vmatmul.mubr.bf16.vlgmr.msra.gmra.mxu0 %v1466_v30  ;;  %v7357_v20 = vld [vmem:[%s9476_s3 + $0x370] sm:$0xff]   ;;  %v1475_v22 = vpack.c.bf16 %v8250_v38, %v1439_v18  ;;  %v7362_v38 = vld [vmem:[%s9476_s3 + $0x3e8] sm:$0xff]   ;;  %v7365_v28 = vld [vmem:[%s9476_s3 + $0x360] sm:$0xff]  }
 0x1fd   : > { %6887 = vmatpush3.bf16.msra.mxu0 %v7324_v62  ;;  %2874 = vmatprep.mubr.bf16.mxu0 %v1471_v35  ;;  %v7363_v26 = vld [vmem:[%s9476_s3 + $0x328] sm:$0xff]   ;;  %v7367_v30 = vld [vmem:[%s9476_s3 + $0x320] sm:$0xff]   ;;  %v7369_v62 = vld [vmem:[%s9476_s3 + $0x358] sm:$0xff]  }
 0x1fe   : > { %2752 = vmatmul.mubr.bf16.vlgmr.msra.gmra.mxu1 %v1464_v23  ;;  %6888 = vmatprep.subr.bf16.mxu0 %v7326_v34  ;;  %v7364_v27 = vld [vmem:[%s9476_s3 + $0x3a8] sm:$0xff]   ;;  %v7366_v23 = vld [vmem:[%s9476_s3 + $0x3e0] sm:$0xff]   ;;  %v7371_v32 = vld [vmem:[%s9476_s3 + $0x318] sm:$0xff]  }
 0x1ff   : > { %6865 = vmatpush3.bf16.msra.mxu1 %v7323_v24  ;;  %2833 = vmatprep.mubr.bf16.mxu1 %v1469_v11  ;;  %v7359_v24 = vld [vmem:[%s9476_s3 + $0x330] sm:$0xff]   ;;  %v7368_v31 = vld [vmem:[%s9476_s3 + $0x3a0] sm:$0xff]   ;;  %v7370_v11 = vld [vmem:[%s9476_s3 + $0x3d8] sm:$0xff]  }
 0x200   : > { %6866 = vmatprep.subr.bf16.mxu1 %v7325_v33  ;;  %v7372_v33 = vld [vmem:[%s9476_s3 + $0x398] sm:$0xff]   ;;  %v7373_v34 = vld [vmem:[%s9476_s3 + $0x350] sm:$0xff]   ;;  %v7400_v10 = vld [vmem:[%s9476_s3 + $0x400] sm:$0xff]  }
 0x201   : > { %6889 = vmatpush3.bf16.msra.mxu0 %v7328_v37  ;;  %v7374_v35 = vld [vmem:[%s9476_s3 + $0x3d0] sm:$0xff]   ;;  %v1440_v12 = vld [vmem:[#allocation6 + $0x80] sm:$0xff] }
 0x202   : > { %6890 = vmatprep.subr.bf16.mxu0 %v7330_v40  ;;  %v7376_v37 = vld [vmem:[%s9476_s3 + $0x390] sm:$0xff]   ;;  %v7378_v40 = vld [vmem:[%s9476_s3 + $0x3c8] sm:$0xff]  }
 0x203   : > { %6867 = vmatpush3.bf16.msra.mxu1 %v7327_v36  ;;  %v7375_v36 = vld [vmem:[%s9476_s3 + $0x310] sm:$0xff]   ;;  %v7409_v18 = vld [vmem:[%s9478_s5 + $0x64] ss:$8 sps:$4 sm:$0xff]  }
 0x204   : > { %6868 = vmatprep.subr.bf16.mxu1 %v7329_v39  ;;  %v7377_v39 = vld [vmem:[%s9476_s3 + $0x348] sm:$0xff]   ;;  %v7401_v14 = vld [vmem:[%s9478_s5 + $0x70] ss:$8 sps:$4 sm:$0xff]  }
 0x205   : > { %6891 = vmatpush3.bf16.msra.mxu0 %v7332_v43  ;;  %v7380_v43 = vld [vmem:[%s9476_s3 + $0x388] sm:$0xff]   ;;  %v7404_v16 = vld [vmem:[%s9478_s5 + $0x170] ss:$8 sps:$4 sm:$0xff]  }
 0x206   : > { %6892 = vmatprep.subr.bf16.mxu0 %v7334_v47  ;;  %v7382_v47 = vld [vmem:[%s9476_s3 + $0x3c0] sm:$0xff]  }
 0x207   : > { %6869 = vmatpush3.bf16.msra.mxu1 %v7331_v42  ;;  %v7379_v42 = vld [vmem:[%s9476_s3 + $0x308] sm:$0xff]  }
 0x208   : > { %6870 = vmatprep.subr.bf16.mxu1 %v7333_v45  ;;  %v7381_v45 = vld [vmem:[%s9476_s3 + $0x340] sm:$0xff]  }
 0x209   : > { %6893 = vmatpush3.bf16.msra.mxu0 %v7336_v50  ;;  %v7384_v50 = vld [vmem:[%s9476_s3 + $0x380] sm:$0xff]  }
 0x20a   : > { %6894 = vmatprep.subr.bf16.mxu0 %v7338_v52  ;;  %v1436_v52 = vld [vmem:[#allocation6 + $0x60] sm:$0xff] }
 0x20b   : > { %6871 = vmatpush3.bf16.msra.mxu1 %v7335_v49  ;;  %v7383_v49 = vld [vmem:[%s9476_s3 + $0x300] sm:$0xff]  }
 0x20c   : > { %6872 = vmatprep.subr.bf16.mxu1 %v7337_v51  ;;  %v7385_v51 = vld [vmem:[%s9476_s3 + $0x478] sm:$0xff]  }
 0x20d   : > { %6895 = vmatpush3.bf16.msra.mxu0 %v7340_v55  ;;  %v7386_v55 = vld [vmem:[%s9476_s3 + $0x438] sm:$0xff]  }
 0x20e   : > { %6896 = vmatprep.subr.bf16.mxu0 %v7342_v58  ;;  %v1472_v58 = vpack.c.bf16 %v8255_v41, %v1436_v52  ;;  %v7389_v41 = vld [vmem:[%s9476_s3 + $0x468] sm:$0xff]  }
 0x20f   : > { %6873 = vmatpush3.bf16.msra.mxu1 %v7339_v54  ;;  %v1438_v54 = vld [vmem:[#allocation6 + $0x70] sm:$0xff]  ;;  %v7455_v52 = vld [vmem:[%s9478_s5 + $0xe0] ss:$8 sps:$4 sm:$0xff]  }
 0x210   : > { %6874 = vmatprep.subr.bf16.mxu1 %v7341_v56  ;;  %v1441_v56 = vld [vmem:[#allocation6 + $0x88] sm:$0xff] }
 0x211   : > { %6897 = vmatpush3.bf16.msra.mxu0 %v7344_v61  ;;  %v1474_v61 = vpack.c.bf16 %v8259_v53, %v1438_v54  ;;  %v7390_v53 = vld [vmem:[%s9476_s3 + $0x428] sm:$0xff]  }
 0x212   : > { %6898 = vmatprep.subr.bf16.mxu0 %v7346_v0  ;;  %v7388_v0 = vld [vmem:[%s9476_s3 + $0x430] sm:$0xff]   ;;  %v7458_v54 = vld [vmem:[%s9478_s5 + $0x1e0] ss:$8 sps:$4 sm:$0xff]  }
 0x213   : > { %6875 = vmatpush3.bf16.msra.mxu1 %v7343_v59  ;;  %v7387_v59 = vld [vmem:[%s9476_s3 + $0x470] sm:$0xff]  }
 0x214   : > { %6876 = vmatprep.subr.bf16.mxu1 %v7345_v63  ;;  %v1477_v63 = vpack.c.bf16 %v8267_v57, %v1441_v56  ;;  %v7391_v57 = vld [vmem:[%s9476_s3 + $0x460] sm:$0xff]   ;;  %v7466_v56 = vld [vmem:[%s9478_s5 + $0x1d4] ss:$8 sps:$4 sm:$0xff]  }
 0x215   : > { %6899 = vmatpush3.bf16.msra.mxu0 %v7348_v2  ;;  %v7393_v2 = vld [vmem:[%s9476_s3 + $0x458] sm:$0xff]  }
 0x216   : > { %6900 = vmatprep.subr.bf16.mxu0 %v7350_v5  ;;  %v7395_v5 = vld [vmem:[%s9476_s3 + $0x450] sm:$0xff]  }
 0x217   : > { %6877 = vmatpush3.bf16.msra.mxu1 %v7347_v1  ;;  %v7392_v1 = vld [vmem:[%s9476_s3 + $0x420] sm:$0xff]  }
 0x218   : > { %6878 = vmatprep.subr.bf16.mxu1 %v7349_v3  ;;  %v7394_v3 = vld [vmem:[%s9476_s3 + $0x418] sm:$0xff]  }
 0x219   : > { %6901 = vmatpush3.bf16.msra.mxu0 %v7352_v7  ;;  %v7397_v7 = vld [vmem:[%s9476_s3 + $0x448] sm:$0xff]  }
 0x21a   : > { %6930 = vmatprep.subr.bf16.mxu0 %v7354_v9  ;;  %v7399_v9 = vld [vmem:[%s9476_s3 + $0x440] sm:$0xff]  }
 0x21b   : > { %6879 = vmatpush3.bf16.msra.mxu1 %v7351_v6  ;;  %v7396_v6 = vld [vmem:[%s9476_s3 + $0x410] sm:$0xff]  }
 0x21c   : > { %6908 = vmatprep.subr.bf16.mxu1 %v7353_v8  ;;  %2875 = vmatmul.mubr.bf16.vlgmr.msra.gmra.mxu0 %v1470_v19  ;;  %v7398_v8 = vld [vmem:[%s9476_s3 + $0x408] sm:$0xff]  }
 0x21d   : > { %6931 = vmatpush3.bf16.msra.mxu0 %v7356_v17  ;;  %2956 = vmatprep.mubr.bf16.mxu0 %v1475_v22  ;;  %v7406_v17 = vld [vmem:[%s9478_s5 + $0x174] ss:$8 sps:$4 sm:$0xff]   ;;  %v7410_v19 = vld [vmem:[%s9478_s5 + $0x160] ss:$8 sps:$4 sm:$0xff]   ;;  %v7416_v22 = vld [vmem:[%s9478_s5 + $0x150] ss:$8 sps:$4 sm:$0xff]  }
 0x21e   : > { %2834 = vmatmul.mubr.bf16.vlgmr.msra.gmra.mxu1 %v1468_v15  ;;  %6932 = vmatprep.subr.bf16.mxu0 %v7358_v60  ;;  %v7403_v15 = vld [vmem:[%s9478_s5 + $0x74] ss:$8 sps:$4 sm:$0xff]  }
 0x21f   : > { %6909 = vmatpush3.bf16.msra.mxu1 %v7355_v13  ;;  %2915 = vmatprep.mubr.bf16.mxu1 %v1473_v21  ;;  %v1476_v13 = vpack.c.bf16 %v8289_v4, %v1440_v12  ;;  %v7407_v4 = vld [vmem:[%s9478_s5 + $0x60] ss:$8 sps:$4 sm:$0xff]   ;;  %v7413_v21 = vld [vmem:[%s9478_s5 + $0x50] ss:$8 sps:$4 sm:$0xff]   ;;  %v7415_v60 = vld [vmem:[%s9478_s5 + $0x54] ss:$8 sps:$4 sm:$0xff]  }
 0x220   : > { %6910 = vmatprep.subr.bf16.mxu1 %v7357_v20  ;;  %v7412_v20 = vld [vmem:[%s9478_s5 + $0x164] ss:$8 sps:$4 sm:$0xff]   ;;  %v7488_v12 = vld [vmem:[%s9478_s5 + $0x190] ss:$8 sps:$4 sm:$0xff]  }
 0x221   : > { %6933 = vmatpush3.bf16.msra.mxu0 %v7360_v25  ;;  %v7421_v25 = vld [vmem:[%s9478_s5 + $0x44] ss:$8 sps:$4 sm:$0xff]  }
 0x222   : > { %6934 = vmatprep.subr.bf16.mxu0 %v7362_v38  ;;  %v7419_v38 = vld [vmem:[%s9478_s5 + $0x40] ss:$8 sps:$4 sm:$0xff]  }
 0x223   : > { %6911 = vmatpush3.bf16.msra.mxu1 %v7359_v24  ;;  %v7418_v24 = vld [vmem:[%s9478_s5 + $0x154] ss:$8 sps:$4 sm:$0xff]  }
 0x224   : > { %6912 = vmatprep.subr.bf16.mxu1 %v7361_v29  ;;  %v7424_v29 = vld [vmem:[%s9478_s5 + $0x144] ss:$8 sps:$4 sm:$0xff]  }
 0x225   : > { %6935 = vmatpush3.bf16.msra.mxu0 %v7364_v27  ;;  %v7427_v27 = vld [vmem:[%s9478_s5 + $0x34] ss:$8 sps:$4 sm:$0xff]  }
 0x226   : > { %6936 = vmatprep.subr.bf16.mxu0 %v7366_v23  ;;  %v7425_v23 = vld [vmem:[%s9478_s5 + $0x30] ss:$8 sps:$4 sm:$0xff]  }
 0x227   : > { %6913 = vmatpush3.bf16.msra.mxu1 %v7363_v26  ;;  %v7422_v26 = vld [vmem:[%s9478_s5 + $0x140] ss:$8 sps:$4 sm:$0xff]  }
 0x228   : > { %6914 = vmatprep.subr.bf16.mxu1 %v7365_v28  ;;  %v7430_v28 = vld [vmem:[%s9478_s5 + $0x134] ss:$8 sps:$4 sm:$0xff]  }
 0x229   : > { %6937 = vmatpush3.bf16.msra.mxu0 %v7368_v31  ;;  %v7433_v31 = vld [vmem:[%s9478_s5 + $0x24] ss:$8 sps:$4 sm:$0xff]  }
 0x22a   : > { %6938 = vmatprep.subr.bf16.mxu0 %v7370_v11  ;;  %v7431_v11 = vld [vmem:[%s9478_s5 + $0x20] ss:$8 sps:$4 sm:$0xff]  }
 0x22b   : > { %6915 = vmatpush3.bf16.msra.mxu1 %v7367_v30  ;;  %v7428_v30 = vld [vmem:[%s9478_s5 + $0x130] ss:$8 sps:$4 sm:$0xff]  }
 0x22c   : > { %6916 = vmatprep.subr.bf16.mxu1 %v7369_v62  ;;  %v7436_v62 = vld [vmem:[%s9478_s5 + $0x124] ss:$8 sps:$4 sm:$0xff]  }
 0x22d   : > { %6939 = vmatpush3.bf16.msra.mxu0 %v7372_v33  ;;  %v7439_v33 = vld [vmem:[%s9478_s5 + $0x14] ss:$8 sps:$4 sm:$0xff]  }
 0x22e   : > { %6940 = vmatprep.subr.bf16.mxu0 %v7374_v35  ;;  %v7437_v35 = vld [vmem:[%s9478_s5 + $0x10] ss:$8 sps:$4 sm:$0xff]  }
 0x22f   : > { %6917 = vmatpush3.bf16.msra.mxu1 %v7371_v32  ;;  %v7434_v32 = vld [vmem:[%s9478_s5 + $0x120] ss:$8 sps:$4 sm:$0xff]  }
 0x230   : > { %6918 = vmatprep.subr.bf16.mxu1 %v7373_v34  ;;  %v7442_v34 = vld [vmem:[%s9478_s5 + $0x114] ss:$8 sps:$4 sm:$0xff]  }
 0x231   : > { %6941 = vmatpush3.bf16.msra.mxu0 %v7376_v37  ;;  %v7445_v37 = vld [vmem:[%s9478_s5 + $0x4] ss:$8 sps:$4 sm:$0xff]  }
 0x232   : > { %6942 = vmatprep.subr.bf16.mxu0 %v7378_v40  ;;  %v7443_v40 = vld [vmem:[%s9478_s5] ss:$8 sps:$4 sm:$0xff]  }
 0x233   : > { %6919 = vmatpush3.bf16.msra.mxu1 %v7375_v36  ;;  %v7440_v36 = vld [vmem:[%s9478_s5 + $0x110] ss:$8 sps:$4 sm:$0xff]  }
 0x234   : > { %6920 = vmatprep.subr.bf16.mxu1 %v7377_v39  ;;  %v7448_v39 = vld [vmem:[%s9478_s5 + $0x104] ss:$8 sps:$4 sm:$0xff]  }
 0x235   : > { %6943 = vmatpush3.bf16.msra.mxu0 %v7380_v43  ;;  %v7451_v43 = vld [vmem:[%s9478_s5 + $0xf4] ss:$8 sps:$4 sm:$0xff]  }
 0x236   : > { %6944 = vmatprep.subr.bf16.mxu0 %v7382_v47  ;;  %v7449_v47 = vld [vmem:[%s9478_s5 + $0xf0] ss:$8 sps:$4 sm:$0xff]  }
 0x237   : > { %6921 = vmatpush3.bf16.msra.mxu1 %v7379_v42  ;;  %v7446_v42 = vld [vmem:[%s9478_s5 + $0x100] ss:$8 sps:$4 sm:$0xff]  }
 0x238   : > { %6922 = vmatprep.subr.bf16.mxu1 %v7381_v45  ;;  %v7454_v45 = vld [vmem:[%s9478_s5 + $0x1f4] ss:$8 sps:$4 sm:$0xff]  }
 0x239   : > { %6945 = vmatpush3.bf16.msra.mxu0 %v7384_v50  ;;  %v7457_v50 = vld [vmem:[%s9478_s5 + $0xe4] ss:$8 sps:$4 sm:$0xff]  }
 0x23a   : > { %4046 = vmatprep.subr.bf16.mxu0 %v7403_v15  ;;  %v7491_v15 = vld [vmem:[%s9478_s5 + $0x80] ss:$8 sps:$4 sm:$0xff]  }
 0x23b   : > { %6923 = vmatpush3.bf16.msra.mxu1 %v7383_v49  ;;  %v7452_v49 = vld [vmem:[%s9478_s5 + $0x1f0] ss:$8 sps:$4 sm:$0xff]  }
 0x23c   : > { %6952 = vmatprep.subr.bf16.mxu1 %v7385_v51  ;;  %2957 = vmatmul.mubr.bf16.vlgmr.msra.gmra.mxu0 %v1474_v61  ;;  %v7460_v51 = vld [vmem:[%s9478_s5 + $0x1e4] ss:$8 sps:$4 sm:$0xff]  }
 0x23d   : > { %4047 = vmatpush1.bf16.msra.mxu0 %v7401_v14  ;;  %v7469_v61 = vld [vmem:[%s9478_s5 + $0xc4] ss:$8 sps:$4 sm:$0xff]  }
 0x23e   : > { %2916 = vmatmul.mubr.bf16.vlgmr.msra.gmra.mxu1 %v1472_v58  ;;  %4048 = vmatprep.subr.bf16.mxu0 %v7409_v18  ;;  %v7461_v58 = vld [vmem:[%s9478_s5 + $0xd0] ss:$8 sps:$4 sm:$0xff]   ;;  %v7496_v14 = vld [vmem:[%s9478_s5 + $0x184] ss:$8 sps:$4 sm:$0xff]  }
 0x23f   : > { %6953 = vmatpush3.bf16.msra.mxu1 %v7386_v55  ;;  %2997 = vmatprep.mubr.bf16.mxu1 %v1477_v63  ;;  %v7463_v55 = vld [vmem:[%s9478_s5 + $0xd4] ss:$8 sps:$4 sm:$0xff]   ;;  %v7472_v63 = vld [vmem:[%s9478_s5 + $0x1c4] ss:$8 sps:$4 sm:$0xff]  }
 0x240   : > { %6954 = vmatprep.subr.bf16.mxu1 %v7387_v59  ;;  %v7464_v59 = vld [vmem:[%s9478_s5 + $0x1d0] ss:$8 sps:$4 sm:$0xff]  }
 0x241   : > { %4049 = vmatpush1.bf16.msra.mxu0 %v7407_v4  ;;  %v7502_v4 = vld [vmem:[%s9478_s5 + $0x374] ss:$8 sps:$4 sm:$0xff]  }
 0x242   : > { %4050 = vmatprep.subr.bf16.mxu0 %v7415_v60 }
 0x243   : > { %6955 = vmatpush3.bf16.msra.mxu1 %v7388_v0  ;;  %v7467_v0 = vld [vmem:[%s9478_s5 + $0xc0] ss:$8 sps:$4 sm:$0xff]  }
 0x244   : > { %6956 = vmatprep.subr.bf16.mxu1 %v7389_v41  ;;  %v7470_v41 = vld [vmem:[%s9478_s5 + $0x1c0] ss:$8 sps:$4 sm:$0xff]  }
 0x245   : > { %4051 = vmatpush1.bf16.msra.mxu0 %v7413_v21 }
 0x246   : > { %4052 = vmatprep.subr.bf16.mxu0 %v7421_v25 }
 0x247   : > { %6957 = vmatpush3.bf16.msra.mxu1 %v7390_v53  ;;  %v7475_v53 = vld [vmem:[%s9478_s5 + $0xb4] ss:$8 sps:$4 sm:$0xff]  }
 0x248   : > { %6958 = vmatprep.subr.bf16.mxu1 %v7391_v57  ;;  %v7478_v57 = vld [vmem:[%s9478_s5 + $0x1b4] ss:$8 sps:$4 sm:$0xff]  }
 0x249   : > { %4053 = vmatpush1.bf16.msra.mxu0 %v7419_v38 }
 0x24a   : > { %4054 = vmatprep.subr.bf16.mxu0 %v7427_v27 }
 0x24b   : > { %6959 = vmatpush3.bf16.msra.mxu1 %v7392_v1  ;;  %v7473_v1 = vld [vmem:[%s9478_s5 + $0xb0] ss:$8 sps:$4 sm:$0xff]  }
 0x24c   : > { %6960 = vmatprep.subr.bf16.mxu1 %v7393_v2  ;;  %v7476_v2 = vld [vmem:[%s9478_s5 + $0x1b0] ss:$8 sps:$4 sm:$0xff]  }
 0x24d   : > { %4055 = vmatpush1.bf16.msra.mxu0 %v7425_v23 }
 0x24e   : > { %4056 = vmatprep.subr.bf16.mxu0 %v7433_v31 }
 0x24f   : > { %6961 = vmatpush3.bf16.msra.mxu1 %v7394_v3  ;;  %v7481_v3 = vld [vmem:[%s9478_s5 + $0xa4] ss:$8 sps:$4 sm:$0xff]  }
 0x250   : > { %6962 = vmatprep.subr.bf16.mxu1 %v7395_v5  ;;  %v7484_v5 = vld [vmem:[%s9478_s5 + $0x1a4] ss:$8 sps:$4 sm:$0xff]  }
 0x251   : > { %4057 = vmatpush1.bf16.msra.mxu0 %v7431_v11 }
 0x252   : > { %4058 = vmatprep.subr.bf16.mxu0 %v7439_v33 }
 0x253   : > { %6963 = vmatpush3.bf16.msra.mxu1 %v7396_v6  ;;  %v7479_v6 = vld [vmem:[%s9478_s5 + $0xa0] ss:$8 sps:$4 sm:$0xff]  }
 0x254   : > { %6964 = vmatprep.subr.bf16.mxu1 %v7397_v7  ;;  %v7482_v7 = vld [vmem:[%s9478_s5 + $0x1a0] ss:$8 sps:$4 sm:$0xff]  }
 0x255   : > { %4059 = vmatpush1.bf16.msra.mxu0 %v7437_v35 }
 0x256   : > { %4060 = vmatprep.subr.bf16.mxu0 %v7445_v37 }
 0x257   : > { %6965 = vmatpush3.bf16.msra.mxu1 %v7398_v8  ;;  %v7487_v8 = vld [vmem:[%s9478_s5 + $0x94] ss:$8 sps:$4 sm:$0xff]  }
 0x258   : > { %6966 = vmatprep.subr.bf16.mxu1 %v7399_v9  ;;  %v7490_v9 = vld [vmem:[%s9478_s5 + $0x194] ss:$8 sps:$4 sm:$0xff]  }
 0x259   : > { %4061 = vmatpush1.bf16.msra.mxu0 %v7443_v40 }
 0x25a   : > { %4062 = vmatprep.subr.bf16.mxu0 %v7451_v43 }
 0x25b   : > { %6967 = vmatpush3.bf16.msra.mxu1 %v7400_v10  ;;  %v7485_v10 = vld [vmem:[%s9478_s5 + $0x90] ss:$8 sps:$4 sm:$0xff]  }
 0x25c   : > { %4089 = vmatprep.subr.bf16.mxu1 %v7406_v17  ;;  %v7499_v17 = vld [vmem:[%s9478_s5 + $0x274] ss:$8 sps:$4 sm:$0xff]  }
 0x25d   : > { %4063 = vmatpush2.bf16.msra.mxu0 %v7449_v47 }
 0x25e   : > { %2998 = vmatmul.mubr.bf16.vlgmr.msra.gmra.mxu1 %v1476_v13  ;;  %4064 = vmatprep.subr.bf16.mxu0 %v7457_v50  ;;  %v7493_v13 = vld [vmem:[%s9478_s5 + $0x84] ss:$8 sps:$4 sm:$0xff]  }
 0x25f   : > { %4090 = vmatpush1.bf16.msra.mxu1 %v7404_v16  ;;  %v7494_v16 = vld [vmem:[%s9478_s5 + $0x180] ss:$8 sps:$4 sm:$0xff]  }
 0x260   : > { %4091 = vmatprep.subr.bf16.mxu1 %v7412_v20 }
 0x261   : > { %4065 = vmatpush2.bf16.msra.mxu0 %v7455_v52 }
 0x262   : > { %4066 = vmatprep.subr.bf16.mxu0 %v7463_v55 }
 0x263   : > { %4092 = vmatpush1.bf16.msra.mxu1 %v7410_v19 }
 0x264   : > { %4093 = vmatprep.subr.bf16.mxu1 %v7418_v24 }
 0x265   : > { %4067 = vmatpush2.bf16.msra.mxu0 %v7461_v58 }
 0x266   : > { %4068 = vmatprep.subr.bf16.mxu0 %v7469_v61 }
 0x267   : > { %4094 = vmatpush1.bf16.msra.mxu1 %v7416_v22 }
 0x268   : > { %4095 = vmatprep.subr.bf16.mxu1 %v7424_v29 }
 0x269   : > { %4069 = vmatpush2.bf16.msra.mxu0 %v7467_v0 }
 0x26a   : > { %4070 = vmatprep.subr.bf16.mxu0 %v7475_v53 }
 0x26b   : > { %4096 = vmatpush1.bf16.msra.mxu1 %v7422_v26 }
 0x26c   : > { %4097 = vmatprep.subr.bf16.mxu1 %v7430_v28 }
 0x26d   : > { %4071 = vmatpush2.bf16.msra.mxu0 %v7473_v1 }
 0x26e   : > { %4072 = vmatprep.subr.bf16.mxu0 %v7481_v3 }
 0x26f   : > { %4098 = vmatpush1.bf16.msra.mxu1 %v7428_v30 }
 0x270   : > { %4099 = vmatprep.subr.bf16.mxu1 %v7436_v62 }
 0x271   : > { %4073 = vmatpush2.bf16.msra.mxu0 %v7479_v6 }
 0x272   : > { %4074 = vmatprep.subr.bf16.mxu0 %v7487_v8 }
 0x273   : > { %4100 = vmatpush1.bf16.msra.mxu1 %v7434_v32 }
 0x274   : > { %4101 = vmatprep.subr.bf16.mxu1 %v7442_v34  ;;  %v6335_v34 = vld [vmem:[%s9477_s4] ss:$0 sm:$0xff] }
 0x275   : > { %4075 = vmatpush2.bf16.msra.mxu0 %v7485_v10 }
 0x276   : > { %4076 = vmatprep.subr.bf16.mxu0 %v7493_v13 }
 0x277   : > { %4102 = vmatpush1.bf16.msra.mxu1 %v7440_v36 }
 0x278   : > { %4103 = vmatprep.subr.bf16.mxu1 %v7448_v39 }
 0x279   : > { %4077 = vmatpush2.bf16.msra.mxu0 %v7491_v15 }
 0x27a   : > { %4132 = vmatprep.subr.bf16.mxu0 %v7499_v17 }
 0x27b   : > { %4104 = vmatpush1.bf16.msra.mxu1 %v7446_v42 }
 0x27c   : > { %4105 = vmatprep.subr.bf16.mxu1 %v7454_v45 }
 0x27f   : > { %4106 = vmatpush2.bf16.msra.mxu1 %v7452_v49 }
 0x280   : > { %4107 = vmatprep.subr.bf16.mxu1 %v7460_v51 }
 0x283   : > { %4108 = vmatpush2.bf16.msra.mxu1 %v7458_v54 }
 0x284   : > { %4109 = vmatprep.subr.bf16.mxu1 %v7466_v56 }
 0x287   : > { %4110 = vmatpush2.bf16.msra.mxu1 %v7464_v59 }
 0x288   : > { %4111 = vmatprep.subr.bf16.mxu1 %v7472_v63 }
 0x28b   : > { %4112 = vmatpush2.bf16.msra.mxu1 %v7470_v41 }
 0x28c   : > { %4113 = vmatprep.subr.bf16.mxu1 %v7478_v57 }
 0x28f   : > { %4114 = vmatpush2.bf16.msra.mxu1 %v7476_v2 }
 0x290   : > { %4115 = vmatprep.subr.bf16.mxu1 %v7484_v5 }
 0x293   : > { %4116 = vmatpush2.bf16.msra.mxu1 %v7482_v7 }
 0x294   : > { %4117 = vmatprep.subr.bf16.mxu1 %v7490_v9 }
 0x297   : > { %4118 = vmatpush2.bf16.msra.mxu1 %v7488_v12 }
 0x298   : > { %4119 = vmatprep.subr.bf16.mxu1 %v7496_v14 }
 0x29a   : > { %v6814_v20 = vpop.f32.mrf.mxu0 }
 0x29b   : > { %4120 = vmatpush2.bf16.msra.mxu1 %v7494_v16 }
 0x29c   : > { %4175 = vmatprep.subr.bf16.mxu1 %v7502_v4  ;;  %v6815_v60 = vpop.f32.mrf.mxu0 }
 0x29d   : > { %v6816_v42 = vadd.f32 %v6815_v60, %v6814_v20 }
 0x29e   : > { %v6792_v18 = vpop.f32.mrf.mxu1  ;;  %v6817_v24 = vpop.f32.mrf.mxu0 }
 0x2a0   : > { %v6793_v19 = vpop.f32.mrf.mxu1  ;;  %v6818_v29 = vpop.f32.mrf.mxu0 }
 0x2a1   : > { %v6794_v33 = vadd.f32 %v6793_v19, %v6792_v18  ;;  %v6819_v51 = vadd.f32 %v6818_v29, %v6817_v24 }
 0x2a2   : > { %v6795_v21 = vpop.f32.mrf.mxu1 }
 0x2a3   : > { %v2672_v37 = vadd.f32 %v6794_v33, %v6335_v34 }
 0x2a4   : > { %v6796_v22 = vpop.f32.mrf.mxu1 }
 0x2a5   : > { %v6797_v39 = vadd.f32 %v6796_v22, %v6795_v21  ;;  %v2713_v49 = vadd.f32 %v6816_v42, %v2672_v37 }
 0x2a7   : > { %v2675_v50 = vadd.f32 %v6797_v39, %v6335_v34 }
 0x2a9   : > { %v2716_v58 = vadd.f32 %v6819_v51, %v2675_v50  ;;  %v4325_v50 = vld [vmem:[#allocation5 + $0x48] sm:$0x1e] }
 0x2bc   : > { %v6858_v26 = vpop.f32.mrf.mxu0 }
 0x2be   : > { %v6836_v25 = vpop.f32.mrf.mxu1  ;;  %v6859_v28 = vpop.f32.mrf.mxu0 }
 0x2bf   : > { %v6860_v59 = vadd.f32 %v6859_v28, %v6858_v26 }
 0x2c0   : > { %v6837_v38 = vpop.f32.mrf.mxu1  ;;  %v6861_v30 = vpop.f32.mrf.mxu0 }
 0x2c1   : > { %v6838_v43 = vadd.f32 %v6837_v38, %v6836_v25 }
 0x2c2   : > { %v6839_v27 = vpop.f32.mrf.mxu1  ;;  %v6862_v62 = vpop.f32.mrf.mxu0 }
 0x2c3   : > { %v2754_v52 = vadd.f32 %v6838_v43, %v2713_v49  ;;  %v6863_v57 = vadd.f32 %v6862_v62, %v6861_v30 }
 0x2c4   : > { %v6840_v23 = vpop.f32.mrf.mxu1 }
 0x2c5   : > { %v6841_v54 = vadd.f32 %v6840_v23, %v6839_v27  ;;  %v2795_v0 = vadd.f32 %v6860_v59, %v2754_v52 }
 0x2c7   : > { %v2757_v41 = vadd.f32 %v6841_v54, %v2716_v58 }
 0x2c9   : > { %v2798_v5 = vadd.f32 %v6863_v57, %v2757_v41  ;;  %v4298_v41 = vld [vmem:[#allocation5] sm:$0xf] }
 0x2dc   : > { %v6902_v32 = vpop.f32.mrf.mxu0 }
 0x2de   : > { %v6880_v31 = vpop.f32.mrf.mxu1  ;;  %v6903_v36 = vpop.f32.mrf.mxu0 }
 0x2df   : > { %v6904_v6 = vadd.f32 %v6903_v36, %v6902_v32 }
 0x2e0   : > { %v6881_v11 = vpop.f32.mrf.mxu1  ;;  %v6905_v45 = vpop.f32.mrf.mxu0 }
 0x2e1   : > { %v6882_v61 = vadd.f32 %v6881_v11, %v6880_v31 }
 0x2e2   : > { %v6883_v35 = vpop.f32.mrf.mxu1  ;;  %v6906_v55 = vpop.f32.mrf.mxu0 }
 0x2e3   : > { %v2836_v1 = vadd.f32 %v6882_v61, %v2795_v0  ;;  %v6907_v13 = vadd.f32 %v6906_v55, %v6905_v45 }
 0x2e4   : > { %v6884_v40 = vpop.f32.mrf.mxu1 }
 0x2e5   : > { %v6885_v2 = vadd.f32 %v6884_v40, %v6883_v35  ;;  %v2877_v9 = vadd.f32 %v6904_v6, %v2836_v1 }
 0x2e7   : > { %v2839_v10 = vadd.f32 %v6885_v2, %v2798_v5  ;;  %v4297_v2 = vld [vmem:[#allocation5 + $0x48] sm:$0xf] }
 0x2e9   : > { %v2880_v17 = vadd.f32 %v6907_v13, %v2839_v10 }
 0x2fc   : > { %v6946_v63 = vpop.f32.mrf.mxu0 }
 0x2fe   : > { %v6924_v47 = vpop.f32.mrf.mxu1  ;;  %v6947_v3 = vpop.f32.mrf.mxu0 }
 0x2ff   : > { %v6948_v4 = vadd.f32 %v6947_v3, %v6946_v63 }
 0x300   : > { %v6925_v56 = vpop.f32.mrf.mxu1  ;;  %v6949_v12 = vpop.f32.mrf.mxu0 }
 0x301   : > { %v6926_v7 = vadd.f32 %v6925_v56, %v6924_v47 }
 0x302   : > { %v6927_v53 = vpop.f32.mrf.mxu1  ;;  %v6950_v18 = vpop.f32.mrf.mxu0 }
 0x303   : > { %v2918_v14 = vadd.f32 %v6926_v7, %v2877_v9  ;;  %v6951_v24 = vadd.f32 %v6950_v18, %v6949_v12  ;;  %v4329_v7 = vrot.slane %v4325_v50, 1 }
 0x304   : > { %v6928_v8 = vpop.f32.mrf.mxu1 }
 0x305   : > { %v6929_v15 = vadd.f32 %v6928_v8, %v6927_v53  ;;  %v2959_v20 = vadd.f32 %v6948_v4, %v2918_v14 }
 0x307   : > { %v2921_v21 = vadd.f32 %v6929_v15, %v2880_v17 }
 0x309   : > { %v2962_v38 = vadd.f32 %v6951_v24, %v2921_v21  ;;  %v4366_v24 = vld [vmem:[#allocation5] sm:$0x3c] }
 0x31e   : > { %v6968_v16 = vpop.f32.mrf.mxu1 }
 0x320   : > { %v6969_v19 = vpop.f32.mrf.mxu1 }
 0x321   : > { %v6970_v60 = vadd.f32 %v6969_v19, %v6968_v16 }
 0x322   : > { %v6971_v22 = vpop.f32.mrf.mxu1 }
 0x323   : > { %v3000_v25 = vadd.f32 %v6970_v60, %v2959_v20 }
 0x324   : > { %v6972_v29 = vpop.f32.mrf.mxu1 }
 0x325   : > { %v3006_v26 = vmax.f32 %v3000_v25, 0.0  ;;  %v6973_v27 = vadd.f32 %v6972_v29, %v6971_v22  ;;  %v4326_v22 = vld [vmem:[#allocation5] sm:$0x1e] }
 0x327   : > { %3009 = vst [vmem:[#allocation4 + $0x9] ss:$8 sps:$4 sm:$0xff] %v3006_v26   ;;  %v3003_v28 = vadd.f32 %v6973_v27, %v2962_v38  ;;  %v4365_v38 = vld [vmem:[#allocation5 + $0x48] sm:$0x3c]  ;;  %v7497_v27 = vld [vmem:[%s9478_s5 + $0x270] ss:$8 sps:$4 sm:$0xff]  }
 0x329   : > { %v3007_v23 = vmax.f32 %v3003_v28, 0.0 }
 0x32b   : > { %3013 = vst [vmem:[#allocation4 + $0x19] ss:$8 sps:$4 sm:$0xff] %v3007_v23   ;;  %v4330_v23 = vrot.slane %v4326_v22, 1  ;;  %v7557_v22 = vld [vmem:[%s9478_s5 + $0x2d0] ss:$8 sps:$4 sm:$0xff]  }
 0x32e   : > { %v3018_v30 = vld [vmem:[#allocation4 + $0x8] sm:$0xf]  ;;  %v3023_v31 = vld [vmem:[#allocation4 + $0x10] sm:$0xf] }
 0x32f   : > { %v3032_v62 = vld [vmem:[#allocation4 + $0x9] sm:$0xf]  ;;  %v3020_v11 = vrot.slane %v3018_v30, 4  ;;  %3024 = vst [vmem:[#allocation6 + $0x90] sm:$0xf] %v3023_v31 }
 0x330   : > { %v3034_v32 = vrot.slane %v3032_v62, 4  ;;  %v3037_v33 = vld [vmem:[#allocation4 + $0x11] sm:$0xf]  ;;  %v3046_v34 = vld [vmem:[#allocation4 + $0xa] sm:$0xf] }
 0x331   : > { %v3048_v35 = vrot.slane %v3046_v34, 4  ;;  %v3051_v36 = vld [vmem:[#allocation4 + $0x12] sm:$0xf]  ;;  %3038 = vst [vmem:[#allocation6 + $0x98] sm:$0xf] %v3037_v33 }
 0x332   : > { %v3060_v37 = vld [vmem:[#allocation4 + $0x10] sm:$0xf]  ;;  %3052 = vst [vmem:[#allocation6 + $0xa0] sm:$0xf] %v3051_v36  ;;  %3022 = vst [vmem:[#allocation6] sm:$0xf0] %v3020_v11 }
 0x333   : > { %v3062_v39 = vrot.slane %v3060_v37, 4  ;;  %v3074_v40 = vld [vmem:[#allocation4 + $0x11] sm:$0xf]  ;;  %3036 = vst [vmem:[#allocation6 + $0x8] sm:$0xf0] %v3034_v32  ;;  %v4370_v11 = vrot.slane %v4366_v24, 2 }
 0x334   : > { %v3088_v42 = vld [vmem:[#allocation4 + $0x12] sm:$0xf]  ;;  %v3076_v43 = vrot.slane %v3074_v40, 4  ;;  %3050 = vst [vmem:[#allocation6 + $0x10] sm:$0xf0] %v3048_v35  ;;  %v4369_v32 = vrot.slane %v4365_v38, 2 }
 0x335   : > { %v3090_v45 = vrot.slane %v3088_v42, 4  ;;  %v3100_v47 = vld [vmem:[#allocation4 + $0x10] sm:$0xf]  ;;  %3064 = vst [vmem:[#allocation6 + $0x18] sm:$0xf0] %v3062_v39 }
 0x336   : > { %v3115_v49 = vld [vmem:[#allocation4 + $0x11] sm:$0xf]  ;;  %3101 = vst [vmem:[#allocation6 + $0x30] sm:$0xf] %v3100_v47  ;;  %v3025_v52 = vld [vmem:[#allocation4 + $0x18] sm:$0xf] }
 0x337   : > { %v3129_v51 = vld [vmem:[#allocation4 + $0x12] sm:$0xf]  ;;  %3116 = vst [vmem:[#allocation6 + $0x38] sm:$0xf] %v3115_v49  ;;  %v3039_v54 = vld [vmem:[#allocation4 + $0x19] sm:$0xf] }
 0x338   : > { %3130 = vst [vmem:[#allocation6 + $0x40] sm:$0xf] %v3129_v51  ;;  %3078 = vst [vmem:[#allocation6 + $0x20] sm:$0xf0] %v3076_v43  ;;  %v3027_v55 = vrot.slane %v3025_v52, 4  ;;  %v3041_v56 = vrot.slane %v3039_v54, 4 }
 0x339   : > { %3092 = vst [vmem:[#allocation6 + $0x28] sm:$0xf0] %v3090_v45  ;;  %v3053_v58 = vld [vmem:[#allocation4 + $0x1a] sm:$0xf]  ;;  %v3067_v63 = vld [vmem:[#allocation4 + $0x20] sm:$0xf] }
 0x33a   : > { %v3065_v59 = vld [vmem:[#allocation4 + $0x18] sm:$0xf]  ;;  %v3055_v61 = vrot.slane %v3053_v58, 4  ;;  %v3069_v53 = vrot.slane %v3067_v63, 4  ;;  %v3081_v57 = vld [vmem:[#allocation4 + $0x21] sm:$0xf] }
 0x33b   : > { %v3079_v0 = vld [vmem:[#allocation4 + $0x19] sm:$0xf]  ;;  %3066 = vst [vmem:[#allocation6 + $0xa8] sm:$0xf] %v3065_v59  ;;  %3029 = vst [vmem:[#allocation6 + $0x90] sm:$0xf0] %v3027_v55 }
 0x33c   : > { %3080 = vst [vmem:[#allocation6 + $0xb0] sm:$0xf] %v3079_v0  ;;  %v3093_v1 = vld [vmem:[#allocation4 + $0x1a] sm:$0xf]  ;;  %3043 = vst [vmem:[#allocation6 + $0x98] sm:$0xf0] %v3041_v56 }
 0x33d   : > { %v3083_v3 = vrot.slane %v3081_v57, 4  ;;  %v3095_v5 = vld [vmem:[#allocation4 + $0x22] sm:$0xf]  ;;  %v3102_v6 = vld [vmem:[#allocation4 + $0x18] sm:$0xf]  ;;  %v3143_v19 = vld [vmem:[#allocation6] sm:$0xff] }
 0x33e   : > { %3057 = vst [vmem:[#allocation6 + $0xa0] sm:$0xf0] %v3055_v61  ;;  %3094 = vst [vmem:[#allocation6 + $0xb8] sm:$0xf] %v3093_v1  ;;  %v3097_v8 = vrot.slane %v3095_v5, 4  ;;  %v3104_v9 = vrot.slane %v3102_v6, 4 }
 0x33f   : > { %v3107_v10 = vld [vmem:[#allocation4 + $0x20] sm:$0xf]  ;;  %v3117_v12 = vld [vmem:[#allocation4 + $0x19] sm:$0xf]  ;;  %3071 = vst [vmem:[#allocation6 + $0xa8] sm:$0xf0] %v3069_v53 }
 0x340   : > { %3108 = vst [vmem:[#allocation6 + $0xc0] sm:$0xf] %v3107_v10  ;;  %v3119_v13 = vrot.slane %v3117_v12, 4  ;;  %v3122_v14 = vld [vmem:[#allocation4 + $0x21] sm:$0xf]  ;;  %v3144_v16 = vld [vmem:[#allocation6 + $0x8] sm:$0xff] }
 0x341   : > { %v3131_v15 = vld [vmem:[#allocation4 + $0x1a] sm:$0xf]  ;;  %3085 = vst [vmem:[#allocation6 + $0xb0] sm:$0xf0] %v3083_v3  ;;  %v3136_v4 = vld [vmem:[#allocation4 + $0x22] sm:$0xf] }
 0x342   : > { %v3133_v17 = vrot.slane %v3131_v15, 4  ;;  %3099 = vst [vmem:[#allocation6 + $0xb8] sm:$0xf0] %v3097_v8  ;;  %3106 = vst [vmem:[#allocation6 + $0x30] sm:$0xf0] %v3104_v9  ;;  %v3145_v20 = vld [vmem:[#allocation6 + $0x10] sm:$0xff] }
 0x343   : > { %3123 = vst [vmem:[#allocation6 + $0xc8] sm:$0xf] %v3122_v14  ;;  %4300 = vst [vmem:[#allocation6 + $0x8] sm:$0xf] %v4298_v41  ;;  %v3058_v18 = vld [vmem:[#allocation4 + $0x8] sm:$0xf] }
 0x344   : > { %3137 = vst [vmem:[#allocation6 + $0xd0] sm:$0xf] %v3136_v4  ;;  %3121 = vst [vmem:[#allocation6 + $0x38] sm:$0xf0] %v3119_v13  ;;  %v3086_v21 = vld [vmem:[#allocation4 + $0xa] sm:$0xf] }
 0x345   : > { %3059 = vst [vmem:[#allocation6 + $0x18] sm:$0xf] %v3058_v18  ;;  %4299 = vst [vmem:[#allocation6] sm:$0xf] %v4297_v2  ;;  %v3072_v60 = vld [vmem:[#allocation4 + $0x9] sm:$0xf] }
 0x346   : > { %3135 = vst [vmem:[#allocation6 + $0x40] sm:$0xf0] %v3133_v17  ;;  %4333 = vst [vmem:[#allocation6 + $0x10] sm:$0xf] %v4329_v7  ;;  %v3153_v25 = vld [vmem:[#allocation6 + $0x98] sm:$0xff]  ;;  %v3152_v29 = vld [vmem:[#allocation6 + $0x90] sm:$0xff] }
 0x347   : > { %3087 = vst [vmem:[#allocation6 + $0x28] sm:$0xf] %v3086_v21  ;;  %3073 = vst [vmem:[#allocation6 + $0x20] sm:$0xf] %v3072_v60  ;;  %v3162_v26 = vpack.c.bf16 %v3153_v25, %v3144_v16  ;;  %v3161_v28 = vpack.c.bf16 %v3152_v29, %v3143_v19  ;;  %v3154_v30 = vld [vmem:[#allocation6 + $0xa0] sm:$0xff]  ;;  %v3155_v62 = vld [vmem:[#allocation6 + $0xa8] sm:$0xff] }
 0x348   : > { %v7505_v31 = vld [vmem:[%s9478_s5 + $0x264] ss:$8 sps:$4 sm:$0xff]   ;;  %v3163_v35 = vpack.c.bf16 %v3154_v30, %v3145_v20  ;;  %v7500_v39 = vld [vmem:[%s9478_s5 + $0x370] ss:$8 sps:$4 sm:$0xff]   ;;  %v7503_v47 = vld [vmem:[%s9478_s5 + $0x260] ss:$8 sps:$4 sm:$0xff]  }
 0x349   : > { %4078 = vmatprep.mubr.bf16.mxu0 %v3162_v26  ;;  %v3157_v33 = vld [vmem:[#allocation6 + $0xb8] sm:$0xff]  ;;  %v7508_v49 = vld [vmem:[%s9478_s5 + $0x364] ss:$8 sps:$4 sm:$0xff]   ;;  %v7506_v52 = vld [vmem:[%s9478_s5 + $0x360] ss:$8 sps:$4 sm:$0xff]  }
 0x34a   : > { %4079 = vmatmul.mubr.bf16.vlgmr.msra.gmra.mxu0 %v3161_v28  ;;  %v3159_v45 = vld [vmem:[#allocation6 + $0xc8] sm:$0xff]  ;;  %v7511_v51 = vld [vmem:[%s9478_s5 + $0x254] ss:$8 sps:$4 sm:$0xff]   ;;  %v7509_v54 = vld [vmem:[%s9478_s5 + $0x250] ss:$8 sps:$4 sm:$0xff]  }
 0x34b   : > { %4133 = vmatpush1.bf16.msra.mxu0 %v7497_v27  ;;  %v3150_v36 = vld [vmem:[#allocation6 + $0x38] sm:$0xff]  ;;  %v7517_v56 = vld [vmem:[%s9478_s5 + $0x244] ss:$8 sps:$4 sm:$0xff]   ;;  %v7515_v59 = vld [vmem:[%s9478_s5 + $0x240] ss:$8 sps:$4 sm:$0xff]  }
 0x34c   : > { %v3146_v34 = vld [vmem:[#allocation6 + $0x18] sm:$0xff]  ;;  %4134 = vmatprep.subr.bf16.mxu0 %v7505_v31  ;;  %v3168_v50 = vpack.c.bf16 %v3159_v45, %v3150_v36  ;;  %v7520_v61 = vld [vmem:[%s9478_s5 + $0x344] ss:$8 sps:$4 sm:$0xff]   ;;  %v7518_v0 = vld [vmem:[%s9478_s5 + $0x340] ss:$8 sps:$4 sm:$0xff]  }
 0x34d   : > { %v3164_v37 = vpack.c.bf16 %v3155_v62, %v3146_v34  ;;  %4334 = vst [vmem:[#allocation6 + $0x18] sm:$0xf] %v4330_v23  ;;  %v7514_v55 = vld [vmem:[%s9478_s5 + $0x354] ss:$8 sps:$4 sm:$0xff]   ;;  %v7512_v58 = vld [vmem:[%s9478_s5 + $0x350] ss:$8 sps:$4 sm:$0xff]  }
 0x34e   : > { %v3148_v40 = vld [vmem:[#allocation6 + $0x28] sm:$0xff]  ;;  %v8791_v42 = vld [vmem:[#allocation6 + $0x20] sm:$0xff]  ;;  %v7523_v63 = vld [vmem:[%s9478_s5 + $0x234] ss:$8 sps:$4 sm:$0xff]  }
 0x34f   : > { %v3166_v43 = vpack.c.bf16 %v3157_v33, %v3148_v40  ;;  %4374 = vst [vmem:[#allocation6 + $0x28] sm:$0xf] %v4370_v11  ;;  %4373 = vst [vmem:[#allocation6 + $0x20] sm:$0xf] %v4369_v32  ;;  %4121 = vmatprep.mubr.bf16.mxu1 %v3164_v37  ;;  %4135 = vmatpush1.bf16.msra.mxu0 %v7503_v47  ;;  %v7521_v41 = vld [vmem:[%s9478_s5 + $0x230] ss:$8 sps:$4 sm:$0xff]  }
 0x350   : > { %4122 = vmatmul.mubr.bf16.vlgmr.msra.gmra.mxu1 %v3163_v35  ;;  %4136 = vmatprep.subr.bf16.mxu0 %v7511_v51  ;;  %v7526_v53 = vld [vmem:[%s9478_s5 + $0x334] ss:$8 sps:$4 sm:$0xff]   ;;  %v7529_v57 = vld [vmem:[%s9478_s5 + $0x224] ss:$8 sps:$4 sm:$0xff]   ;;  %v7524_v1 = vld [vmem:[%s9478_s5 + $0x330] ss:$8 sps:$4 sm:$0xff]  }
 0x351   : > { %4164 = vmatprep.mubr.bf16.mxu0 %v3166_v43  ;;  %4176 = vmatpush1.bf16.msra.mxu1 %v7500_v39  ;;  %v7527_v2 = vld [vmem:[%s9478_s5 + $0x220] ss:$8 sps:$4 sm:$0xff]   ;;  %v7532_v3 = vld [vmem:[%s9478_s5 + $0x324] ss:$8 sps:$4 sm:$0xff]   ;;  %v7535_v5 = vld [vmem:[%s9478_s5 + $0x214] ss:$8 sps:$4 sm:$0xff]  }
 0x352   : > { %4207 = vmatprep.mubr.bf16.mxu1 %v3168_v50  ;;  %4177 = vmatprep.subr.bf16.mxu1 %v7508_v49  ;;  %v7530_v6 = vld [vmem:[%s9478_s5 + $0x320] ss:$8 sps:$4 sm:$0xff]   ;;  %v7533_v7 = vld [vmem:[%s9478_s5 + $0x210] ss:$8 sps:$4 sm:$0xff]   ;;  %v7538_v8 = vld [vmem:[%s9478_s5 + $0x314] ss:$8 sps:$4 sm:$0xff]  }
 0x353   : > { %4137 = vmatpush1.bf16.msra.mxu0 %v7509_v54  ;;  %v7541_v9 = vld [vmem:[%s9478_s5 + $0x204] ss:$8 sps:$4 sm:$0xff]   ;;  %v7536_v10 = vld [vmem:[%s9478_s5 + $0x310] ss:$8 sps:$4 sm:$0xff]   ;;  %v7539_v12 = vld [vmem:[%s9478_s5 + $0x200] ss:$8 sps:$4 sm:$0xff]  }
 0x354   : > { %4138 = vmatprep.subr.bf16.mxu0 %v7517_v56  ;;  %v7544_v13 = vld [vmem:[%s9478_s5 + $0x304] ss:$8 sps:$4 sm:$0xff]   ;;  %v7547_v14 = vld [vmem:[%s9478_s5 + $0x2f4] ss:$8 sps:$4 sm:$0xff]   ;;  %v7542_v15 = vld [vmem:[%s9478_s5 + $0x300] ss:$8 sps:$4 sm:$0xff]  }
 0x355   : > { %4178 = vmatpush1.bf16.msra.mxu1 %v7506_v52  ;;  %v7545_v16 = vld [vmem:[%s9478_s5 + $0x2f0] ss:$8 sps:$4 sm:$0xff]   ;;  %v7550_v17 = vld [vmem:[%s9478_s5 + $0x3f4] ss:$8 sps:$4 sm:$0xff]   ;;  %v7553_v4 = vld [vmem:[%s9478_s5 + $0x2e4] ss:$8 sps:$4 sm:$0xff]  }
 0x356   : > { %4179 = vmatprep.subr.bf16.mxu1 %v7514_v55  ;;  %v7548_v18 = vld [vmem:[%s9478_s5 + $0x3f0] ss:$8 sps:$4 sm:$0xff]   ;;  %v7551_v19 = vld [vmem:[%s9478_s5 + $0x2e0] ss:$8 sps:$4 sm:$0xff]   ;;  %v7556_v20 = vld [vmem:[%s9478_s5 + $0x3e4] ss:$8 sps:$4 sm:$0xff]  }
 0x357   : > { %4139 = vmatpush1.bf16.msra.mxu0 %v7515_v59  ;;  %v7559_v21 = vld [vmem:[%s9478_s5 + $0x2d4] ss:$8 sps:$4 sm:$0xff]   ;;  %v7554_v60 = vld [vmem:[%s9478_s5 + $0x3e0] ss:$8 sps:$4 sm:$0xff]   ;;  %v7565_v25 = vld [vmem:[%s9478_s5 + $0x2c4] ss:$8 sps:$4 sm:$0xff]  }
 0x358   : > { %4140 = vmatprep.subr.bf16.mxu0 %v7523_v63  ;;  %v7562_v24 = vld [vmem:[%s9478_s5 + $0x3d4] ss:$8 sps:$4 sm:$0xff]   ;;  %v7560_v29 = vld [vmem:[%s9478_s5 + $0x3d0] ss:$8 sps:$4 sm:$0xff]   ;;  %v7563_v38 = vld [vmem:[%s9478_s5 + $0x2c0] ss:$8 sps:$4 sm:$0xff]  }
 0x359   : > { %4180 = vmatpush1.bf16.msra.mxu1 %v7512_v58  ;;  %v7568_v26 = vld [vmem:[%s9478_s5 + $0x3c4] ss:$8 sps:$4 sm:$0xff]   ;;  %v7571_v27 = vld [vmem:[%s9478_s5 + $0x2b4] ss:$8 sps:$4 sm:$0xff]   ;;  %v7566_v28 = vld [vmem:[%s9478_s5 + $0x3c0] ss:$8 sps:$4 sm:$0xff]  }
 0x35a   : > { %4181 = vmatprep.subr.bf16.mxu1 %v7520_v61  ;;  %v7569_v23 = vld [vmem:[%s9478_s5 + $0x2b0] ss:$8 sps:$4 sm:$0xff]   ;;  %v7574_v30 = vld [vmem:[%s9478_s5 + $0x3b4] ss:$8 sps:$4 sm:$0xff]   ;;  %v7577_v31 = vld [vmem:[%s9478_s5 + $0x2a4] ss:$8 sps:$4 sm:$0xff]  }
 0x35b   : > { %4141 = vmatpush1.bf16.msra.mxu0 %v7521_v41  ;;  %v7572_v62 = vld [vmem:[%s9478_s5 + $0x3b0] ss:$8 sps:$4 sm:$0xff]   ;;  %v7575_v11 = vld [vmem:[%s9478_s5 + $0x2a0] ss:$8 sps:$4 sm:$0xff]   ;;  %v7580_v32 = vld [vmem:[%s9478_s5 + $0x3a4] ss:$8 sps:$4 sm:$0xff]  }
 0x35c   : > { %4142 = vmatprep.subr.bf16.mxu0 %v7529_v57  ;;  %v7583_v33 = vld [vmem:[%s9478_s5 + $0x294] ss:$8 sps:$4 sm:$0xff]   ;;  %v7578_v34 = vld [vmem:[%s9478_s5 + $0x3a0] ss:$8 sps:$4 sm:$0xff]   ;;  %v7581_v35 = vld [vmem:[%s9478_s5 + $0x290] ss:$8 sps:$4 sm:$0xff]  }
 0x35d   : > { %4182 = vmatpush1.bf16.msra.mxu1 %v7518_v0  ;;  %v7586_v36 = vld [vmem:[%s9478_s5 + $0x394] ss:$8 sps:$4 sm:$0xff]   ;;  %v7589_v37 = vld [vmem:[%s9478_s5 + $0x284] ss:$8 sps:$4 sm:$0xff]   ;;  %v7584_v39 = vld [vmem:[%s9478_s5 + $0x390] ss:$8 sps:$4 sm:$0xff]  }
 0x35e   : > { %4183 = vmatprep.subr.bf16.mxu1 %v7526_v53  ;;  %v7587_v40 = vld [vmem:[%s9478_s5 + $0x280] ss:$8 sps:$4 sm:$0xff]   ;;  %v7592_v43 = vld [vmem:[%s9478_s5 + $0x384] ss:$8 sps:$4 sm:$0xff]   ;;  %v7595_v45 = vld [vmem:[%s9478_s5 + $0x474] ss:$8 sps:$4 sm:$0xff]  }
 0x35f   : > { %4143 = vmatpush1.bf16.msra.mxu0 %v7527_v2  ;;  %v3156_v47 = vld [vmem:[#allocation6 + $0xb0] sm:$0xff]  ;;  %v7590_v49 = vld [vmem:[%s9478_s5 + $0x380] ss:$8 sps:$4 sm:$0xff]   ;;  %v7598_v54 = vld [vmem:[%s9478_s5 + $0x464] ss:$8 sps:$4 sm:$0xff]   ;;  %v7781_v59 = vmov 0  }
 0x360   : > { %4144 = vmatprep.subr.bf16.mxu0 %v7535_v5  ;;  %v7593_v50 = vld [vmem:[%s9478_s5 + $0x470] ss:$8 sps:$4 sm:$0xff]   ;;  %v3165_v51 = vpack.c.bf16 %v3156_v47, %v8791_v42  ;;  %v3158_v55 = vld [vmem:[#allocation6 + $0xc0] sm:$0xff]  ;;  %v7601_v42 = vld [vmem:[%s9478_s5 + $0x454] ss:$8 sps:$4 sm:$0xff]  }
 0x361   : > { %4184 = vmatpush1.bf16.msra.mxu1 %v7524_v1  ;;  %v3149_v52 = vld [vmem:[#allocation6 + $0x30] sm:$0xff]  ;;  %v7596_v58 = vld [vmem:[%s9478_s5 + $0x460] ss:$8 sps:$4 sm:$0xff]   ;;  %v7604_v63 = vld [vmem:[%s9478_s5 + $0x444] ss:$8 sps:$4 sm:$0xff]  }
 0x362   : > { %4185 = vmatprep.subr.bf16.mxu1 %v7532_v3  ;;  %v3167_v56 = vpack.c.bf16 %v3158_v55, %v3149_v52  ;;  %v7599_v61 = vld [vmem:[%s9478_s5 + $0x450] ss:$8 sps:$4 sm:$0xff]   ;;  %v7602_v0 = vld [vmem:[%s9478_s5 + $0x440] ss:$8 sps:$4 sm:$0xff]   ;;  %v7607_v41 = vld [vmem:[%s9478_s5 + $0x434] ss:$8 sps:$4 sm:$0xff]  }
 0x363   : > { %4145 = vmatpush1.bf16.msra.mxu0 %v7533_v7  ;;  %v7605_v53 = vld [vmem:[%s9478_s5 + $0x430] ss:$8 sps:$4 sm:$0xff]   ;;  %v7610_v57 = vld [vmem:[%s9478_s5 + $0x424] ss:$8 sps:$4 sm:$0xff]   ;;  %v7608_v1 = vld [vmem:[%s9478_s5 + $0x420] ss:$8 sps:$4 sm:$0xff]  }
 0x364   : > { %4146 = vmatprep.subr.bf16.mxu0 %v7541_v9  ;;  %v7613_v2 = vld [vmem:[%s9478_s5 + $0x414] ss:$8 sps:$4 sm:$0xff]   ;;  %v7611_v3 = vld [vmem:[%s9478_s5 + $0x410] ss:$8 sps:$4 sm:$0xff]   ;;  %v7616_v5 = vld [vmem:[%s9478_s5 + $0x404] ss:$8 sps:$4 sm:$0xff]  }
 0x365   : > { %4186 = vmatpush1.bf16.msra.mxu1 %v7530_v6  ;;  %v7614_v6 = vld [vmem:[%s9478_s5 + $0x400] ss:$8 sps:$4 sm:$0xff]  }
 0x366   : > { %4187 = vmatprep.subr.bf16.mxu1 %v7538_v8  ;;  %v3151_v7 = vld [vmem:[#allocation6 + $0x40] sm:$0xff]  ;;  %v3160_v8 = vld [vmem:[#allocation6 + $0xd0] sm:$0xff] }
 0x367   : > { %4147 = vmatpush1.bf16.msra.mxu0 %v7539_v12  ;;  %v3169_v9 = vpack.c.bf16 %v3160_v8, %v3151_v7  ;;  %v7618_v12 = vld [vmem:[%s9480_s7 + $0xf8] sm:$0xff]  }
 0x368   : > { %4148 = vmatprep.subr.bf16.mxu0 %v7547_v14  ;;  %v7620_v14 = vld [vmem:[%s9480_s7 + $0xb8] sm:$0xff]  }
 0x369   : > { %4188 = vmatpush1.bf16.msra.mxu1 %v7536_v10  ;;  %v7617_v10 = vld [vmem:[%s9480_s7 + $0x78] sm:$0xff]  }
 0x36a   : > { %4189 = vmatprep.subr.bf16.mxu1 %v7544_v13  ;;  %v7619_v13 = vld [vmem:[%s9480_s7 + $0x38] sm:$0xff]  }
 0x36b   : > { %4149 = vmatpush2.bf16.msra.mxu0 %v7545_v16  ;;  %v7622_v16 = vld [vmem:[%s9480_s7 + $0xf0] sm:$0xff]  }
 0x36c   : > { %4150 = vmatprep.subr.bf16.mxu0 %v7553_v4  ;;  %v7624_v4 = vld [vmem:[%s9480_s7 + $0xb0] sm:$0xff]  }
 0x36d   : > { %4190 = vmatpush1.bf16.msra.mxu1 %v7542_v15  ;;  %v7621_v15 = vld [vmem:[%s9480_s7 + $0x70] sm:$0xff]  }
 0x36e   : > { %4191 = vmatprep.subr.bf16.mxu1 %v7550_v17  ;;  %v7623_v17 = vld [vmem:[%s9480_s7 + $0x30] sm:$0xff]  }
 0x36f   : > { %4151 = vmatpush2.bf16.msra.mxu0 %v7551_v19  ;;  %v7626_v19 = vld [vmem:[%s9480_s7 + $0xe8] sm:$0xff]  }
 0x370   : > { %4152 = vmatprep.subr.bf16.mxu0 %v7559_v21  ;;  %v7628_v21 = vld [vmem:[%s9480_s7 + $0xa8] sm:$0xff]  }
 0x371   : > { %4192 = vmatpush2.bf16.msra.mxu1 %v7548_v18  ;;  %v7625_v18 = vld [vmem:[%s9480_s7 + $0x68] sm:$0xff]  }
 0x372   : > { %4193 = vmatprep.subr.bf16.mxu1 %v7556_v20  ;;  %v7627_v20 = vld [vmem:[%s9480_s7 + $0x28] sm:$0xff]  }
 0x373   : > { %4153 = vmatpush2.bf16.msra.mxu0 %v7557_v22  ;;  %v7630_v22 = vld [vmem:[%s9480_s7 + $0xe0] sm:$0xff]  }
 0x374   : > { %4154 = vmatprep.subr.bf16.mxu0 %v7565_v25  ;;  %v7632_v25 = vld [vmem:[%s9480_s7 + $0xa0] sm:$0xff]  }
 0x375   : > { %4194 = vmatpush2.bf16.msra.mxu1 %v7554_v60  ;;  %v7629_v60 = vld [vmem:[%s9480_s7 + $0x60] sm:$0xff]  }
 0x376   : > { %4195 = vmatprep.subr.bf16.mxu1 %v7562_v24  ;;  %v7631_v24 = vld [vmem:[%s9480_s7 + $0x20] sm:$0xff]  }
 0x377   : > { %4155 = vmatpush2.bf16.msra.mxu0 %v7563_v38  ;;  %v7634_v38 = vld [vmem:[%s9480_s7 + $0xd8] sm:$0xff]  }
 0x378   : > { %4156 = vmatprep.subr.bf16.mxu0 %v7571_v27  ;;  %v7636_v27 = vld [vmem:[%s9480_s7 + $0x98] sm:$0xff]  }
 0x379   : > { %4196 = vmatpush2.bf16.msra.mxu1 %v7560_v29  ;;  %v7633_v29 = vld [vmem:[%s9480_s7 + $0x58] sm:$0xff]  }
 0x37a   : > { %4197 = vmatprep.subr.bf16.mxu1 %v7568_v26  ;;  %v7635_v26 = vld [vmem:[%s9480_s7 + $0x18] sm:$0xff]  }
 0x37b   : > { %4157 = vmatpush2.bf16.msra.mxu0 %v7569_v23  ;;  %v7638_v23 = vld [vmem:[%s9480_s7 + $0xd0] sm:$0xff]  }
 0x37c   : > { %4158 = vmatprep.subr.bf16.mxu0 %v7577_v31  ;;  %v7640_v31 = vld [vmem:[%s9480_s7 + $0x90] sm:$0xff]  }
 0x37d   : > { %4198 = vmatpush2.bf16.msra.mxu1 %v7566_v28  ;;  %v7637_v28 = vld [vmem:[%s9480_s7 + $0x50] sm:$0xff]  }
 0x37e   : > { %4199 = vmatprep.subr.bf16.mxu1 %v7574_v30  ;;  %v7639_v30 = vld [vmem:[%s9480_s7 + $0x10] sm:$0xff]  }
 0x37f   : > { %4159 = vmatpush2.bf16.msra.mxu0 %v7575_v11  ;;  %v7642_v11 = vld [vmem:[%s9480_s7 + $0xc8] sm:$0xff]  }
 0x380   : > { %4160 = vmatprep.subr.bf16.mxu0 %v7583_v33  ;;  %v7644_v33 = vld [vmem:[%s9480_s7 + $0x88] sm:$0xff]  }
 0x381   : > { %4200 = vmatpush2.bf16.msra.mxu1 %v7572_v62  ;;  %v7641_v62 = vld [vmem:[%s9480_s7 + $0x48] sm:$0xff]  }
 0x382   : > { %4201 = vmatprep.subr.bf16.mxu1 %v7580_v32  ;;  %v7643_v32 = vld [vmem:[%s9480_s7 + $0x8] sm:$0xff]  }
 0x383   : > { %4161 = vmatpush2.bf16.msra.mxu0 %v7581_v35  ;;  %v7646_v35 = vld [vmem:[%s9480_s7 + $0xc0] sm:$0xff]  }
 0x384   : > { %4162 = vmatprep.subr.bf16.mxu0 %v7589_v37  ;;  %v7648_v37 = vld [vmem:[%s9480_s7 + $0x80] sm:$0xff]  }
 0x385   : > { %4202 = vmatpush2.bf16.msra.mxu1 %v7578_v34  ;;  %v7645_v34 = vld [vmem:[%s9480_s7 + $0x40] sm:$0xff]  }
 0x386   : > { %4203 = vmatprep.subr.bf16.mxu1 %v7586_v36  ;;  %v7647_v36 = vld [vmem:[%s9480_s7] sm:$0xff]  }
 0x387   : > { %4163 = vmatpush2.bf16.msra.mxu0 %v7587_v40  ;;  %v7650_v40 = vld [vmem:[%s9480_s7 + $0x1f8] sm:$0xff]  }
 0x388   : > { %4218 = vmatprep.subr.bf16.mxu0 %v7595_v45 }
 0x389   : > { %4204 = vmatpush2.bf16.msra.mxu1 %v7584_v39  ;;  %v7649_v39 = vld [vmem:[%s9480_s7 + $0x178] sm:$0xff]  }
 0x38a   : > { %4205 = vmatprep.subr.bf16.mxu1 %v7592_v43  ;;  %4165 = vmatmul.mubr.bf16.vlgmr.msra.gmra.mxu0 %v3165_v51  ;;  %v3314_v51 = vld [vmem:[%s9479_s6] sm:$0x3] }
 0x38b   : > { %4219 = vmatpush1.bf16.msra.mxu0 %v7593_v50  ;;  %4250 = vmatprep.mubr.bf16.mxu0 %v7781_v59 }
 0x38c   : > { %4220 = vmatprep.subr.bf16.mxu0 %v7598_v54  ;;  %v3319_v54 = vrot.slane %v3314_v51, %v695_v46 }
 0x38d   : > { %4206 = vmatpush2.bf16.msra.mxu1 %v7590_v49 }
 0x38e   : > { %6974 = vmatprep.subr.bf16.mxu1 %v7617_v10 }
 0x38f   : > { %4221 = vmatpush1.bf16.msra.mxu0 %v7596_v58  ;;  %v3323_v58 = vrot.slane %v3314_v51, %v699_v48 }
 0x390   : > { %4208 = vmatmul.mubr.bf16.vlgmr.msra.gmra.mxu1 %v3167_v56  ;;  %4222 = vmatprep.subr.bf16.mxu0 %v7601_v42 }
 0x391   : > { %6975 = vmatpush3.bf16.msra.mxu1 %v7619_v13 }
 0x392   : > { %6976 = vmatprep.subr.bf16.mxu1 %v7621_v15 }
 0x393   : > { %4223 = vmatpush1.bf16.msra.mxu0 %v7599_v61 }
 0x394   : > { %4224 = vmatprep.subr.bf16.mxu0 %v7604_v63 }
 0x395   : > { %6977 = vmatpush3.bf16.msra.mxu1 %v7623_v17 }
 0x396   : > { %6978 = vmatprep.subr.bf16.mxu1 %v7625_v18 }
 0x397   : > { %4225 = vmatpush1.bf16.msra.mxu0 %v7602_v0 }
 0x398   : > { %4226 = vmatprep.subr.bf16.mxu0 %v7607_v41 }
 0x399   : > { %6979 = vmatpush3.bf16.msra.mxu1 %v7627_v20 }
 0x39a   : > { %6980 = vmatprep.subr.bf16.mxu1 %v7629_v60 }
 0x39b   : > { %4227 = vmatpush1.bf16.msra.mxu0 %v7605_v53 }
 0x39c   : > { %4228 = vmatprep.subr.bf16.mxu0 %v7610_v57 }
 0x39d   : > { %6981 = vmatpush3.bf16.msra.mxu1 %v7631_v24 }
 0x39e   : > { %6982 = vmatprep.subr.bf16.mxu1 %v7633_v29 }
 0x39f   : > { %4229 = vmatpush1.bf16.msra.mxu0 %v7608_v1 }
 0x3a0   : > { %4230 = vmatprep.subr.bf16.mxu0 %v7613_v2 }
 0x3a1   : > { %6983 = vmatpush3.bf16.msra.mxu1 %v7635_v26 }
 0x3a2   : > { %6984 = vmatprep.subr.bf16.mxu1 %v7637_v28 }
 0x3a3   : > { %4231 = vmatpush1.bf16.msra.mxu0 %v7611_v3 }
 0x3a4   : > { %4232 = vmatprep.subr.bf16.mxu0 %v7616_v5 }
 0x3a5   : > { %6985 = vmatpush3.bf16.msra.mxu1 %v7639_v30 }
 0x3a6   : > { %6986 = vmatprep.subr.bf16.mxu1 %v7641_v62 }
 0x3a7   : > { %4233 = vmatpush1.bf16.msra.mxu0 %v7614_v6 }
 0x3a8   : > { %6996 = vmatprep.subr.bf16.mxu0 %v7618_v12 }
 0x3a9   : > { %6987 = vmatpush3.bf16.msra.mxu1 %v7643_v32 }
 0x3aa   : > { %4251 = vmatmul.mubr.bf16.vlgmr.msra.gmra.mxu0 %v3169_v9  ;;  %6988 = vmatprep.subr.bf16.mxu1 %v7645_v34 }
 0x3ab   : > { %6997 = vmatpush3.bf16.msra.mxu0 %v7620_v14 }
 0x3ac   : > { %6998 = vmatprep.subr.bf16.mxu0 %v7622_v16 }
 0x3ad   : > { %6989 = vmatpush3.bf16.msra.mxu1 %v7647_v36 }
 0x3ae   : > { %7018 = vmatprep.subr.bf16.mxu1 %v7649_v39 }
 0x3af   : > { %6999 = vmatpush3.bf16.msra.mxu0 %v7624_v4 }
 0x3b0   : > { %7000 = vmatprep.subr.bf16.mxu0 %v7626_v19 }
 0x3b3   : > { %7001 = vmatpush3.bf16.msra.mxu0 %v7628_v21 }
 0x3b4   : > { %7002 = vmatprep.subr.bf16.mxu0 %v7630_v22 }
 0x3b7   : > { %7003 = vmatpush3.bf16.msra.mxu0 %v7632_v25 }
 0x3b8   : > { %7004 = vmatprep.subr.bf16.mxu0 %v7634_v38 }
 0x3bb   : > { %7005 = vmatpush3.bf16.msra.mxu0 %v7636_v27 }
 0x3bc   : > { %7006 = vmatprep.subr.bf16.mxu0 %v7638_v23 }
 0x3bf   : > { %7007 = vmatpush3.bf16.msra.mxu0 %v7640_v31 }
 0x3c0   : > { %7008 = vmatprep.subr.bf16.mxu0 %v7642_v11 }
 0x3c3   : > { %7009 = vmatpush3.bf16.msra.mxu0 %v7644_v33 }
 0x3c4   : > { %7010 = vmatprep.subr.bf16.mxu0 %v7646_v35 }
 0x3c7   : > { %7011 = vmatpush3.bf16.msra.mxu0 %v7648_v37 }
 0x3c8   : > { %7040 = vmatprep.subr.bf16.mxu0 %v7650_v40 }
 0x40a   : > { %v4080_v43 = vpop.f32.mrf.mxu0 }
 0x40b   : > { %v4081_v59 = vadd.f32 %v4080_v43, %v3319_v54 }
 0x40c   : > { %v4082_v45 = vpop.f32.mrf.mxu0 }
 0x40d   : > { %v4083_v63 = vadd.f32 %v4082_v45, %v3323_v58 }
 0x40e   : > { %v4084_v49 = vpop.f32.mrf.mxu0 }
 0x40f   : > { %v4085_v53 = vadd.f32 %v4084_v49, %v3319_v54 }
 0x410   : > { %v4123_v47 = vpop.f32.mrf.mxu1  ;;  %v4086_v52 = vpop.f32.mrf.mxu0 }
 0x411   : > { %v4124_v41 = vadd.f32 %v4123_v47, %v4081_v59  ;;  %v4087_v1 = vadd.f32 %v4086_v52, %v3323_v58 }
 0x412   : > { %v4125_v50 = vpop.f32.mrf.mxu1 }
 0x413   : > { %v4126_v2 = vadd.f32 %v4125_v50, %v4083_v63 }
 0x414   : > { %v4127_v55 = vpop.f32.mrf.mxu1 }
 0x415   : > { %v4128_v6 = vadd.f32 %v4127_v55, %v4085_v53 }
 0x416   : > { %v4129_v42 = vpop.f32.mrf.mxu1 }
 0x417   : > { %v4130_v8 = vadd.f32 %v4129_v42, %v4087_v1 }
 0x44a   : > { %v4166_v56 = vpop.f32.mrf.mxu0 }
 0x44b   : > { %v4167_v3 = vadd.f32 %v4166_v56, %v4124_v41 }
 0x44c   : > { %v4168_v61 = vpop.f32.mrf.mxu0 }
 0x44d   : > { %v4169_v7 = vadd.f32 %v4168_v61, %v4126_v2 }
 0x44e   : > { %v4170_v57 = vpop.f32.mrf.mxu0 }
 0x44f   : > { %v4171_v10 = vadd.f32 %v4170_v57, %v4128_v6 }
 0x450   : > { %v4209_v0 = vpop.f32.mrf.mxu1  ;;  %v4172_v46 = vpop.f32.mrf.mxu0 }
 0x451   : > { %v4210_v9 = vadd.f32 %v4209_v0, %v4167_v3  ;;  %v4173_v48 = vadd.f32 %v4172_v46, %v4130_v8 }
 0x452   : > { %v4211_v5 = vpop.f32.mrf.mxu1 }
 0x453   : > { %v4212_v13 = vadd.f32 %v4211_v5, %v4169_v7 }
 0x454   : > { %v4213_v44 = vpop.f32.mrf.mxu1 }
 0x455   : > { %v4214_v16 = vadd.f32 %v4213_v44, %v4171_v10 }
 0x456   : > { %v4215_v17 = vpop.f32.mrf.mxu1 }
 0x457   : > { %v4216_v19 = vadd.f32 %v4215_v17, %v4173_v48 }
 0x46a   : > { %v4252_v12 = vpop.f32.mrf.mxu0 }
 0x46b   : > { %v4253_v14 = vadd.f32 %v4252_v12, %v4210_v9 }
 0x46c   : > { %v4254_v15 = vpop.f32.mrf.mxu0 }
 0x46d   : > { %v4261_v4 = vmax.f32 %v4253_v14, 0.0  ;;  %v4255_v18 = vadd.f32 %v4254_v15, %v4212_v13 }
 0x46e   : > { %v4256_v20 = vpop.f32.mrf.mxu0 }
 0x46f   : > { %v4267_v21 = vrot.slane %v4261_v4, 7  ;;  %v4274_v60 = vrot.slane %v4261_v4, 3  ;;  %v4262_v22 = vmax.f32 %v4255_v18, 0.0  ;;  %v4257_v24 = vadd.f32 %v4256_v20, %v4214_v16 }
 0x470   : > { %v4258_v25 = vpop.f32.mrf.mxu0 }
 0x471   : > { %4272 = vst [vmem:[#allocation5 + $0x50] sm:$0x1e] %v4267_v21  ;;  %4279 = vst [vmem:[#allocation5 + $0x8] sm:$0x1e] %v4274_v60  ;;  %v4268_v29 = vrot.slane %v4262_v22, 7  ;;  %v4275_v38 = vrot.slane %v4262_v22, 3  ;;  %v4259_v27 = vadd.f32 %v4258_v25, %v4216_v19 }
 0x472   : > { %v4263_v26 = vmax.f32 %v4257_v24, 0.0 }
 0x473   : > { %4273 = vst [vmem:[#allocation5 + $0x30] sm:$0x1e] %v4268_v29  ;;  %4280 = vst [vmem:[#allocation5 + $0x20] sm:$0x1e] %v4275_v38  ;;  %v4264_v30 = vmax.f32 %v4259_v27, 0.0 }
 0x474   : > { %v4283_v28 = vrot.slane %v4263_v26, 7  ;;  %v4290_v23 = vrot.slane %v4263_v26, 3 }
 0x475   : > { %v4284_v31 = vrot.slane %v4264_v30, 7  ;;  %v4291_v62 = vrot.slane %v4264_v30, 3 }
 0x476   : > { %4288 = vst [vmem:[#allocation5 + $0x18] sm:$0x1e] %v4283_v28  ;;  %4295 = vst [vmem:[#allocation5 + $0x38] sm:$0x1e] %v4290_v23 }
 0x477   : > { %4289 = vst [vmem:[#allocation5 + $0x40] sm:$0x1e] %v4284_v31  ;;  %4296 = vst [vmem:[#allocation5 + $0x28] sm:$0x1e] %v4291_v62 }
 0x478   : > { %v4301_v11 = vld [vmem:[#allocation5 + $0x50] sm:$0xf]  ;;  %v4311_v32 = vld [vmem:[#allocation5 + $0x8] sm:$0xf] }
 0x479   : > { %v4335_v33 = vld [vmem:[#allocation5 + $0x50] sm:$0x1e]  ;;  %v4305_v34 = vrot.slane %v4301_v11, 4  ;;  %v4345_v36 = vld [vmem:[#allocation5 + $0x8] sm:$0x1e] }
 0x47a   : > { %v4339_v35 = vrot.slane %v4335_v33, 5  ;;  %v4375_v37 = vld [vmem:[#allocation5 + $0x50] sm:$0x3c]  ;;  %4313 = vst [vmem:[#allocation6 + $0x90] sm:$0xf] %v4311_v32  ;;  %v4349_v39 = vrot.slane %v4345_v36, 1 }
 0x47b   : > { %v4379_v40 = vrot.slane %v4375_v37, 6  ;;  %v4385_v43 = vld [vmem:[#allocation5 + $0x8] sm:$0x3c]  ;;  %v4405_v45 = vld [vmem:[#allocation5 + $0x50] sm:$0xf] }
 0x47c   : > { %v4389_v47 = vrot.slane %v4385_v43, 2  ;;  %v4409_v49 = vld [vmem:[#allocation5 + $0x8] sm:$0xf]  ;;  %v4433_v50 = vld [vmem:[#allocation5 + $0x50] sm:$0x1e] }
 0x47d   : > { %4309 = vst [vmem:[#allocation6] sm:$0xf0] %v4305_v34  ;;  %4343 = vst [vmem:[#allocation6 + $0x10] sm:$0xf0] %v4339_v35  ;;  %v4413_v51 = vrot.slane %v4409_v49, 4  ;;  %v4437_v52 = vrot.slane %v4433_v50, 1 }
 0x47e   : > { %4407 = vst [vmem:[#allocation6 + $0x30] sm:$0xf] %v4405_v45  ;;  %v4443_v54 = vld [vmem:[#allocation5 + $0x8] sm:$0x1e]  ;;  %v4473_v55 = vld [vmem:[#allocation5 + $0x50] sm:$0x3c] }
 0x47f   : > { %4353 = vst [vmem:[#allocation6 + $0xa0] sm:$0xf] %v4349_v39  ;;  %4383 = vst [vmem:[#allocation6 + $0x20] sm:$0xf0] %v4379_v40  ;;  %v4447_v56 = vrot.slane %v4443_v54, 5  ;;  %v4477_v58 = vrot.slane %v4473_v55, 2 }
 0x480   : > { %v4483_v59 = vld [vmem:[#allocation5 + $0x8] sm:$0x3c]  ;;  %4393 = vst [vmem:[#allocation6 + $0xb0] sm:$0xf] %v4389_v47  ;;  %4417 = vst [vmem:[#allocation6 + $0x30] sm:$0xf0] %v4413_v51 }
 0x481   : > { %v4513_v42 = vld [vmem:[#allocation5 + $0x8] sm:$0xf]  ;;  %v4487_v61 = vrot.slane %v4483_v59, 6  ;;  %4441 = vst [vmem:[#allocation6 + $0x40] sm:$0xf] %v4437_v52 }
 0x482   : > { %4515 = vst [vmem:[#allocation6 + $0x60] sm:$0xf] %v4513_v42  ;;  %v4542_v63 = vld [vmem:[#allocation5 + $0x8] sm:$0x1e]  ;;  %4451 = vst [vmem:[#allocation6 + $0x40] sm:$0xf0] %v4447_v56 }
 0x483   : > { %v4582_v0 = vld [vmem:[#allocation5 + $0x8] sm:$0x3c]  ;;  %v4546_v41 = vrot.slane %v4542_v63, 1  ;;  %4481 = vst [vmem:[#allocation6 + $0x50] sm:$0xf] %v4477_v58 }
 0x484   : > { %v4586_v53 = vrot.slane %v4582_v0, 2  ;;  %v4302_v57 = vld [vmem:[#allocation5 + $0x30] sm:$0xf]  ;;  %v4312_v1 = vld [vmem:[#allocation5 + $0x20] sm:$0xf] }
 0x485   : > { %4491 = vst [vmem:[#allocation6 + $0x50] sm:$0xf0] %v4487_v61  ;;  %v4306_v2 = vrot.slane %v4302_v57, 4  ;;  %v4336_v3 = vld [vmem:[#allocation5 + $0x30] sm:$0x1e] }
 0x486   : > { %v4346_v5 = vld [vmem:[#allocation5 + $0x20] sm:$0x1e]  ;;  %4314 = vst [vmem:[#allocation6 + $0x98] sm:$0xf] %v4312_v1  ;;  %4550 = vst [vmem:[#allocation6 + $0x70] sm:$0xf] %v4546_v41 }
 0x487   : > { %4590 = vst [vmem:[#allocation6 + $0x80] sm:$0xf] %v4586_v53  ;;  %v4340_v6 = vrot.slane %v4336_v3, 5  ;;  %v4350_v7 = vrot.slane %v4346_v5, 1  ;;  %v4376_v46 = vld [vmem:[#allocation5 + $0x30] sm:$0x3c] }
 0x488   : > { %v4386_v8 = vld [vmem:[#allocation5 + $0x20] sm:$0x3c]  ;;  %v4380_v9 = vrot.slane %v4376_v46, 6  ;;  %v4406_v44 = vld [vmem:[#allocation5 + $0x30] sm:$0xf] }
 0x489   : > { %v4390_v10 = vrot.slane %v4386_v8, 2  ;;  %v4410_v48 = vld [vmem:[#allocation5 + $0x20] sm:$0xf]  ;;  %4310 = vst [vmem:[#allocation6 + $0x8] sm:$0xf0] %v4306_v2 }
 0x48a   : > { %v4414_v12 = vrot.slane %v4410_v48, 4  ;;  %v4434_v13 = vld [vmem:[#allocation5 + $0x30] sm:$0x1e]  ;;  %v4444_v14 = vld [vmem:[#allocation5 + $0x20] sm:$0x1e] }
 0x48b   : > { %4344 = vst [vmem:[#allocation6 + $0x18] sm:$0xf0] %v4340_v6  ;;  %4354 = vst [vmem:[#allocation6 + $0xa8] sm:$0xf] %v4350_v7  ;;  %v4438_v15 = vrot.slane %v4434_v13, 1  ;;  %v4448_v16 = vrot.slane %v4444_v14, 5 }
 0x48c   : > { %4408 = vst [vmem:[#allocation6 + $0x38] sm:$0xf] %v4406_v44  ;;  %v4474_v17 = vld [vmem:[#allocation5 + $0x30] sm:$0x3c]  ;;  %v4484_v4 = vld [vmem:[#allocation5 + $0x20] sm:$0x3c] }
 0x48d   : > { %4384 = vst [vmem:[#allocation6 + $0x28] sm:$0xf0] %v4380_v9  ;;  %4394 = vst [vmem:[#allocation6 + $0xb8] sm:$0xf] %v4390_v10  ;;  %v4478_v18 = vrot.slane %v4474_v17, 2  ;;  %v4488_v19 = vrot.slane %v4484_v4, 6 }
 0x48e   : > { %v4514_v20 = vld [vmem:[#allocation5 + $0x20] sm:$0xf]  ;;  %4418 = vst [vmem:[#allocation6 + $0x38] sm:$0xf0] %v4414_v12  ;;  %4442 = vst [vmem:[#allocation6 + $0x48] sm:$0xf] %v4438_v15 }
 0x48f   : > { %v4543_v21 = vld [vmem:[#allocation5 + $0x20] sm:$0x1e]  ;;  %4452 = vst [vmem:[#allocation6 + $0x48] sm:$0xf0] %v4448_v16  ;;  %4516 = vst [vmem:[#allocation6 + $0x68] sm:$0xf] %v4514_v20 }
 0x490   : > { %v4547_v60 = vrot.slane %v4543_v21, 1  ;;  %v4583_v22 = vld [vmem:[#allocation5 + $0x20] sm:$0x3c]  ;;  %v4315_v24 = vld [vmem:[#allocation5 + $0x18] sm:$0xf]  ;;  %v4623_v4 = vld [vmem:[#allocation6 + $0x8] sm:$0xff] }
 0x491   : > { %v4587_v25 = vrot.slane %v4583_v22, 2  ;;  %4482 = vst [vmem:[#allocation6 + $0x58] sm:$0xf] %v4478_v18  ;;  %4492 = vst [vmem:[#allocation6 + $0x58] sm:$0xf0] %v4488_v19  ;;  %v4319_v29 = vrot.slane %v4315_v24, 4 }
 0x492   : > { %v4355_v38 = vld [vmem:[#allocation5 + $0x18] sm:$0x1e]  ;;  %4551 = vst [vmem:[#allocation6 + $0x78] sm:$0xf] %v4547_v60  ;;  %v4316_v56 = vld [vmem:[#allocation5 + $0x40] sm:$0xf] }
 0x493   : > { %v4395_v26 = vld [vmem:[#allocation5 + $0x18] sm:$0x3c]  ;;  %v4359_v27 = vrot.slane %v4355_v38, 5  ;;  %4591 = vst [vmem:[#allocation6 + $0x88] sm:$0xf] %v4587_v25  ;;  %v4320_v59 = vrot.slane %v4316_v56, 4 }
 0x494   : > { %v4399_v28 = vrot.slane %v4395_v26, 6  ;;  %v4419_v23 = vld [vmem:[#allocation5 + $0x18] sm:$0xf]  ;;  %4323 = vst [vmem:[#allocation6 + $0x90] sm:$0xf0] %v4319_v29  ;;  %v4622_v38 = vld [vmem:[#allocation6] sm:$0xff] }
 0x495   : > { %v4423_v30 = vld [vmem:[#allocation5 + $0x38] sm:$0xf]  ;;  %4421 = vst [vmem:[#allocation6 + $0xc0] sm:$0xf] %v4419_v23  ;;  %4363 = vst [vmem:[#allocation6 + $0xa0] sm:$0xf0] %v4359_v27 }
 0x496   : > { %v4427_v31 = vrot.slane %v4423_v30, 4  ;;  %v4453_v62 = vld [vmem:[#allocation5 + $0x18] sm:$0x1e]  ;;  %4403 = vst [vmem:[#allocation6 + $0xb0] sm:$0xf0] %v4399_v28  ;;  %v4624_v26 = vld [vmem:[#allocation6 + $0x10] sm:$0xff] }
 0x497   : > { %v4463_v11 = vld [vmem:[#allocation5 + $0x38] sm:$0x1e]  ;;  %v4457_v32 = vrot.slane %v4453_v62, 1  ;;  %v4356_v58 = vld [vmem:[#allocation5 + $0x40] sm:$0x1e]  ;;  %v4627_v62 = vld [vmem:[#allocation6 + $0x28] sm:$0xff] }
 0x498   : > { %v4467_v33 = vrot.slane %v4463_v11, 5  ;;  %v4493_v34 = vld [vmem:[#allocation5 + $0x18] sm:$0x3c]  ;;  %4431 = vst [vmem:[#allocation6 + $0xc0] sm:$0xf0] %v4427_v31  ;;  %v4360_v42 = vrot.slane %v4356_v58, 5 }
 0x499   : > { %v4503_v35 = vld [vmem:[#allocation5 + $0x38] sm:$0x3c]  ;;  %v4497_v36 = vrot.slane %v4493_v34, 2  ;;  %4461 = vst [vmem:[#allocation6 + $0xd0] sm:$0xf] %v4457_v32  ;;  %v7653_v31 = vld [vmem:[%s9480_s7 + $0x170] sm:$0xff]  }
 0x49a   : > { %v4507_v37 = vrot.slane %v4503_v35, 6  ;;  %v4517_v39 = vld [vmem:[#allocation5 + $0x18] sm:$0xf]  ;;  %4471 = vst [vmem:[#allocation6 + $0xd0] sm:$0xf0] %v4467_v33  ;;  %v7654_v32 = vld [vmem:[%s9480_s7 + $0x1f0] sm:$0xff]  }
 0x49b   : > { %v4527_v40 = vld [vmem:[#allocation5 + $0x38] sm:$0xf]  ;;  %v4521_v43 = vrot.slane %v4517_v39, 4  ;;  %4501 = vst [vmem:[#allocation6 + $0xe0] sm:$0xf] %v4497_v36  ;;  %v4640_v18 = vld [vmem:[#allocation6 + $0x90] sm:$0xff] }
 0x49c   : > { %4529 = vst [vmem:[#allocation6 + $0xf0] sm:$0xf] %v4527_v40  ;;  %v4552_v45 = vld [vmem:[#allocation5 + $0x18] sm:$0x1e]  ;;  %4511 = vst [vmem:[#allocation6 + $0xe0] sm:$0xf0] %v4507_v37  ;;  %v4658_v28 = vpack.c.bf16 %v4640_v18, %v4622_v38 }
 0x49d   : > { %v4562_v47 = vld [vmem:[#allocation5 + $0x38] sm:$0x1e]  ;;  %v4556_v49 = vrot.slane %v4552_v45, 5  ;;  %4525 = vst [vmem:[#allocation6 + $0x60] sm:$0xf0] %v4521_v43  ;;  %v4642_v19 = vld [vmem:[#allocation6 + $0xa0] sm:$0xff] }
 0x49e   : > { %v4566_v50 = vrot.slane %v4562_v47, 1  ;;  %v4592_v51 = vld [vmem:[#allocation5 + $0x18] sm:$0x3c]  ;;  %v4396_v61 = vld [vmem:[#allocation5 + $0x40] sm:$0x3c]  ;;  %v4660_v23 = vpack.c.bf16 %v4642_v19, %v4624_v26  ;;  %v7655_v35 = vld [vmem:[%s9480_s7 + $0x130] sm:$0xff]  }
 0x49f   : > { %v4602_v52 = vld [vmem:[#allocation5 + $0x38] sm:$0x3c]  ;;  %v4596_v54 = vrot.slane %v4592_v51, 6  ;;  %4560 = vst [vmem:[#allocation6 + $0x70] sm:$0xf0] %v4556_v49  ;;  %v4400_v0 = vrot.slane %v4396_v61, 6 }
 0x4a0   : > { %v4606_v55 = vrot.slane %v4602_v52, 2  ;;  %4570 = vst [vmem:[#allocation6 + $0x100] sm:$0xf] %v4566_v50  ;;  %v4420_v63 = vld [vmem:[#allocation5 + $0x40] sm:$0xf]  ;;  %v7651_v20 = vld [vmem:[%s9480_s7 + $0x138] sm:$0xff]  }
 0x4a1   : > { %4600 = vst [vmem:[#allocation6 + $0x80] sm:$0xf0] %v4596_v54  ;;  %v4424_v41 = vld [vmem:[#allocation5 + $0x28] sm:$0xf]  ;;  %v4454_v53 = vld [vmem:[#allocation5 + $0x40] sm:$0x1e] }
 0x4a2   : > { %4610 = vst [vmem:[#allocation6 + $0x110] sm:$0xf] %v4606_v55  ;;  %4422 = vst [vmem:[#allocation6 + $0xc8] sm:$0xf] %v4420_v63  ;;  %v4428_v57 = vrot.slane %v4424_v41, 4  ;;  %v4458_v1 = vrot.slane %v4454_v53, 1 }
 0x4a3   : > { %v4464_v2 = vld [vmem:[#allocation5 + $0x28] sm:$0x1e]  ;;  %v4494_v3 = vld [vmem:[#allocation5 + $0x40] sm:$0x3c]  ;;  %4324 = vst [vmem:[#allocation6 + $0x98] sm:$0xf0] %v4320_v59 }
 0x4a4   : > { %4364 = vst [vmem:[#allocation6 + $0xa8] sm:$0xf0] %v4360_v42  ;;  %v4468_v5 = vrot.slane %v4464_v2, 5  ;;  %v4498_v6 = vrot.slane %v4494_v3, 2  ;;  %v4504_v7 = vld [vmem:[#allocation5 + $0x28] sm:$0x3c] }
 0x4a5   : > { %v4518_v46 = vld [vmem:[#allocation5 + $0x40] sm:$0xf]  ;;  %4404 = vst [vmem:[#allocation6 + $0xb8] sm:$0xf0] %v4400_v0  ;;  %v4508_v8 = vrot.slane %v4504_v7, 6  ;;  %v7652_v21 = vld [vmem:[%s9480_s7 + $0x1b8] sm:$0xff]  }
 0x4a6   : > { %v4522_v9 = vrot.slane %v4518_v46, 4  ;;  %v4528_v10 = vld [vmem:[#allocation5 + $0x28] sm:$0xf]  ;;  %v4553_v44 = vld [vmem:[#allocation5 + $0x40] sm:$0x1e]  ;;  %v4625_v22 = vld [vmem:[#allocation6 + $0x18] sm:$0xff] }
 0x4a7   : > { %4432 = vst [vmem:[#allocation6 + $0xc8] sm:$0xf0] %v4428_v57  ;;  %4462 = vst [vmem:[#allocation6 + $0xd8] sm:$0xf] %v4458_v1  ;;  %v4557_v48 = vrot.slane %v4553_v44, 5  ;;  %v4629_v11 = vld [vmem:[#allocation6 + $0x38] sm:$0xff] }
 0x4a8   : > { %v4563_v12 = vld [vmem:[#allocation5 + $0x28] sm:$0x1e]  ;;  %v4593_v13 = vld [vmem:[#allocation5 + $0x40] sm:$0x3c]  ;;  %4472 = vst [vmem:[#allocation6 + $0xd8] sm:$0xf0] %v4468_v5 }
 0x4a9   : > { %4502 = vst [vmem:[#allocation6 + $0xe8] sm:$0xf] %v4498_v6  ;;  %4530 = vst [vmem:[#allocation6 + $0xf8] sm:$0xf] %v4528_v10  ;;  %v4567_v14 = vrot.slane %v4563_v12, 1  ;;  %v4597_v15 = vrot.slane %v4593_v13, 6 }
 0x4aa   : > { %v4603_v16 = vld [vmem:[#allocation5 + $0x28] sm:$0x3c]  ;;  %4512 = vst [vmem:[#allocation6 + $0xe8] sm:$0xf0] %v4508_v8  ;;  %4526 = vst [vmem:[#allocation6 + $0x68] sm:$0xf0] %v4522_v9 }
 0x4ab   : > { %v4607_v17 = vrot.slane %v4603_v16, 2  ;;  %4561 = vst [vmem:[#allocation6 + $0x78] sm:$0xf0] %v4557_v48  ;;  %4571 = vst [vmem:[#allocation6 + $0x108] sm:$0xf] %v4567_v14  ;;  %v4641_v60 = vld [vmem:[#allocation6 + $0x98] sm:$0xff] }
 0x4ac   : > { %4601 = vst [vmem:[#allocation6 + $0x88] sm:$0xf0] %v4597_v15  ;;  %v4643_v24 = vld [vmem:[#allocation6 + $0xa8] sm:$0xff]  ;;  %v4659_v25 = vpack.c.bf16 %v4641_v60, %v4623_v4  ;;  %v4645_v27 = vld [vmem:[#allocation6 + $0xb8] sm:$0xff]  ;;  %v7656_v36 = vld [vmem:[%s9480_s7 + $0x1b0] sm:$0xff]  }
 0x4ad   : > { %4611 = vst [vmem:[#allocation6 + $0x118] sm:$0xf] %v4607_v17  ;;  %v4661_v29 = vpack.c.bf16 %v4643_v24, %v4625_v22  ;;  %v4663_v33 = vpack.c.bf16 %v4645_v27, %v4627_v62  ;;  %v7657_v37 = vld [vmem:[%s9480_s7 + $0x168] sm:$0xff]   ;;  %v7661_v45 = vld [vmem:[%s9480_s7 + $0x160] sm:$0xff]   ;;  %v7665_v51 = vld [vmem:[%s9480_s7 + $0x158] sm:$0xff]  }
 0x4ae   : > { %v4647_v30 = vld [vmem:[#allocation6 + $0xc8] sm:$0xff]  ;;  %5867 = vmatprep.mubr.bf16.mxu1 %v4659_v25  ;;  %v7662_v47 = vld [vmem:[%s9480_s7 + $0x1e0] sm:$0xff]   ;;  %v7666_v52 = vld [vmem:[%s9480_s7 + $0x1d8] sm:$0xff]  }
 0x4af   : > { %5908 = vmatprep.mubr.bf16.mxu0 %v4661_v29  ;;  %5868 = vmatmul.mubr.bf16.vlgmr.msra.gmra.mxu1 %v4658_v28  ;;  %v4665_v34 = vpack.c.bf16 %v4647_v30, %v4629_v11  ;;  %v7658_v39 = vld [vmem:[%s9480_s7 + $0x1e8] sm:$0xff]   ;;  %v7663_v49 = vld [vmem:[%s9480_s7 + $0x120] sm:$0xff]   ;;  %v7667_v54 = vld [vmem:[%s9480_s7 + $0x118] sm:$0xff]  }
 0x4b0   : > { %5909 = vmatmul.mubr.bf16.vlgmr.msra.gmra.mxu0 %v4660_v23  ;;  %7019 = vmatpush3.bf16.msra.mxu1 %v7651_v20  ;;  %v7659_v40 = vld [vmem:[%s9480_s7 + $0x128] sm:$0xff]   ;;  %v7664_v50 = vld [vmem:[%s9480_s7 + $0x1a0] sm:$0xff]   ;;  %v7668_v55 = vld [vmem:[%s9480_s7 + $0x198] sm:$0xff]  }
 0x4b1   : > { %7041 = vmatpush3.bf16.msra.mxu0 %v7652_v21  ;;  %5949 = vmatprep.mubr.bf16.mxu1 %v4663_v33  ;;  %v7660_v43 = vld [vmem:[%s9480_s7 + $0x1a8] sm:$0xff]   ;;  %v7669_v56 = vld [vmem:[%s9480_s7 + $0x150] sm:$0xff]   ;;  %v7677_v53 = vld [vmem:[%s9480_s7 + $0x140] sm:$0xff]  }
 0x4b2   : > { %5990 = vmatprep.mubr.bf16.mxu0 %v4665_v34  ;;  %7020 = vmatprep.subr.bf16.mxu1 %v7653_v31  ;;  %v7670_v58 = vld [vmem:[%s9480_s7 + $0x1d0] sm:$0xff]   ;;  %v7673_v61 = vld [vmem:[%s9480_s7 + $0x148] sm:$0xff]   ;;  %v7678_v57 = vld [vmem:[%s9480_s7 + $0x1c0] sm:$0xff]  }
 0x4b3   : > { %7042 = vmatprep.subr.bf16.mxu0 %v7654_v32  ;;  %v7671_v59 = vld [vmem:[%s9480_s7 + $0x110] sm:$0xff]   ;;  %v7674_v63 = vld [vmem:[%s9480_s7 + $0x1c8] sm:$0xff]   ;;  %v7679_v1 = vld [vmem:[%s9480_s7 + $0x100] sm:$0xff]  }
 0x4b4   : > { %7021 = vmatpush3.bf16.msra.mxu1 %v7655_v35  ;;  %v7672_v42 = vld [vmem:[%s9480_s7 + $0x190] sm:$0xff]   ;;  %v7675_v0 = vld [vmem:[%s9480_s7 + $0x108] sm:$0xff]   ;;  %v7680_v2 = vld [vmem:[%s9480_s7 + $0x180] sm:$0xff]  }
 0x4b5   : > { %7043 = vmatpush3.bf16.msra.mxu0 %v7656_v36  ;;  %7022 = vmatprep.subr.bf16.mxu1 %v7657_v37  ;;  %v7676_v41 = vld [vmem:[%s9480_s7 + $0x188] sm:$0xff]   ;;  %v7681_v3 = vld [vmem:[%s9480_s7 + $0x278] sm:$0xff]   ;;  %v4644_v6 = vld [vmem:[#allocation6 + $0xb0] sm:$0xff] }
 0x4b6   : > { %7044 = vmatprep.subr.bf16.mxu0 %v7658_v39  ;;  %v7682_v5 = vld [vmem:[%s9480_s7 + $0x2f8] sm:$0xff]   ;;  %v4646_v7 = vld [vmem:[#allocation6 + $0xc0] sm:$0xff]  ;;  %v4628_v10 = vld [vmem:[#allocation6 + $0x30] sm:$0xff] }
 0x4b7   : > { %v7683_v46 = vld [vmem:[%s9480_s7 + $0x238] sm:$0xff]   ;;  %v4626_v9 = vld [vmem:[#allocation6 + $0x20] sm:$0xff]  ;;  %v4651_v44 = vld [vmem:[#allocation6 + $0xe8] sm:$0xff]  ;;  %v4664_v12 = vpack.c.bf16 %v4646_v7, %v4628_v10 }
 0x4b8   : > { %7023 = vmatpush3.bf16.msra.mxu1 %v7659_v40  ;;  %v4649_v8 = vld [vmem:[#allocation6 + $0xd8] sm:$0xff]  ;;  %v4662_v48 = vpack.c.bf16 %v4644_v6, %v4626_v9  ;;  %v4631_v13 = vld [vmem:[#allocation6 + $0x48] sm:$0xff]  ;;  %v7685_v17 = vld [vmem:[%s9480_s7 + $0x270] sm:$0xff]  }
 0x4b9   : > { %7045 = vmatpush3.bf16.msra.mxu0 %v7660_v43  ;;  %7024 = vmatprep.subr.bf16.mxu1 %v7661_v45  ;;  %v7684_v14 = vld [vmem:[%s9480_s7 + $0x2b8] sm:$0xff]   ;;  %v4667_v15 = vpack.c.bf16 %v4649_v8, %v4631_v13  ;;  %v7686_v4 = vld [vmem:[%s9480_s7 + $0x2f0] sm:$0xff]   ;;  %v7689_v21 = vld [vmem:[%s9480_s7 + $0x268] sm:$0xff]  }
 0x4ba   : > { %7046 = vmatprep.subr.bf16.mxu0 %v7662_v47  ;;  %v4633_v16 = vld [vmem:[#allocation6 + $0x58] sm:$0xff]  ;;  %v7687_v19 = vld [vmem:[%s9480_s7 + $0x230] sm:$0xff]   ;;  %v7690_v60 = vld [vmem:[%s9480_s7 + $0x2e8] sm:$0xff]  }
 0x4bb   : > { %v4669_v18 = vpack.c.bf16 %v4651_v44, %v4633_v16  ;;  %v7688_v20 = vld [vmem:[%s9480_s7 + $0x2b0] sm:$0xff]   ;;  %v7691_v22 = vld [vmem:[%s9480_s7 + $0x228] sm:$0xff]   ;;  %v7693_v25 = vld [vmem:[%s9480_s7 + $0x260] sm:$0xff]  }
 0x4bc   : > { %7025 = vmatpush3.bf16.msra.mxu1 %v7663_v49  ;;  %v7692_v24 = vld [vmem:[%s9480_s7 + $0x2a8] sm:$0xff]   ;;  %v7694_v29 = vld [vmem:[%s9480_s7 + $0x2e0] sm:$0xff]   ;;  %v7697_v27 = vld [vmem:[%s9480_s7 + $0x258] sm:$0xff]  }
 0x4bd   : > { %7047 = vmatpush3.bf16.msra.mxu0 %v7664_v50  ;;  %7026 = vmatprep.subr.bf16.mxu1 %v7665_v51  ;;  %v7695_v38 = vld [vmem:[%s9480_s7 + $0x220] sm:$0xff]   ;;  %v7698_v28 = vld [vmem:[%s9480_s7 + $0x2d8] sm:$0xff]   ;;  %v7701_v31 = vld [vmem:[%s9480_s7 + $0x250] sm:$0xff]  }
 0x4be   : > { %7048 = vmatprep.subr.bf16.mxu0 %v7666_v52  ;;  %v7696_v26 = vld [vmem:[%s9480_s7 + $0x2a0] sm:$0xff]   ;;  %v7699_v23 = vld [vmem:[%s9480_s7 + $0x218] sm:$0xff]   ;;  %v7702_v62 = vld [vmem:[%s9480_s7 + $0x2d0] sm:$0xff]  }
 0x4bf   : > { %v7700_v30 = vld [vmem:[%s9480_s7 + $0x298] sm:$0xff]   ;;  %v7703_v11 = vld [vmem:[%s9480_s7 + $0x210] sm:$0xff]   ;;  %v7705_v33 = vld [vmem:[%s9480_s7 + $0x248] sm:$0xff]  }
 0x4c0   : > { %7027 = vmatpush3.bf16.msra.mxu1 %v7667_v54  ;;  %v7704_v32 = vld [vmem:[%s9480_s7 + $0x290] sm:$0xff]   ;;  %v7706_v34 = vld [vmem:[%s9480_s7 + $0x2c8] sm:$0xff]   ;;  %v7709_v37 = vld [vmem:[%s9480_s7 + $0x240] sm:$0xff]  }
 0x4c1   : > { %7049 = vmatpush3.bf16.msra.mxu0 %v7668_v55  ;;  %7028 = vmatprep.subr.bf16.mxu1 %v7669_v56  ;;  %v7707_v35 = vld [vmem:[%s9480_s7 + $0x208] sm:$0xff]   ;;  %v7710_v39 = vld [vmem:[%s9480_s7 + $0x2c0] sm:$0xff]   ;;  %v7713_v45 = vld [vmem:[%s9480_s7 + $0x378] sm:$0xff]  }
 0x4c2   : > { %7050 = vmatprep.subr.bf16.mxu0 %v7670_v58  ;;  %v7708_v36 = vld [vmem:[%s9480_s7 + $0x288] sm:$0xff]   ;;  %v7711_v40 = vld [vmem:[%s9480_s7 + $0x200] sm:$0xff]   ;;  %v4648_v47 = vld [vmem:[#allocation6 + $0xd0] sm:$0xff] }
 0x4c3   : > { %v7712_v43 = vld [vmem:[%s9480_s7 + $0x280] sm:$0xff]   ;;  %v7714_v49 = vld [vmem:[%s9480_s7 + $0x3f8] sm:$0xff]   ;;  %v4635_v54 = vld [vmem:[#allocation6 + $0x68] sm:$0xff] }
 0x4c4   : > { %7029 = vmatpush3.bf16.msra.mxu1 %v7671_v59  ;;  %v4650_v50 = vld [vmem:[#allocation6 + $0xe0] sm:$0xff]  ;;  %v7715_v51 = vld [vmem:[%s9480_s7 + $0x338] sm:$0xff]   ;;  %v4632_v58 = vld [vmem:[#allocation6 + $0x50] sm:$0xff] }
 0x4c5   : > { %7051 = vmatpush3.bf16.msra.mxu0 %v7672_v42  ;;  %7030 = vmatprep.subr.bf16.mxu1 %v7673_v61  ;;  %v4630_v52 = vld [vmem:[#allocation6 + $0x40] sm:$0xff]  ;;  %v7716_v55 = vld [vmem:[%s9480_s7 + $0x3b8] sm:$0xff]   ;;  %v4655_v42 = vld [vmem:[#allocation6 + $0x108] sm:$0xff]  ;;  %v4668_v61 = vpack.c.bf16 %v4650_v50, %v4632_v58 }
 0x4c6   : > { %7052 = vmatprep.subr.bf16.mxu0 %v7674_v63  ;;  %v4666_v56 = vpack.c.bf16 %v4648_v47, %v4630_v52  ;;  %v4637_v59 = vld [vmem:[#allocation6 + $0x78] sm:$0xff]  ;;  %v7723_v6 = vld [vmem:[%s9480_s7 + $0x328] sm:$0xff]   ;;  %v7726_v8 = vld [vmem:[%s9480_s7 + $0x3e0] sm:$0xff]  }
 0x4c7   : > { %v4653_v63 = vld [vmem:[#allocation6 + $0xf8] sm:$0xff]  ;;  %v7724_v7 = vld [vmem:[%s9480_s7 + $0x3a8] sm:$0xff]   ;;  %v7727_v9 = vld [vmem:[%s9480_s7 + $0x320] sm:$0xff]  }
 0x4c8   : > { %7031 = vmatpush3.bf16.msra.mxu1 %v7675_v0  ;;  %v7717_v0 = vld [vmem:[%s9480_s7 + $0x370] sm:$0xff]   ;;  %v7728_v10 = vld [vmem:[%s9480_s7 + $0x3a0] sm:$0xff]   ;;  %v7729_v44 = vld [vmem:[%s9480_s7 + $0x358] sm:$0xff]  }
 0x4c9   : > { %7053 = vmatpush3.bf16.msra.mxu0 %v7676_v41  ;;  %7032 = vmatprep.subr.bf16.mxu1 %v7677_v53  ;;  %v4671_v41 = vpack.c.bf16 %v4653_v63, %v4635_v54  ;;  %v7718_v53 = vld [vmem:[%s9480_s7 + $0x3f0] sm:$0xff]   ;;  %v7732_v13 = vld [vmem:[%s9480_s7 + $0x398] sm:$0xff]   ;;  %v7757_v47 = vld [vmem:[%s9480_s7 + $0x448] sm:$0xff]  }
 0x4ca   : > { %7054 = vmatprep.subr.bf16.mxu0 %v7678_v57  ;;  %v4673_v57 = vpack.c.bf16 %v4655_v42, %v4637_v59  ;;  %v7735_v16 = vld [vmem:[%s9480_s7 + $0x310] sm:$0xff]   ;;  %v7759_v50 = vld [vmem:[%s9480_s7 + $0x440] sm:$0xff]  }
 0x4cb   : > { %v4638_v52 = vld [vmem:[#allocation6 + $0x80] sm:$0xff]  ;;  %v4656_v54 = vld [vmem:[#allocation6 + $0x110] sm:$0xff] }
 0x4cc   : > { %7033 = vmatpush3.bf16.msra.mxu1 %v7679_v1  ;;  %v7719_v1 = vld [vmem:[%s9480_s7 + $0x330] sm:$0xff]  }
 0x4cd   : > { %7055 = vmatpush3.bf16.msra.mxu0 %v7680_v2  ;;  %7062 = vmatprep.subr.bf16.mxu1 %v7681_v3  ;;  %v7720_v2 = vld [vmem:[%s9480_s7 + $0x3b0] sm:$0xff]   ;;  %v7721_v3 = vld [vmem:[%s9480_s7 + $0x368] sm:$0xff]  }
 0x4ce   : > { %7084 = vmatprep.subr.bf16.mxu0 %v7682_v5  ;;  %v7722_v5 = vld [vmem:[%s9480_s7 + $0x3e8] sm:$0xff]  }
 0x4cf   : > { %5950 = vmatmul.mubr.bf16.vlgmr.msra.gmra.mxu1 %v4662_v48  ;;  %v7730_v48 = vld [vmem:[%s9480_s7 + $0x3d8] sm:$0xff]  }
 0x4d0   : > { %5991 = vmatmul.mubr.bf16.vlgmr.msra.gmra.mxu0 %v4664_v12  ;;  %7063 = vmatpush3.bf16.msra.mxu1 %v7683_v46  ;;  %v7725_v46 = vld [vmem:[%s9480_s7 + $0x360] sm:$0xff]   ;;  %v7731_v12 = vld [vmem:[%s9480_s7 + $0x318] sm:$0xff]  }
 0x4d1   : > { %6031 = vmatprep.mubr.bf16.mxu1 %v4667_v15  ;;  %7085 = vmatpush3.bf16.msra.mxu0 %v7684_v14  ;;  %v7733_v14 = vld [vmem:[%s9480_s7 + $0x350] sm:$0xff]  }
 0x4d2   : > { %6072 = vmatprep.mubr.bf16.mxu0 %v4669_v18  ;;  %7064 = vmatprep.subr.bf16.mxu1 %v7685_v17  ;;  %v7734_v15 = vld [vmem:[%s9480_s7 + $0x3d0] sm:$0xff]   ;;  %v7738_v18 = vld [vmem:[%s9480_s7 + $0x3c8] sm:$0xff]  }
 0x4d3   : > { %7086 = vmatprep.subr.bf16.mxu0 %v7686_v4  ;;  %v7736_v17 = vld [vmem:[%s9480_s7 + $0x390] sm:$0xff]   ;;  %v7737_v4 = vld [vmem:[%s9480_s7 + $0x348] sm:$0xff]  }
 0x4d4   : > { %7065 = vmatpush3.bf16.msra.mxu1 %v7687_v19  ;;  %v7739_v19 = vld [vmem:[%s9480_s7 + $0x308] sm:$0xff]  }
 0x4d5   : > { %7087 = vmatpush3.bf16.msra.mxu0 %v7688_v20  ;;  %7066 = vmatprep.subr.bf16.mxu1 %v7689_v21  ;;  %v7740_v20 = vld [vmem:[%s9480_s7 + $0x388] sm:$0xff]   ;;  %v7741_v21 = vld [vmem:[%s9480_s7 + $0x340] sm:$0xff]  }
 0x4d6   : > { %7088 = vmatprep.subr.bf16.mxu0 %v7690_v60  ;;  %v7742_v60 = vld [vmem:[%s9480_s7 + $0x3c0] sm:$0xff]  }
 0x4d8   : > { %7067 = vmatpush3.bf16.msra.mxu1 %v7691_v22  ;;  %v7743_v22 = vld [vmem:[%s9480_s7 + $0x300] sm:$0xff]  }
 0x4d9   : > { %7089 = vmatpush3.bf16.msra.mxu0 %v7692_v24  ;;  %7068 = vmatprep.subr.bf16.mxu1 %v7693_v25  ;;  %v7744_v24 = vld [vmem:[%s9480_s7 + $0x380] sm:$0xff]   ;;  %v7745_v25 = vld [vmem:[%s9480_s7 + $0x478] sm:$0xff]  }
 0x4da   : > { %7090 = vmatprep.subr.bf16.mxu0 %v7694_v29  ;;  %v4634_v29 = vld [vmem:[#allocation6 + $0x60] sm:$0xff] }
 0x4dc   : > { %7069 = vmatpush3.bf16.msra.mxu1 %v7695_v38  ;;  %v4636_v38 = vld [vmem:[#allocation6 + $0x70] sm:$0xff] }
 0x4dd   : > { %7091 = vmatpush3.bf16.msra.mxu0 %v7696_v26  ;;  %7070 = vmatprep.subr.bf16.mxu1 %v7697_v27  ;;  %v4654_v26 = vld [vmem:[#allocation6 + $0x100] sm:$0xff]  ;;  %v7746_v27 = vld [vmem:[%s9480_s7 + $0x438] sm:$0xff]  }
 0x4de   : > { %7092 = vmatprep.subr.bf16.mxu0 %v7698_v28  ;;  %v4652_v28 = vld [vmem:[#allocation6 + $0xf0] sm:$0xff] }
 0x4e0   : > { %7071 = vmatpush3.bf16.msra.mxu1 %v7699_v23  ;;  %v4639_v23 = vld [vmem:[#allocation6 + $0x88] sm:$0xff] }
 0x4e1   : > { %7093 = vmatpush3.bf16.msra.mxu0 %v7700_v30  ;;  %7072 = vmatprep.subr.bf16.mxu1 %v7701_v31  ;;  %v4657_v30 = vld [vmem:[#allocation6 + $0x118] sm:$0xff]  ;;  %v4670_v31 = vpack.c.bf16 %v4652_v28, %v4634_v29 }
 0x4e2   : > { %7094 = vmatprep.subr.bf16.mxu0 %v7702_v62  ;;  %v7747_v62 = vld [vmem:[%s9480_s7 + $0x470] sm:$0xff]  }
 0x4e4   : > { %7073 = vmatpush3.bf16.msra.mxu1 %v7703_v11  ;;  %v4672_v11 = vpack.c.bf16 %v4654_v26, %v4636_v38 }
 0x4e5   : > { %7095 = vmatpush3.bf16.msra.mxu0 %v7704_v32  ;;  %7074 = vmatprep.subr.bf16.mxu1 %v7705_v33  ;;  %v4675_v32 = vpack.c.bf16 %v4657_v30, %v4639_v23  ;;  %v7748_v33 = vld [vmem:[%s9480_s7 + $0x430] sm:$0xff]  }
 0x4e6   : > { %7096 = vmatprep.subr.bf16.mxu0 %v7706_v34  ;;  %v7749_v34 = vld [vmem:[%s9480_s7 + $0x468] sm:$0xff]  }
 0x4e8   : > { %7075 = vmatpush3.bf16.msra.mxu1 %v7707_v35  ;;  %v7750_v35 = vld [vmem:[%s9480_s7 + $0x428] sm:$0xff]  }
 0x4e9   : > { %7097 = vmatpush3.bf16.msra.mxu0 %v7708_v36  ;;  %7076 = vmatprep.subr.bf16.mxu1 %v7709_v37  ;;  %v7751_v36 = vld [vmem:[%s9480_s7 + $0x460] sm:$0xff]  }
 0x4ea   : > { %7098 = vmatprep.subr.bf16.mxu0 %v7710_v39  ;;  %v7752_v37 = vld [vmem:[%s9480_s7 + $0x420] sm:$0xff]   ;;  %v7753_v39 = vld [vmem:[%s9480_s7 + $0x458] sm:$0xff]  }
 0x4ec   : > { %7077 = vmatpush3.bf16.msra.mxu1 %v7711_v40  ;;  %v7754_v40 = vld [vmem:[%s9480_s7 + $0x418] sm:$0xff]  }
 0x4ed   : > { %7099 = vmatpush3.bf16.msra.mxu0 %v7712_v43  ;;  %7106 = vmatprep.subr.bf16.mxu1 %v7713_v45  ;;  %v7755_v43 = vld [vmem:[%s9480_s7 + $0x450] sm:$0xff]  }
 0x4ee   : > { %7128 = vmatprep.subr.bf16.mxu0 %v7714_v49  ;;  %v7756_v45 = vld [vmem:[%s9480_s7 + $0x410] sm:$0xff]   ;;  %v7758_v49 = vld [vmem:[%s9480_s7 + $0x408] sm:$0xff]  }
 0x4ef   : > { %6032 = vmatmul.mubr.bf16.vlgmr.msra.gmra.mxu1 %v4666_v56 }
 0x4f0   : > { %6073 = vmatmul.mubr.bf16.vlgmr.msra.gmra.mxu0 %v4668_v61  ;;  %7107 = vmatpush3.bf16.msra.mxu1 %v7715_v51  ;;  %v7760_v51 = vld [vmem:[%s9480_s7 + $0x400] sm:$0xff]  }
 0x4f1   : > { %6113 = vmatprep.mubr.bf16.mxu1 %v4671_v41  ;;  %7129 = vmatpush3.bf16.msra.mxu0 %v7716_v55  ;;  %v4674_v55 = vpack.c.bf16 %v4656_v54, %v4638_v52 }
 0x4f2   : > { %6154 = vmatprep.mubr.bf16.mxu0 %v4673_v57  ;;  %7108 = vmatprep.subr.bf16.mxu1 %v7717_v0 }
 0x4f3   : > { %7130 = vmatprep.subr.bf16.mxu0 %v7718_v53 }
 0x4f4   : > { %7109 = vmatpush3.bf16.msra.mxu1 %v7719_v1 }
 0x4f5   : > { %7131 = vmatpush3.bf16.msra.mxu0 %v7720_v2  ;;  %7110 = vmatprep.subr.bf16.mxu1 %v7721_v3 }
 0x4f6   : > { %7132 = vmatprep.subr.bf16.mxu0 %v7722_v5 }
 0x4f8   : > { %7111 = vmatpush3.bf16.msra.mxu1 %v7723_v6 }
 0x4f9   : > { %7133 = vmatpush3.bf16.msra.mxu0 %v7724_v7  ;;  %7112 = vmatprep.subr.bf16.mxu1 %v7725_v46 }
 0x4fa   : > { %7134 = vmatprep.subr.bf16.mxu0 %v7726_v8 }
 0x4fc   : > { %7113 = vmatpush3.bf16.msra.mxu1 %v7727_v9 }
 0x4fd   : > { %7135 = vmatpush3.bf16.msra.mxu0 %v7728_v10  ;;  %7114 = vmatprep.subr.bf16.mxu1 %v7729_v44  ;;  %v6624_v44 = vld [vmem:[%s9481_s8] ss:$0 sm:$0xff] }
 0x4fe   : > { %7136 = vmatprep.subr.bf16.mxu0 %v7730_v48 }
 0x500   : > { %7115 = vmatpush3.bf16.msra.mxu1 %v7731_v12 }
 0x501   : > { %7137 = vmatpush3.bf16.msra.mxu0 %v7732_v13  ;;  %7116 = vmatprep.subr.bf16.mxu1 %v7733_v14 }
 0x502   : > { %7138 = vmatprep.subr.bf16.mxu0 %v7734_v15 }
 0x504   : > { %7117 = vmatpush3.bf16.msra.mxu1 %v7735_v16 }
 0x505   : > { %7139 = vmatpush3.bf16.msra.mxu0 %v7736_v17  ;;  %7118 = vmatprep.subr.bf16.mxu1 %v7737_v4 }
 0x506   : > { %7140 = vmatprep.subr.bf16.mxu0 %v7738_v18 }
 0x508   : > { %7119 = vmatpush3.bf16.msra.mxu1 %v7739_v19 }
 0x509   : > { %7141 = vmatpush3.bf16.msra.mxu0 %v7740_v20  ;;  %7120 = vmatprep.subr.bf16.mxu1 %v7741_v21 }
 0x50a   : > { %7142 = vmatprep.subr.bf16.mxu0 %v7742_v60 }
 0x50c   : > { %7121 = vmatpush3.bf16.msra.mxu1 %v7743_v22 }
 0x50d   : > { %7143 = vmatpush3.bf16.msra.mxu0 %v7744_v24  ;;  %7150 = vmatprep.subr.bf16.mxu1 %v7745_v25 }
 0x50f   : > { %6114 = vmatmul.mubr.bf16.vlgmr.msra.gmra.mxu1 %v4670_v31 }
 0x510   : > { %6155 = vmatmul.mubr.bf16.vlgmr.msra.gmra.mxu0 %v4672_v11  ;;  %7151 = vmatpush3.bf16.msra.mxu1 %v7746_v27 }
 0x511   : > { %6195 = vmatprep.mubr.bf16.mxu1 %v4675_v32  ;;  %7152 = vmatprep.subr.bf16.mxu1 %v7747_v62 }
 0x514   : > { %7153 = vmatpush3.bf16.msra.mxu1 %v7748_v33 }
 0x515   : > { %7154 = vmatprep.subr.bf16.mxu1 %v7749_v34 }
 0x518   : > { %7155 = vmatpush3.bf16.msra.mxu1 %v7750_v35 }
 0x519   : > { %7156 = vmatprep.subr.bf16.mxu1 %v7751_v36 }
 0x51c   : > { %7157 = vmatpush3.bf16.msra.mxu1 %v7752_v37 }
 0x51d   : > { %7158 = vmatprep.subr.bf16.mxu1 %v7753_v39 }
 0x520   : > { %7159 = vmatpush3.bf16.msra.mxu1 %v7754_v40 }
 0x521   : > { %7160 = vmatprep.subr.bf16.mxu1 %v7755_v43 }
 0x524   : > { %7161 = vmatpush3.bf16.msra.mxu1 %v7756_v45 }
 0x525   : > { %7162 = vmatprep.subr.bf16.mxu1 %v7757_v47 }
 0x528   : > { %7163 = vmatpush3.bf16.msra.mxu1 %v7758_v49 }
 0x529   : > { %7164 = vmatprep.subr.bf16.mxu1 %v7759_v50 }
 0x52c   : > { %7165 = vmatpush3.bf16.msra.mxu1 %v7760_v51 }
 0x52f   : > { %6196 = vmatmul.mubr.bf16.vlgmr.msra.gmra.mxu1 %v4674_v55 }
 0x56f   : > { %v6990_v56 = vpop.f32.mrf.mxu1 }
 0x570   : > { %v7012_v59 = vpop.f32.mrf.mxu0 }
 0x571   : > { %v6991_v58 = vpop.f32.mrf.mxu1 }
 0x572   : > { %v7013_v61 = vpop.f32.mrf.mxu0  ;;  %v6992_v10 = vadd.f32 %v6991_v58, %v6990_v56 }
 0x573   : > { %v6993_v42 = vpop.f32.mrf.mxu1  ;;  %v7014_v16 = vadd.f32 %v7013_v61, %v7012_v59 }
 0x574   : > { %v7015_v0 = vpop.f32.mrf.mxu0  ;;  %v5870_v13 = vadd.f32 %v6992_v10, %v6624_v44 }
 0x575   : > { %v6994_v63 = vpop.f32.mrf.mxu1 }
 0x576   : > { %v7016_v53 = vpop.f32.mrf.mxu0  ;;  %v6995_v14 = vadd.f32 %v6994_v63, %v6993_v42  ;;  %v5911_v19 = vadd.f32 %v7014_v16, %v5870_v13 }
 0x577   : > { %v7017_v21 = vadd.f32 %v7016_v53, %v7015_v0 }
 0x578   : > { %v5873_v20 = vadd.f32 %v6995_v14, %v6624_v44 }
 0x57a   : > { %v5914_v29 = vadd.f32 %v7017_v21, %v5873_v20 }
 0x58f   : > { %v7034_v41 = vpop.f32.mrf.mxu1 }
 0x590   : > { %v7056_v1 = vpop.f32.mrf.mxu0 }
 0x591   : > { %v7035_v57 = vpop.f32.mrf.mxu1 }
 0x592   : > { %v7057_v3 = vpop.f32.mrf.mxu0  ;;  %v7036_v17 = vadd.f32 %v7035_v57, %v7034_v41 }
 0x593   : > { %v7037_v2 = vpop.f32.mrf.mxu1  ;;  %v7058_v38 = vadd.f32 %v7057_v3, %v7056_v1 }
 0x594   : > { %v7059_v6 = vpop.f32.mrf.mxu0  ;;  %v5952_v60 = vadd.f32 %v7036_v17, %v5911_v19 }
 0x595   : > { %v7038_v5 = vpop.f32.mrf.mxu1 }
 0x596   : > { %v7060_v46 = vpop.f32.mrf.mxu0  ;;  %v7039_v22 = vadd.f32 %v7038_v5, %v7037_v2  ;;  %v5993_v28 = vadd.f32 %v7058_v38, %v5952_v60 }
 0x597   : > { %v7061_v31 = vadd.f32 %v7060_v46, %v7059_v6 }
 0x598   : > { %v5955_v23 = vadd.f32 %v7039_v22, %v5914_v29 }
 0x59a   : > { %v5996_v33 = vadd.f32 %v7061_v31, %v5955_v23 }
 0x5af   : > { %v7078_v7 = vpop.f32.mrf.mxu1 }
 0x5b0   : > { %v7100_v9 = vpop.f32.mrf.mxu0 }
 0x5b1   : > { %v7079_v8 = vpop.f32.mrf.mxu1 }
 0x5b2   : > { %v7101_v12 = vpop.f32.mrf.mxu0  ;;  %v7080_v26 = vadd.f32 %v7079_v8, %v7078_v7 }
 0x5b3   : > { %v7081_v48 = vpop.f32.mrf.mxu1  ;;  %v7102_v34 = vadd.f32 %v7101_v12, %v7100_v9 }
 0x5b4   : > { %v7103_v4 = vpop.f32.mrf.mxu0  ;;  %v6034_v62 = vadd.f32 %v7080_v26, %v5993_v28 }
 0x5b5   : > { %v7082_v15 = vpop.f32.mrf.mxu1 }
 0x5b6   : > { %v7104_v24 = vpop.f32.mrf.mxu0  ;;  %v7083_v11 = vadd.f32 %v7082_v15, %v7081_v48  ;;  %v6075_v37 = vadd.f32 %v7102_v34, %v6034_v62 }
 0x5b7   : > { %v7105_v43 = vadd.f32 %v7104_v24, %v7103_v4 }
 0x5b8   : > { %v6037_v39 = vadd.f32 %v7083_v11, %v5996_v33 }
 0x5ba   : > { %v6078_v50 = vadd.f32 %v7105_v43, %v6037_v39 }
 0x5cf   : > { %v7122_v18 = vpop.f32.mrf.mxu1 }
 0x5d0   : > { %v7144_v27 = vpop.f32.mrf.mxu0 }
 0x5d1   : > { %v7123_v25 = vpop.f32.mrf.mxu1 }
 0x5d2   : > { %v7145_v32 = vpop.f32.mrf.mxu0  ;;  %v7124_v35 = vadd.f32 %v7123_v25, %v7122_v18 }
 0x5d3   : > { %v7125_v30 = vpop.f32.mrf.mxu1  ;;  %v7146_v51 = vadd.f32 %v7145_v32, %v7144_v27 }
 0x5d4   : > { %v7147_v40 = vpop.f32.mrf.mxu0  ;;  %v6116_v45 = vadd.f32 %v7124_v35, %v6075_v37 }
 0x5d5   : > { %v7126_v36 = vpop.f32.mrf.mxu1 }
 0x5d6   : > { %v7127_v47 = vadd.f32 %v7126_v36, %v7125_v30  ;;  %v7148_v52 = vpop.f32.mrf.mxu0  ;;  %v6157_v55 = vadd.f32 %v7146_v51, %v6116_v45 }
 0x5d7   : > { %v7149_v42 = vadd.f32 %v7148_v52, %v7147_v40 }
 0x5d8   : > { %v6119_v56 = vadd.f32 %v7127_v47, %v6078_v50 }
 0x5da   : > { %v6160_v0 = vadd.f32 %v7149_v42, %v6119_v56 }
 0x5ef   : > { %v7166_v49 = vpop.f32.mrf.mxu1 }
 0x5f1   : > { %v7167_v54 = vpop.f32.mrf.mxu1 }
 0x5f2   : > { %v7168_v58 = vadd.f32 %v7167_v54, %v7166_v49 }
 0x5f3   : > { %v7169_v59 = vpop.f32.mrf.mxu1 }
 0x5f4   : > { %v6198_v61 = vadd.f32 %v7168_v58, %v6157_v55 }
 0x5f5   : > { %v7170_v63 = vpop.f32.mrf.mxu1 }
 0x5f6   : > { %7761 = vtanh.f32 %v6198_v61  ;;  %v7171_v41 = vadd.f32 %v7170_v63, %v7169_v59 }
 0x5f8   : > { %v6201_v53 = vadd.f32 %v7171_v41, %v6160_v0 }
 0x5fa   : > { %7763 = vtanh.f32 %v6201_v53 }
 0x603   : > { %v7762_v57 = vpop.eup %7761 }
 0x604   : > { %6206 = vst.msk [vmem:[%s332_s11] sm:$0xf] %vm373_vm1, %v7762_v57 }
 0x605   : > { %6769 = vst.msk [vmem:[%s332_s11] sm:$0xf0] %vm393_vm2, %v7762_v57 }
 0x607   : > { %v7764_v1 = vpop.eup %7763 }
 0x608   : > { %6770 = vst.msk [vmem:[%s332_s11 + $0x8] sm:$0xf] %vm373_vm1, %v7764_v1 }
 0x609   : > { %6771 = vst.msk [vmem:[%s332_s11 + $0x8] sm:$0xf0] %vm393_vm2, %v7764_v1 }
 0x60a PF: > { %s19_s30 = sadd.s32 1, %s7771_s30  }
 0x60b   : > { %p16_p4 = scmp.ge.s32.totalorder %s19_s30, 4  }
 0x60d   :  { %18 = sbr.rel (!%p16_p4) target bundleno = 1 (0x1), region = 112 }

</bundles_post_ra>
